<compile_context>
chip_gen: v7x
topology: tpu7x:2x2x1
jax: 0.10.0
libtpu: 0.0.40
codegen_flags: <defaults>
</compile_context>

<pallas_src>
import functools

import jax
import jax.numpy as jnp
from jax.experimental import pallas as pl
from jax.experimental.pallas import tpu as pltpu

# ----------------------------- config (small, deterministic) ----------------
D_MODEL = 32
N_HEADS = 4
HEAD_DIM = D_MODEL // N_HEADS
FFN_DIM = 64
N_LAYERS = 2
VOCAB = 50
MAX_POS = 64
SENTI_NUMS = 3

BATCH = 2
DEC_SEQ = 8
ENC_SEQ = 8

LN_EPS = 1e-5


# ----------------------------- fused Pallas kernel ---------------------------
def _fused_kernel(labels_ref,                      # SMEM [B] int32
                  x_ref, enc_ref, amask_ref,       # VMEM activations / mask
                  emb_ln_w, emb_ln_b,
                  sa_qkv_w, sa_qkv_b, sa_o_w, sa_o_b, sa_ln_w, sa_ln_b,
                  ca_qkv_w, ca_qkv_b, ca_o_w, ca_o_b, ca_ln_w, ca_ln_b,
                  fc1_w, fc1_b, fc2_w, fc2_b, fin_ln_w, fin_ln_b,
                  hd_w, hd_b, ho_w, ho_b,
                  loss_ref, logits_ref,            # outputs
                  attn_buf,                        # VMEM scratch [B*T, D]
                  *, batch, dec_len, enc_len):
    B, T, Te = batch, dec_len, enc_len
    D, H, HD, C = D_MODEL, N_HEADS, HEAD_DIM, SENTI_NUMS
    f32 = jnp.float32

    def ln(v, w, b):
        mu = jnp.mean(v, axis=-1, keepdims=True)
        var = jnp.mean(jnp.square(v - mu), axis=-1, keepdims=True)
        return (v - mu) * jax.lax.rsqrt(var + LN_EPS) * w + b

    def mm(a, w):
        return jnp.dot(a, w, preferred_element_type=f32)

    def attention(q, k, v, o_w_l, o_b_row, bias, Tk):
        # q: [B*T, D]; k, v: [B*Tk, D]; bias: None or additive [B, Tk].
        # Output projection is decomposed per head: concat_h(o_h) @ Wo
        #   == sum_h o_h @ Wo[h*HD:(h+1)*HD, :]  -> no head concat needed.
        for b in range(B):
            acc = jnp.zeros((T, D), f32)
            for h in range(H):
                qh = q[b * T:(b + 1) * T, h * HD:(h + 1) * HD]
                kh = k[b * Tk:(b + 1) * Tk, h * HD:(h + 1) * HD]
                vh = v[b * Tk:(b + 1) * Tk, h * HD:(h + 1) * HD]
                s = jax.lax.dot_general(qh, kh, (((1,), (1,)), ((), ())),
                                        preferred_element_type=f32)      # [T, Tk]
                if bias is not None:
                    s = s + bias[b:b + 1, :]
                s = s - jnp.max(s, axis=-1, keepdims=True)
                p = jnp.exp(s)
                p = p * pl.reciprocal(jnp.sum(p, axis=-1, keepdims=True),
                                      approx=True)
                oh = mm(p, vh)                                            # [T, HD]
                acc = acc + mm(oh, o_w_l[h * HD:(h + 1) * HD, :])         # [T, D]
            attn_buf[b * T:(b + 1) * T, :] = acc
        return attn_buf[...] + o_b_row                                     # [B*T, D]

    # embedding layer-norm (token+position sum computed in the wrapper)
    x = ln(x_ref[...], emb_ln_w[...], emb_ln_b[...])                       # [B*T, D]
    enc = enc_ref[...]                                                     # [B*Te, D]
    # encoder_padding_mask: 1 = valid -> additive -1e9 on padded positions
    cross_bias = (amask_ref[...] - 1.0) * 1e9                              # [B, Te]

    for l in range(N_LAYERS):
        # ---- self-attention (decoder_padding_mask=None, causal_mask=None: no mask) ----
        resid = x
        qkv = mm(x, sa_qkv_w[l]) + sa_qkv_b[l:l + 1, :]                    # [B*T, 3D]
        a = attention(qkv[:, :D], qkv[:, D:2 * D], qkv[:, 2 * D:],
                      sa_o_w[l], sa_o_b[l:l + 1, :], None, T)
        x = ln(resid + a, sa_ln_w[l:l + 1, :], sa_ln_b[l:l + 1, :])

        # ---- cross-attention over encoder hidden states ----
        resid = x
        q = mm(x, ca_qkv_w[l][:, :D]) + ca_qkv_b[l:l + 1, :D]
        kv = mm(enc, ca_qkv_w[l][:, D:]) + ca_qkv_b[l:l + 1, D:]
        a = attention(q, kv[:, :D], kv[:, D:],
                      ca_o_w[l], ca_o_b[l:l + 1, :], cross_bias, Te)
        x = ln(resid + a, ca_ln_w[l:l + 1, :], ca_ln_b[l:l + 1, :])

        # ---- feed-forward ----
        resid = x
        ffn = mm(x, fc1_w[l]) + fc1_b[l:l + 1, :]
        # TODO(synk): torch F.gelu is erf-based; tanh approximation kept for Mosaic safety.
        ffn = jax.nn.gelu(ffn, approximate=True)
        ffn = mm(ffn, fc2_w[l]) + fc2_b[l:l + 1, :]
        x = ln(resid + ffn, fin_ln_w[l:l + 1, :], fin_ln_b[l:l + 1, :])

    # ---- classification head on decoder_outputs[0][:, 1] + cross-entropy ----
    loss_acc = jnp.zeros((1, 1), f32)
    for b in range(B):
        cls = x[b * T + 1:b * T + 2, :]                                    # [1, D]
        hcls = jnp.tanh(mm(cls, hd_w[...]) + hd_b[...])
        logit = mm(hcls, ho_w[...]) + ho_b[...]                            # [1, C]
        logits_ref[b:b + 1, :] = logit
        z = logit - jnp.max(logit, axis=-1, keepdims=True)
        lse = jnp.log(jnp.sum(jnp.exp(z), axis=-1, keepdims=True))
        onehot = (jax.lax.broadcasted_iota(jnp.int32, (1, C), 1)
                  == labels_ref[b]).astype(f32)
        loss_acc = loss_acc - jnp.sum(onehot * (z - lse), axis=1, keepdims=True)
    loss_ref[...] = loss_acc * (1.0 / B)


# ----------------------------- wrapper ---------------------------------------
@jax.jit
def sentiment_forward(params, senti_labels, encoder_outputs, attention_mask,
                      senti_decoder_input_ids):
    B, T = senti_decoder_input_ids.shape
    Tenc = encoder_outputs.shape[1]
    D = D_MODEL

    # TODO(synk): data-dependent token embedding gather stays in XLA (jnp.take);
    # everything downstream is one fused Pallas launch.
    tok = jnp.take(params["embed_tokens"], senti_decoder_input_ids.reshape(-1), axis=0)
    pos = params["embed_positions"][2:2 + T]                     # BART +2 offset
    x = (tok.reshape(B, T, D) + pos[None, :, :]).reshape(B * T, D)

    enc = encoder_outputs.reshape(B * Tenc, D)
    amask = attention_mask.astype(jnp.float32)
    labels = senti_labels.astype(jnp.int32)

    operands = (labels, x, enc, amask,
                params["emb_ln_w"], params["emb_ln_b"],
                params["sa_qkv_w"], params["sa_qkv_b"],
                params["sa_o_w"], params["sa_o_b"],
                params["sa_ln_w"], params["sa_ln_b"],
                params["ca_qkv_w"], params["ca_qkv_b"],
                params["ca_o_w"], params["ca_o_b"],
                params["ca_ln_w"], params["ca_ln_b"],
                params["fc1_w"], params["fc1_b"],
                params["fc2_w"], params["fc2_b"],
                params["fin_ln_w"], params["fin_ln_b"],
                params["hd_w"], params["hd_b"],
                params["ho_w"], params["ho_b"])

    vmem = pl.BlockSpec(memory_space=pltpu.MemorySpace.VMEM)
    smem = pl.BlockSpec(memory_space=pltpu.MemorySpace.SMEM)

    loss, logits = pl.pallas_call(
        functools.partial(_fused_kernel, batch=B, dec_len=T, enc_len=Tenc),
        out_shape=(jax.ShapeDtypeStruct((1, 1), jnp.float32),
                   jax.ShapeDtypeStruct((B, SENTI_NUMS), jnp.float32)),
        in_specs=[smem] + [vmem] * (len(operands) - 1),
        out_specs=(vmem, vmem),
        scratch_shapes=[pltpu.VMEM((B * T, D), jnp.float32)],
    )(*operands)
    return loss[0, 0], logits


# ----------------------------- parameter init --------------------------------
def init_params(key):
    keys = iter(jax.random.split(key, 64))

    def nrm(shape):
        return jax.random.normal(next(keys), shape, jnp.float32) * 0.02

    def zeros(shape):
        return jnp.zeros(shape, jnp.float32)

    def ones(shape):
        return jnp.ones(shape, jnp.float32)

    scale = HEAD_DIM ** -0.5

    def attn_qkv():
        # torch stores Linear weights as [out, in]; we keep [in, out] so y = x @ W + b.
        q_w, k_w, v_w = nrm((D_MODEL, D_MODEL)), nrm((D_MODEL, D_MODEL)), nrm((D_MODEL, D_MODEL))
        q_b, k_b, v_b = zeros((D_MODEL,)), zeros((D_MODEL,)), zeros((D_MODEL,))
        # fold 1/sqrt(head_dim) into the q projection (weights AND bias)
        w = jnp.concatenate([q_w * scale, k_w, v_w], axis=1)      # [D, 3D]
        b = jnp.concatenate([q_b * scale, k_b, v_b], axis=0)      # [3D]
        return w, b

    names = ["sa_qkv_w", "sa_qkv_b", "sa_o_w", "sa_o_b", "sa_ln_w", "sa_ln_b",
             "ca_qkv_w", "ca_qkv_b", "ca_o_w", "ca_o_b", "ca_ln_w", "ca_ln_b",
             "fc1_w", "fc1_b", "fc2_w", "fc2_b", "fin_ln_w", "fin_ln_b"]
    fields = {k: [] for k in names}
    for _ in range(N_LAYERS):
        w, b = attn_qkv()
        fields["sa_qkv_w"].append(w); fields["sa_qkv_b"].append(b)
        fields["sa_o_w"].append(nrm((D_MODEL, D_MODEL))); fields["sa_o_b"].append(zeros((D_MODEL,)))
        fields["sa_ln_w"].append(ones((D_MODEL,))); fields["sa_ln_b"].append(zeros((D_MODEL,)))
        w, b = attn_qkv()
        fields["ca_qkv_w"].append(w); fields["ca_qkv_b"].append(b)
        fields["ca_o_w"].append(nrm((D_MODEL, D_MODEL))); fields["ca_o_b"].append(zeros((D_MODEL,)))
        fields["ca_ln_w"].append(ones((D_MODEL,))); fields["ca_ln_b"].append(zeros((D_MODEL,)))
        fields["fc1_w"].append(nrm((D_MODEL, FFN_DIM))); fields["fc1_b"].append(zeros((FFN_DIM,)))
        fields["fc2_w"].append(nrm((FFN_DIM, D_MODEL))); fields["fc2_b"].append(zeros((D_MODEL,)))
        fields["fin_ln_w"].append(ones((D_MODEL,))); fields["fin_ln_b"].append(zeros((D_MODEL,)))

    params = {k: jnp.stack(v, axis=0) for k, v in fields.items()}   # leading layer axis
    params.update({
        "embed_tokens": nrm((VOCAB, D_MODEL)),
        "embed_positions": nrm((MAX_POS + 2, D_MODEL)),
        "emb_ln_w": ones((1, D_MODEL)), "emb_ln_b": zeros((1, D_MODEL)),
        "hd_w": nrm((D_MODEL, D_MODEL)), "hd_b": zeros((1, D_MODEL)),
        "ho_w": nrm((D_MODEL, SENTI_NUMS)), "ho_b": zeros((1, SENTI_NUMS)),
    })
    return params


# ----------------------------- main -------------------------------------------
if __name__ == "__main__":
    key = jax.random.PRNGKey(0)
    k_param, k_enc, k_ids, k_lab = jax.random.split(key, 4)

    params = init_params(k_param)

    encoder_outputs = jax.random.normal(k_enc, (BATCH, ENC_SEQ, D_MODEL), jnp.float32)
    attention_mask = jnp.concatenate(
        [jnp.ones((BATCH, ENC_SEQ - 2), jnp.int32),
         jnp.zeros((BATCH, 2), jnp.int32)], axis=1)          # last 2 enc tokens pad
    senti_decoder_input_ids = jax.random.randint(
        k_ids, (BATCH, DEC_SEQ), 0, VOCAB, dtype=jnp.int32)
    senti_labels = jax.random.randint(k_lab, (BATCH,), 0, SENTI_NUMS, dtype=jnp.int32)

    senti_loss, predict_senti = sentiment_forward(
        params, senti_labels, encoder_outputs, attention_mask,
        senti_decoder_input_ids)

    jax.block_until_ready((senti_loss, predict_senti))
    assert predict_senti.shape == (BATCH, SENTI_NUMS)
    assert senti_loss.shape == ()
    print("KERNEL_OK")
</pallas_src>

<mosaic_0001>
module attributes {stable_mosaic.version = 11 : i64} {
  func.func @_fused_kernel(%arg0: memref<2xi32, #tpu.memory_space<smem>>, %arg1: memref<16x32xf32, #tpu.memory_space<vmem>>, %arg2: memref<16x32xf32, #tpu.memory_space<vmem>>, %arg3: memref<2x8xf32, #tpu.memory_space<vmem>>, %arg4: memref<1x32xf32, #tpu.memory_space<vmem>>, %arg5: memref<1x32xf32, #tpu.memory_space<vmem>>, %arg6: memref<2x32x96xf32, #tpu.memory_space<vmem>>, %arg7: memref<2x96xf32, #tpu.memory_space<vmem>>, %arg8: memref<2x32x32xf32, #tpu.memory_space<vmem>>, %arg9: memref<2x32xf32, #tpu.memory_space<vmem>>, %arg10: memref<2x32xf32, #tpu.memory_space<vmem>>, %arg11: memref<2x32xf32, #tpu.memory_space<vmem>>, %arg12: memref<2x32x96xf32, #tpu.memory_space<vmem>>, %arg13: memref<2x96xf32, #tpu.memory_space<vmem>>, %arg14: memref<2x32x32xf32, #tpu.memory_space<vmem>>, %arg15: memref<2x32xf32, #tpu.memory_space<vmem>>, %arg16: memref<2x32xf32, #tpu.memory_space<vmem>>, %arg17: memref<2x32xf32, #tpu.memory_space<vmem>>, %arg18: memref<2x32x64xf32, #tpu.memory_space<vmem>>, %arg19: memref<2x64xf32, #tpu.memory_space<vmem>>, %arg20: memref<2x64x32xf32, #tpu.memory_space<vmem>>, %arg21: memref<2x32xf32, #tpu.memory_space<vmem>>, %arg22: memref<2x32xf32, #tpu.memory_space<vmem>>, %arg23: memref<2x32xf32, #tpu.memory_space<vmem>>, %arg24: memref<32x32xf32, #tpu.memory_space<vmem>>, %arg25: memref<1x32xf32, #tpu.memory_space<vmem>>, %arg26: memref<32x3xf32, #tpu.memory_space<vmem>>, %arg27: memref<1x3xf32, #tpu.memory_space<vmem>>, %arg28: memref<1x1xf32, #tpu.memory_space<vmem>>, %arg29: memref<2x3xf32, #tpu.memory_space<vmem>>, %arg30: memref<16x32xf32, #tpu.memory_space<vmem>>) attributes {dimension_semantics = [], scalar_prefetch = 0 : i64, scratch_operands = 1 : i64, tpu.core_type = #tpu.core_type<tc>} {
    %c0 = arith.constant 0 : index
    %c0_0 = arith.constant 0 : index
    %0 = vector.load %arg1[%c0, %c0_0] : memref<16x32xf32, #tpu.memory_space<vmem>>, vector<16x32xf32>
    %c0_1 = arith.constant 0 : index
    %c0_2 = arith.constant 0 : index
    %1 = vector.load %arg4[%c0_1, %c0_2] : memref<1x32xf32, #tpu.memory_space<vmem>>, vector<1x32xf32>
    %c0_3 = arith.constant 0 : index
    %c0_4 = arith.constant 0 : index
    %2 = vector.load %arg5[%c0_3, %c0_4] : memref<1x32xf32, #tpu.memory_space<vmem>>, vector<1x32xf32>
    %cst = arith.constant dense<0.000000e+00> : vector<16xf32>
    %3 = vector.multi_reduction <add>, %0, %cst [1] : vector<16x32xf32> to vector<16xf32>
    %4 = vector.shape_cast %3 : vector<16xf32> to vector<16x1xf32>
    %cst_5 = arith.constant 3.200000e+01 : f32
    %5 = vector.broadcast %cst_5 : f32 to vector<16x1xf32>
    %6 = arith.divf %4, %5 : vector<16x1xf32>
    %7 = vector.broadcast %6 : vector<16x1xf32> to vector<16x32xf32>
    %8 = arith.subf %0, %7 : vector<16x32xf32>
    %9 = arith.mulf %8, %8 : vector<16x32xf32>
    %cst_6 = arith.constant dense<0.000000e+00> : vector<16xf32>
    %10 = vector.multi_reduction <add>, %9, %cst_6 [1] : vector<16x32xf32> to vector<16xf32>
    %11 = vector.shape_cast %10 : vector<16xf32> to vector<16x1xf32>
    %cst_7 = arith.constant 3.200000e+01 : f32
    %12 = vector.broadcast %cst_7 : f32 to vector<16x1xf32>
    %13 = arith.divf %11, %12 : vector<16x1xf32>
    %14 = vector.broadcast %6 : vector<16x1xf32> to vector<16x32xf32>
    %15 = arith.subf %0, %14 : vector<16x32xf32>
    %cst_8 = arith.constant 9.99999974E-6 : f32
    %16 = vector.broadcast %cst_8 : f32 to vector<16x1xf32>
    %17 = arith.addf %13, %16 : vector<16x1xf32>
    %18 = math.rsqrt %17 : vector<16x1xf32>
    %19 = vector.broadcast %18 : vector<16x1xf32> to vector<16x32xf32>
    %20 = arith.mulf %15, %19 : vector<16x32xf32>
    %21 = vector.broadcast %1 : vector<1x32xf32> to vector<16x32xf32>
    %22 = arith.mulf %20, %21 : vector<16x32xf32>
    %23 = vector.broadcast %2 : vector<1x32xf32> to vector<16x32xf32>
    %24 = arith.addf %22, %23 : vector<16x32xf32>
    %c0_9 = arith.constant 0 : index
    %c0_10 = arith.constant 0 : index
    %25 = vector.load %arg2[%c0_9, %c0_10] : memref<16x32xf32, #tpu.memory_space<vmem>>, vector<16x32xf32>
    %c0_11 = arith.constant 0 : index
    %c0_12 = arith.constant 0 : index
    %26 = vector.load %arg3[%c0_11, %c0_12] : memref<2x8xf32, #tpu.memory_space<vmem>>, vector<2x8xf32>
    %cst_13 = arith.constant 1.000000e+00 : f32
    %27 = vector.broadcast %cst_13 : f32 to vector<2x8xf32>
    %28 = arith.subf %26, %27 : vector<2x8xf32>
    %cst_14 = arith.constant 1.000000e+09 : f32
    %29 = vector.broadcast %cst_14 : f32 to vector<2x8xf32>
    %30 = arith.mulf %28, %29 : vector<2x8xf32>
    %c0_15 = arith.constant 0 : index
    %c0_16 = arith.constant 0 : index
    %c0_17 = arith.constant 0 : index
    %31 = vector.load %arg6[%c0_15, %c0_16, %c0_17] : memref<2x32x96xf32, #tpu.memory_space<vmem>>, vector<1x32x96xf32>
    %32 = vector.shape_cast %31 : vector<1x32x96xf32> to vector<32x96xf32>
    %cst_18 = arith.constant dense<0.000000e+00> : vector<16x96xf32>
    %33 = tpu.matmul %24, %32, %cst_18 {dimension_numbers = #tpu.dot_dimension_numbers<[1], [0], [0], [1], [0, 0, 1, 1], [], []>} : vector<16x32xf32>, vector<32x96xf32>, vector<16x96xf32> -> vector<16x96xf32>
    %c0_19 = arith.constant 0 : index
    %c0_20 = arith.constant 0 : index
    %34 = vector.load %arg7[%c0_19, %c0_20] : memref<2x96xf32, #tpu.memory_space<vmem>>, vector<1x96xf32>
    %35 = vector.broadcast %34 : vector<1x96xf32> to vector<16x96xf32>
    %36 = arith.addf %33, %35 : vector<16x96xf32>
    %37 = vector.extract_strided_slice %36 {offsets = [0, 0], sizes = [16, 32], strides = [1, 1]} : vector<16x96xf32> to vector<16x32xf32>
    %38 = vector.extract_strided_slice %36 {offsets = [0, 32], sizes = [16, 32], strides = [1, 1]} : vector<16x96xf32> to vector<16x32xf32>
    %39 = vector.extract_strided_slice %36 {offsets = [0, 64], sizes = [16, 32], strides = [1, 1]} : vector<16x96xf32> to vector<16x32xf32>
    %c0_21 = arith.constant 0 : index
    %c0_22 = arith.constant 0 : index
    %c0_23 = arith.constant 0 : index
    %40 = vector.load %arg8[%c0_21, %c0_22, %c0_23] : memref<2x32x32xf32, #tpu.memory_space<vmem>>, vector<1x32x32xf32>
    %41 = vector.shape_cast %40 : vector<1x32x32xf32> to vector<32x32xf32>
    %c0_24 = arith.constant 0 : index
    %c0_25 = arith.constant 0 : index
    %42 = vector.load %arg9[%c0_24, %c0_25] : memref<2x32xf32, #tpu.memory_space<vmem>>, vector<1x32xf32>
    %cst_26 = arith.constant 0.000000e+00 : f32
    %43 = vector.broadcast %cst_26 : f32 to vector<8x32xf32>
    %44 = vector.extract_strided_slice %37 {offsets = [0, 0], sizes = [8, 8], strides = [1, 1]} : vector<16x32xf32> to vector<8x8xf32>
    %45 = vector.extract_strided_slice %38 {offsets = [0, 0], sizes = [8, 8], strides = [1, 1]} : vector<16x32xf32> to vector<8x8xf32>
    %46 = vector.extract_strided_slice %39 {offsets = [0, 0], sizes = [8, 8], strides = [1, 1]} : vector<16x32xf32> to vector<8x8xf32>
    %cst_27 = arith.constant dense<0.000000e+00> : vector<8x8xf32>
    %47 = tpu.matmul %44, %45, %cst_27 {dimension_numbers = #tpu.dot_dimension_numbers<[1], [1], [0], [0], [0, 0, 1, 0], [], []>} : vector<8x8xf32>, vector<8x8xf32>, vector<8x8xf32> -> vector<8x8xf32>
    %cst_28 = arith.constant dense<0xFF800000> : vector<8xf32>
    %48 = vector.multi_reduction <maximumf>, %47, %cst_28 [1] : vector<8x8xf32> to vector<8xf32>
    %49 = vector.shape_cast %48 : vector<8xf32> to vector<8x1xf32>
    %50 = vector.broadcast %49 : vector<8x1xf32> to vector<8x8xf32>
    %51 = arith.subf %47, %50 : vector<8x8xf32>
    %52 = math.exp %51 : vector<8x8xf32>
    %cst_29 = arith.constant dense<0.000000e+00> : vector<8xf32>
    %53 = vector.multi_reduction <add>, %52, %cst_29 [1] : vector<8x8xf32> to vector<8xf32>
    %54 = vector.shape_cast %53 : vector<8xf32> to vector<8x1xf32>
    %55 = tpu.reciprocal %54 {approx = true} : vector<8x1xf32> -> vector<8x1xf32>
    %56 = vector.broadcast %55 : vector<8x1xf32> to vector<8x8xf32>
    %57 = arith.mulf %52, %56 : vector<8x8xf32>
    %cst_30 = arith.constant dense<0.000000e+00> : vector<8x8xf32>
    %58 = tpu.matmul %57, %46, %cst_30 {dimension_numbers = #tpu.dot_dimension_numbers<[1], [0], [0], [1], [0, 0, 1, 1], [], []>} : vector<8x8xf32>, vector<8x8xf32>, vector<8x8xf32> -> vector<8x8xf32>
    %59 = vector.extract_strided_slice %41 {offsets = [0, 0], sizes = [8, 32], strides = [1, 1]} : vector<32x32xf32> to vector<8x32xf32>
    %cst_31 = arith.constant dense<0.000000e+00> : vector<8x32xf32>
    %60 = tpu.matmul %58, %59, %cst_31 {dimension_numbers = #tpu.dot_dimension_numbers<[1], [0], [0], [1], [0, 0, 1, 1], [], []>} : vector<8x8xf32>, vector<8x32xf32>, vector<8x32xf32> -> vector<8x32xf32>
    %61 = arith.addf %43, %60 : vector<8x32xf32>
    %62 = vector.extract_strided_slice %37 {offsets = [0, 8], sizes = [8, 8], strides = [1, 1]} : vector<16x32xf32> to vector<8x8xf32>
    %63 = vector.extract_strided_slice %38 {offsets = [0, 8], sizes = [8, 8], strides = [1, 1]} : vector<16x32xf32> to vector<8x8xf32>
    %64 = vector.extract_strided_slice %39 {offsets = [0, 8], sizes = [8, 8], strides = [1, 1]} : vector<16x32xf32> to vector<8x8xf32>
    %cst_32 = arith.constant dense<0.000000e+00> : vector<8x8xf32>
    %65 = tpu.matmul %62, %63, %cst_32 {dimension_numbers = #tpu.dot_dimension_numbers<[1], [1], [0], [0], [0, 0, 1, 0], [], []>} : vector<8x8xf32>, vector<8x8xf32>, vector<8x8xf32> -> vector<8x8xf32>
    %cst_33 = arith.constant dense<0xFF800000> : vector<8xf32>
    %66 = vector.multi_reduction <maximumf>, %65, %cst_33 [1] : vector<8x8xf32> to vector<8xf32>
    %67 = vector.shape_cast %66 : vector<8xf32> to vector<8x1xf32>
    %68 = vector.broadcast %67 : vector<8x1xf32> to vector<8x8xf32>
    %69 = arith.subf %65, %68 : vector<8x8xf32>
    %70 = math.exp %69 : vector<8x8xf32>
    %cst_34 = arith.constant dense<0.000000e+00> : vector<8xf32>
    %71 = vector.multi_reduction <add>, %70, %cst_34 [1] : vector<8x8xf32> to vector<8xf32>
    %72 = vector.shape_cast %71 : vector<8xf32> to vector<8x1xf32>
    %73 = tpu.reciprocal %72 {approx = true} : vector<8x1xf32> -> vector<8x1xf32>
    %74 = vector.broadcast %73 : vector<8x1xf32> to vector<8x8xf32>
    %75 = arith.mulf %70, %74 : vector<8x8xf32>
    %cst_35 = arith.constant dense<0.000000e+00> : vector<8x8xf32>
    %76 = tpu.matmul %75, %64, %cst_35 {dimension_numbers = #tpu.dot_dimension_numbers<[1], [0], [0], [1], [0, 0, 1, 1], [], []>} : vector<8x8xf32>, vector<8x8xf32>, vector<8x8xf32> -> vector<8x8xf32>
    %77 = vector.extract_strided_slice %41 {offsets = [8, 0], sizes = [8, 32], strides = [1, 1]} : vector<32x32xf32> to vector<8x32xf32>
    %cst_36 = arith.constant dense<0.000000e+00> : vector<8x32xf32>
    %78 = tpu.matmul %76, %77, %cst_36 {dimension_numbers = #tpu.dot_dimension_numbers<[1], [0], [0], [1], [0, 0, 1, 1], [], []>} : vector<8x8xf32>, vector<8x32xf32>, vector<8x32xf32> -> vector<8x32xf32>
    %79 = arith.addf %61, %78 : vector<8x32xf32>
    %80 = vector.extract_strided_slice %37 {offsets = [0, 16], sizes = [8, 8], strides = [1, 1]} : vector<16x32xf32> to vector<8x8xf32>
    %81 = vector.extract_strided_slice %38 {offsets = [0, 16], sizes = [8, 8], strides = [1, 1]} : vector<16x32xf32> to vector<8x8xf32>
    %82 = vector.extract_strided_slice %39 {offsets = [0, 16], sizes = [8, 8], strides = [1, 1]} : vector<16x32xf32> to vector<8x8xf32>
    %cst_37 = arith.constant dense<0.000000e+00> : vector<8x8xf32>
    %83 = tpu.matmul %80, %81, %cst_37 {dimension_numbers = #tpu.dot_dimension_numbers<[1], [1], [0], [0], [0, 0, 1, 0], [], []>} : vector<8x8xf32>, vector<8x8xf32>, vector<8x8xf32> -> vector<8x8xf32>
    %cst_38 = arith.constant dense<0xFF800000> : vector<8xf32>
    %84 = vector.multi_reduction <maximumf>, %83, %cst_38 [1] : vector<8x8xf32> to vector<8xf32>
    %85 = vector.shape_cast %84 : vector<8xf32> to vector<8x1xf32>
    %86 = vector.broadcast %85 : vector<8x1xf32> to vector<8x8xf32>
    %87 = arith.subf %83, %86 : vector<8x8xf32>
    %88 = math.exp %87 : vector<8x8xf32>
    %cst_39 = arith.constant dense<0.000000e+00> : vector<8xf32>
    %89 = vector.multi_reduction <add>, %88, %cst_39 [1] : vector<8x8xf32> to vector<8xf32>
    %90 = vector.shape_cast %89 : vector<8xf32> to vector<8x1xf32>
    %91 = tpu.reciprocal %90 {approx = true} : vector<8x1xf32> -> vector<8x1xf32>
    %92 = vector.broadcast %91 : vector<8x1xf32> to vector<8x8xf32>
    %93 = arith.mulf %88, %92 : vector<8x8xf32>
    %cst_40 = arith.constant dense<0.000000e+00> : vector<8x8xf32>
    %94 = tpu.matmul %93, %82, %cst_40 {dimension_numbers = #tpu.dot_dimension_numbers<[1], [0], [0], [1], [0, 0, 1, 1], [], []>} : vector<8x8xf32>, vector<8x8xf32>, vector<8x8xf32> -> vector<8x8xf32>
    %95 = vector.extract_strided_slice %41 {offsets = [16, 0], sizes = [8, 32], strides = [1, 1]} : vector<32x32xf32> to vector<8x32xf32>
    %cst_41 = arith.constant dense<0.000000e+00> : vector<8x32xf32>
    %96 = tpu.matmul %94, %95, %cst_41 {dimension_numbers = #tpu.dot_dimension_numbers<[1], [0], [0], [1], [0, 0, 1, 1], [], []>} : vector<8x8xf32>, vector<8x32xf32>, vector<8x32xf32> -> vector<8x32xf32>
    %97 = arith.addf %79, %96 : vector<8x32xf32>
    %98 = vector.extract_strided_slice %37 {offsets = [0, 24], sizes = [8, 8], strides = [1, 1]} : vector<16x32xf32> to vector<8x8xf32>
    %99 = vector.extract_strided_slice %38 {offsets = [0, 24], sizes = [8, 8], strides = [1, 1]} : vector<16x32xf32> to vector<8x8xf32>
    %100 = vector.extract_strided_slice %39 {offsets = [0, 24], sizes = [8, 8], strides = [1, 1]} : vector<16x32xf32> to vector<8x8xf32>
    %cst_42 = arith.constant dense<0.000000e+00> : vector<8x8xf32>
    %101 = tpu.matmul %98, %99, %cst_42 {dimension_numbers = #tpu.dot_dimension_numbers<[1], [1], [0], [0], [0, 0, 1, 0], [], []>} : vector<8x8xf32>, vector<8x8xf32>, vector<8x8xf32> -> vector<8x8xf32>
    %cst_43 = arith.constant dense<0xFF800000> : vector<8xf32>
    %102 = vector.multi_reduction <maximumf>, %101, %cst_43 [1] : vector<8x8xf32> to vector<8xf32>
    %103 = vector.shape_cast %102 : vector<8xf32> to vector<8x1xf32>
    %104 = vector.broadcast %103 : vector<8x1xf32> to vector<8x8xf32>
    %105 = arith.subf %101, %104 : vector<8x8xf32>
    %106 = math.exp %105 : vector<8x8xf32>
    %cst_44 = arith.constant dense<0.000000e+00> : vector<8xf32>
    %107 = vector.multi_reduction <add>, %106, %cst_44 [1] : vector<8x8xf32> to vector<8xf32>
    %108 = vector.shape_cast %107 : vector<8xf32> to vector<8x1xf32>
    %109 = tpu.reciprocal %108 {approx = true} : vector<8x1xf32> -> vector<8x1xf32>
    %110 = vector.broadcast %109 : vector<8x1xf32> to vector<8x8xf32>
    %111 = arith.mulf %106, %110 : vector<8x8xf32>
    %cst_45 = arith.constant dense<0.000000e+00> : vector<8x8xf32>
    %112 = tpu.matmul %111, %100, %cst_45 {dimension_numbers = #tpu.dot_dimension_numbers<[1], [0], [0], [1], [0, 0, 1, 1], [], []>} : vector<8x8xf32>, vector<8x8xf32>, vector<8x8xf32> -> vector<8x8xf32>
    %113 = vector.extract_strided_slice %41 {offsets = [24, 0], sizes = [8, 32], strides = [1, 1]} : vector<32x32xf32> to vector<8x32xf32>
    %cst_46 = arith.constant dense<0.000000e+00> : vector<8x32xf32>
    %114 = tpu.matmul %112, %113, %cst_46 {dimension_numbers = #tpu.dot_dimension_numbers<[1], [0], [0], [1], [0, 0, 1, 1], [], []>} : vector<8x8xf32>, vector<8x32xf32>, vector<8x32xf32> -> vector<8x32xf32>
    %115 = arith.addf %97, %114 : vector<8x32xf32>
    %c0_47 = arith.constant 0 : index
    %c0_48 = arith.constant 0 : index
    %116 = vector.load %arg30[%c0_47, %c0_48] : memref<16x32xf32, #tpu.memory_space<vmem>>, vector<8x32xf32>
    tpu.vector_store %arg30[%c0_47, %c0_48], %115 {strides = array<i32>} : memref<16x32xf32, #tpu.memory_space<vmem>>, vector<8x32xf32>,
    %cst_49 = arith.constant 0.000000e+00 : f32
    %117 = vector.broadcast %cst_49 : f32 to vector<8x32xf32>
    %118 = vector.extract_strided_slice %37 {offsets = [8, 0], sizes = [8, 8], strides = [1, 1]} : vector<16x32xf32> to vector<8x8xf32>
    %119 = vector.extract_strided_slice %38 {offsets = [8, 0], sizes = [8, 8], strides = [1, 1]} : vector<16x32xf32> to vector<8x8xf32>
    %120 = vector.extract_strided_slice %39 {offsets = [8, 0], sizes = [8, 8], strides = [1, 1]} : vector<16x32xf32> to vector<8x8xf32>
    %cst_50 = arith.constant dense<0.000000e+00> : vector<8x8xf32>
    %121 = tpu.matmul %118, %119, %cst_50 {dimension_numbers = #tpu.dot_dimension_numbers<[1], [1], [0], [0], [0, 0, 1, 0], [], []>} : vector<8x8xf32>, vector<8x8xf32>, vector<8x8xf32> -> vector<8x8xf32>
    %cst_51 = arith.constant dense<0xFF800000> : vector<8xf32>
    %122 = vector.multi_reduction <maximumf>, %121, %cst_51 [1] : vector<8x8xf32> to vector<8xf32>
    %123 = vector.shape_cast %122 : vector<8xf32> to vector<8x1xf32>
    %124 = vector.broadcast %123 : vector<8x1xf32> to vector<8x8xf32>
    %125 = arith.subf %121, %124 : vector<8x8xf32>
    %126 = math.exp %125 : vector<8x8xf32>
    %cst_52 = arith.constant dense<0.000000e+00> : vector<8xf32>
    %127 = vector.multi_reduction <add>, %126, %cst_52 [1] : vector<8x8xf32> to vector<8xf32>
    %128 = vector.shape_cast %127 : vector<8xf32> to vector<8x1xf32>
    %129 = tpu.reciprocal %128 {approx = true} : vector<8x1xf32> -> vector<8x1xf32>
    %130 = vector.broadcast %129 : vector<8x1xf32> to vector<8x8xf32>
    %131 = arith.mulf %126, %130 : vector<8x8xf32>
    %cst_53 = arith.constant dense<0.000000e+00> : vector<8x8xf32>
    %132 = tpu.matmul %131, %120, %cst_53 {dimension_numbers = #tpu.dot_dimension_numbers<[1], [0], [0], [1], [0, 0, 1, 1], [], []>} : vector<8x8xf32>, vector<8x8xf32>, vector<8x8xf32> -> vector<8x8xf32>
    %133 = vector.extract_strided_slice %41 {offsets = [0, 0], sizes = [8, 32], strides = [1, 1]} : vector<32x32xf32> to vector<8x32xf32>
    %cst_54 = arith.constant dense<0.000000e+00> : vector<8x32xf32>
    %134 = tpu.matmul %132, %133, %cst_54 {dimension_numbers = #tpu.dot_dimension_numbers<[1], [0], [0], [1], [0, 0, 1, 1], [], []>} : vector<8x8xf32>, vector<8x32xf32>, vector<8x32xf32> -> vector<8x32xf32>
    %135 = arith.addf %117, %134 : vector<8x32xf32>
    %136 = vector.extract_strided_slice %37 {offsets = [8, 8], sizes = [8, 8], strides = [1, 1]} : vector<16x32xf32> to vector<8x8xf32>
    %137 = vector.extract_strided_slice %38 {offsets = [8, 8], sizes = [8, 8], strides = [1, 1]} : vector<16x32xf32> to vector<8x8xf32>
    %138 = vector.extract_strided_slice %39 {offsets = [8, 8], sizes = [8, 8], strides = [1, 1]} : vector<16x32xf32> to vector<8x8xf32>
    %cst_55 = arith.constant dense<0.000000e+00> : vector<8x8xf32>
    %139 = tpu.matmul %136, %137, %cst_55 {dimension_numbers = #tpu.dot_dimension_numbers<[1], [1], [0], [0], [0, 0, 1, 0], [], []>} : vector<8x8xf32>, vector<8x8xf32>, vector<8x8xf32> -> vector<8x8xf32>
    %cst_56 = arith.constant dense<0xFF800000> : vector<8xf32>
    %140 = vector.multi_reduction <maximumf>, %139, %cst_56 [1] : vector<8x8xf32> to vector<8xf32>
    %141 = vector.shape_cast %140 : vector<8xf32> to vector<8x1xf32>
    %142 = vector.broadcast %141 : vector<8x1xf32> to vector<8x8xf32>
    %143 = arith.subf %139, %142 : vector<8x8xf32>
    %144 = math.exp %143 : vector<8x8xf32>
    %cst_57 = arith.constant dense<0.000000e+00> : vector<8xf32>
    %145 = vector.multi_reduction <add>, %144, %cst_57 [1] : vector<8x8xf32> to vector<8xf32>
    %146 = vector.shape_cast %145 : vector<8xf32> to vector<8x1xf32>
    %147 = tpu.reciprocal %146 {approx = true} : vector<8x1xf32> -> vector<8x1xf32>
    %148 = vector.broadcast %147 : vector<8x1xf32> to vector<8x8xf32>
    %149 = arith.mulf %144, %148 : vector<8x8xf32>
    %cst_58 = arith.constant dense<0.000000e+00> : vector<8x8xf32>
    %150 = tpu.matmul %149, %138, %cst_58 {dimension_numbers = #tpu.dot_dimension_numbers<[1], [0], [0], [1], [0, 0, 1, 1], [], []>} : vector<8x8xf32>, vector<8x8xf32>, vector<8x8xf32> -> vector<8x8xf32>
    %151 = vector.extract_strided_slice %41 {offsets = [8, 0], sizes = [8, 32], strides = [1, 1]} : vector<32x32xf32> to vector<8x32xf32>
    %cst_59 = arith.constant dense<0.000000e+00> : vector<8x32xf32>
    %152 = tpu.matmul %150, %151, %cst_59 {dimension_numbers = #tpu.dot_dimension_numbers<[1], [0], [0], [1], [0, 0, 1, 1], [], []>} : vector<8x8xf32>, vector<8x32xf32>, vector<8x32xf32> -> vector<8x32xf32>
    %153 = arith.addf %135, %152 : vector<8x32xf32>
    %154 = vector.extract_strided_slice %37 {offsets = [8, 16], sizes = [8, 8], strides = [1, 1]} : vector<16x32xf32> to vector<8x8xf32>
    %155 = vector.extract_strided_slice %38 {offsets = [8, 16], sizes = [8, 8], strides = [1, 1]} : vector<16x32xf32> to vector<8x8xf32>
    %156 = vector.extract_strided_slice %39 {offsets = [8, 16], sizes = [8, 8], strides = [1, 1]} : vector<16x32xf32> to vector<8x8xf32>
    %cst_60 = arith.constant dense<0.000000e+00> : vector<8x8xf32>
    %157 = tpu.matmul %154, %155, %cst_60 {dimension_numbers = #tpu.dot_dimension_numbers<[1], [1], [0], [0], [0, 0, 1, 0], [], []>} : vector<8x8xf32>, vector<8x8xf32>, vector<8x8xf32> -> vector<8x8xf32>
    %cst_61 = arith.constant dense<0xFF800000> : vector<8xf32>
    %158 = vector.multi_reduction <maximumf>, %157, %cst_61 [1] : vector<8x8xf32> to vector<8xf32>
    %159 = vector.shape_cast %158 : vector<8xf32> to vector<8x1xf32>
    %160 = vector.broadcast %159 : vector<8x1xf32> to vector<8x8xf32>
    %161 = arith.subf %157, %160 : vector<8x8xf32>
    %162 = math.exp %161 : vector<8x8xf32>
    %cst_62 = arith.constant dense<0.000000e+00> : vector<8xf32>
    %163 = vector.multi_reduction <add>, %162, %cst_62 [1] : vector<8x8xf32> to vector<8xf32>
    %164 = vector.shape_cast %163 : vector<8xf32> to vector<8x1xf32>
    %165 = tpu.reciprocal %164 {approx = true} : vector<8x1xf32> -> vector<8x1xf32>
    %166 = vector.broadcast %165 : vector<8x1xf32> to vector<8x8xf32>
    %167 = arith.mulf %162, %166 : vector<8x8xf32>
    %cst_63 = arith.constant dense<0.000000e+00> : vector<8x8xf32>
    %168 = tpu.matmul %167, %156, %cst_63 {dimension_numbers = #tpu.dot_dimension_numbers<[1], [0], [0], [1], [0, 0, 1, 1], [], []>} : vector<8x8xf32>, vector<8x8xf32>, vector<8x8xf32> -> vector<8x8xf32>
    %169 = vector.extract_strided_slice %41 {offsets = [16, 0], sizes = [8, 32], strides = [1, 1]} : vector<32x32xf32> to vector<8x32xf32>
    %cst_64 = arith.constant dense<0.000000e+00> : vector<8x32xf32>
    %170 = tpu.matmul %168, %169, %cst_64 {dimension_numbers = #tpu.dot_dimension_numbers<[1], [0], [0], [1], [0, 0, 1, 1], [], []>} : vector<8x8xf32>, vector<8x32xf32>, vector<8x32xf32> -> vector<8x32xf32>
    %171 = arith.addf %153, %170 : vector<8x32xf32>
    %172 = vector.extract_strided_slice %37 {offsets = [8, 24], sizes = [8, 8], strides = [1, 1]} : vector<16x32xf32> to vector<8x8xf32>
    %173 = vector.extract_strided_slice %38 {offsets = [8, 24], sizes = [8, 8], strides = [1, 1]} : vector<16x32xf32> to vector<8x8xf32>
    %174 = vector.extract_strided_slice %39 {offsets = [8, 24], sizes = [8, 8], strides = [1, 1]} : vector<16x32xf32> to vector<8x8xf32>
    %cst_65 = arith.constant dense<0.000000e+00> : vector<8x8xf32>
    %175 = tpu.matmul %172, %173, %cst_65 {dimension_numbers = #tpu.dot_dimension_numbers<[1], [1], [0], [0], [0, 0, 1, 0], [], []>} : vector<8x8xf32>, vector<8x8xf32>, vector<8x8xf32> -> vector<8x8xf32>
    %cst_66 = arith.constant dense<0xFF800000> : vector<8xf32>
    %176 = vector.multi_reduction <maximumf>, %175, %cst_66 [1] : vector<8x8xf32> to vector<8xf32>
    %177 = vector.shape_cast %176 : vector<8xf32> to vector<8x1xf32>
    %178 = vector.broadcast %177 : vector<8x1xf32> to vector<8x8xf32>
    %179 = arith.subf %175, %178 : vector<8x8xf32>
    %180 = math.exp %179 : vector<8x8xf32>
    %cst_67 = arith.constant dense<0.000000e+00> : vector<8xf32>
    %181 = vector.multi_reduction <add>, %180, %cst_67 [1] : vector<8x8xf32> to vector<8xf32>
    %182 = vector.shape_cast %181 : vector<8xf32> to vector<8x1xf32>
    %183 = tpu.reciprocal %182 {approx = true} : vector<8x1xf32> -> vector<8x1xf32>
    %184 = vector.broadcast %183 : vector<8x1xf32> to vector<8x8xf32>
    %185 = arith.mulf %180, %184 : vector<8x8xf32>
    %cst_68 = arith.constant dense<0.000000e+00> : vector<8x8xf32>
    %186 = tpu.matmul %185, %174, %cst_68 {dimension_numbers = #tpu.dot_dimension_numbers<[1], [0], [0], [1], [0, 0, 1, 1], [], []>} : vector<8x8xf32>, vector<8x8xf32>, vector<8x8xf32> -> vector<8x8xf32>
    %187 = vector.extract_strided_slice %41 {offsets = [24, 0], sizes = [8, 32], strides = [1, 1]} : vector<32x32xf32> to vector<8x32xf32>
    %cst_69 = arith.constant dense<0.000000e+00> : vector<8x32xf32>
    %188 = tpu.matmul %186, %187, %cst_69 {dimension_numbers = #tpu.dot_dimension_numbers<[1], [0], [0], [1], [0, 0, 1, 1], [], []>} : vector<8x8xf32>, vector<8x32xf32>, vector<8x32xf32> -> vector<8x32xf32>
    %189 = arith.addf %171, %188 : vector<8x32xf32>
    %c8 = arith.constant 8 : index
    %c0_70 = arith.constant 0 : index
    %190 = vector.load %arg30[%c8, %c0_70] : memref<16x32xf32, #tpu.memory_space<vmem>>, vector<8x32xf32>
    tpu.vector_store %arg30[%c8, %c0_70], %189 {strides = array<i32>} : memref<16x32xf32, #tpu.memory_space<vmem>>, vector<8x32xf32>,
    %c0_71 = arith.constant 0 : index
    %c0_72 = arith.constant 0 : index
    %191 = vector.load %arg30[%c0_71, %c0_72] : memref<16x32xf32, #tpu.memory_space<vmem>>, vector<16x32xf32>
    %192 = vector.broadcast %42 : vector<1x32xf32> to vector<16x32xf32>
    %193 = arith.addf %191, %192 : vector<16x32xf32>
    %194 = arith.addf %24, %193 : vector<16x32xf32>
    %c0_73 = arith.constant 0 : index
    %c0_74 = arith.constant 0 : index
    %195 = vector.load %arg10[%c0_73, %c0_74] : memref<2x32xf32, #tpu.memory_space<vmem>>, vector<1x32xf32>
    %c0_75 = arith.constant 0 : index
    %c0_76 = arith.constant 0 : index
    %196 = vector.load %arg11[%c0_75, %c0_76] : memref<2x32xf32, #tpu.memory_space<vmem>>, vector<1x32xf32>
    %cst_77 = arith.constant dense<0.000000e+00> : vector<16xf32>
    %197 = vector.multi_reduction <add>, %194, %cst_77 [1] : vector<16x32xf32> to vector<16xf32>
    %198 = vector.shape_cast %197 : vector<16xf32> to vector<16x1xf32>
    %cst_78 = arith.constant 3.200000e+01 : f32
    %199 = vector.broadcast %cst_78 : f32 to vector<16x1xf32>
    %200 = arith.divf %198, %199 : vector<16x1xf32>
    %201 = vector.broadcast %200 : vector<16x1xf32> to vector<16x32xf32>
    %202 = arith.subf %194, %201 : vector<16x32xf32>
    %203 = arith.mulf %202, %202 : vector<16x32xf32>
    %cst_79 = arith.constant dense<0.000000e+00> : vector<16xf32>
    %204 = vector.multi_reduction <add>, %203, %cst_79 [1] : vector<16x32xf32> to vector<16xf32>
    %205 = vector.shape_cast %204 : vector<16xf32> to vector<16x1xf32>
    %cst_80 = arith.constant 3.200000e+01 : f32
    %206 = vector.broadcast %cst_80 : f32 to vector<16x1xf32>
    %207 = arith.divf %205, %206 : vector<16x1xf32>
    %208 = vector.broadcast %200 : vector<16x1xf32> to vector<16x32xf32>
    %209 = arith.subf %194, %208 : vector<16x32xf32>
    %cst_81 = arith.constant 9.99999974E-6 : f32
    %210 = vector.broadcast %cst_81 : f32 to vector<16x1xf32>
    %211 = arith.addf %207, %210 : vector<16x1xf32>
    %212 = math.rsqrt %211 : vector<16x1xf32>
    %213 = vector.broadcast %212 : vector<16x1xf32> to vector<16x32xf32>
    %214 = arith.mulf %209, %213 : vector<16x32xf32>
    %215 = vector.broadcast %195 : vector<1x32xf32> to vector<16x32xf32>
    %216 = arith.mulf %214, %215 : vector<16x32xf32>
    %217 = vector.broadcast %196 : vector<1x32xf32> to vector<16x32xf32>
    %218 = arith.addf %216, %217 : vector<16x32xf32>
    %c0_82 = arith.constant 0 : index
    %c0_83 = arith.constant 0 : index
    %c0_84 = arith.constant 0 : index
    %219 = vector.load %arg12[%c0_82, %c0_83, %c0_84] : memref<2x32x96xf32, #tpu.memory_space<vmem>>, vector<1x32x96xf32>
    %220 = vector.shape_cast %219 : vector<1x32x96xf32> to vector<32x96xf32>
    %221 = vector.extract_strided_slice %220 {offsets = [0, 0], sizes = [32, 32], strides = [1, 1]} : vector<32x96xf32> to vector<32x32xf32>
    %cst_85 = arith.constant dense<0.000000e+00> : vector<16x32xf32>
    %222 = tpu.matmul %218, %221, %cst_85 {dimension_numbers = #tpu.dot_dimension_numbers<[1], [0], [0], [1], [0, 0, 1, 1], [], []>} : vector<16x32xf32>, vector<32x32xf32>, vector<16x32xf32> -> vector<16x32xf32>
    %c0_86 = arith.constant 0 : index
    %c0_87 = arith.constant 0 : index
    %223 = vector.load %arg13[%c0_86, %c0_87] : memref<2x96xf32, #tpu.memory_space<vmem>>, vector<1x32xf32>
    %224 = vector.broadcast %223 : vector<1x32xf32> to vector<16x32xf32>
    %225 = arith.addf %222, %224 : vector<16x32xf32>
    %c0_88 = arith.constant 0 : index
    %c0_89 = arith.constant 0 : index
    %c0_90 = arith.constant 0 : index
    %226 = vector.load %arg12[%c0_88, %c0_89, %c0_90] : memref<2x32x96xf32, #tpu.memory_space<vmem>>, vector<1x32x96xf32>
    %227 = vector.shape_cast %226 : vector<1x32x96xf32> to vector<32x96xf32>
    %228 = vector.extract_strided_slice %227 {offsets = [0, 32], sizes = [32, 64], strides = [1, 1]} : vector<32x96xf32> to vector<32x64xf32>
    %cst_91 = arith.constant dense<0.000000e+00> : vector<16x64xf32>
    %229 = tpu.matmul %25, %228, %cst_91 {dimension_numbers = #tpu.dot_dimension_numbers<[1], [0], [0], [1], [0, 0, 1, 1], [], []>} : vector<16x32xf32>, vector<32x64xf32>, vector<16x64xf32> -> vector<16x64xf32>
    %c0_92 = arith.constant 0 : index
    %c32 = arith.constant 32 : index
    %230 = vector.load %arg13[%c0_92, %c32] : memref<2x96xf32, #tpu.memory_space<vmem>>, vector<1x64xf32>
    %231 = vector.broadcast %230 : vector<1x64xf32> to vector<16x64xf32>
    %232 = arith.addf %229, %231 : vector<16x64xf32>
    %233 = vector.extract_strided_slice %232 {offsets = [0, 0], sizes = [16, 32], strides = [1, 1]} : vector<16x64xf32> to vector<16x32xf32>
    %234 = vector.extract_strided_slice %232 {offsets = [0, 32], sizes = [16, 32], strides = [1, 1]} : vector<16x64xf32> to vector<16x32xf32>
    %c0_93 = arith.constant 0 : index
    %c0_94 = arith.constant 0 : index
    %c0_95 = arith.constant 0 : index
    %235 = vector.load %arg14[%c0_93, %c0_94, %c0_95] : memref<2x32x32xf32, #tpu.memory_space<vmem>>, vector<1x32x32xf32>
    %236 = vector.shape_cast %235 : vector<1x32x32xf32> to vector<32x32xf32>
    %c0_96 = arith.constant 0 : index
    %c0_97 = arith.constant 0 : index
    %237 = vector.load %arg15[%c0_96, %c0_97] : memref<2x32xf32, #tpu.memory_space<vmem>>, vector<1x32xf32>
    %cst_98 = arith.constant 0.000000e+00 : f32
    %238 = vector.broadcast %cst_98 : f32 to vector<8x32xf32>
    %239 = vector.extract_strided_slice %225 {offsets = [0, 0], sizes = [8, 8], strides = [1, 1]} : vector<16x32xf32> to vector<8x8xf32>
    %240 = vector.extract_strided_slice %233 {offsets = [0, 0], sizes = [8, 8], strides = [1, 1]} : vector<16x32xf32> to vector<8x8xf32>
    %241 = vector.extract_strided_slice %234 {offsets = [0, 0], sizes = [8, 8], strides = [1, 1]} : vector<16x32xf32> to vector<8x8xf32>
    %cst_99 = arith.constant dense<0.000000e+00> : vector<8x8xf32>
    %242 = tpu.matmul %239, %240, %cst_99 {dimension_numbers = #tpu.dot_dimension_numbers<[1], [1], [0], [0], [0, 0, 1, 0], [], []>} : vector<8x8xf32>, vector<8x8xf32>, vector<8x8xf32> -> vector<8x8xf32>
    %243 = vector.extract_strided_slice %30 {offsets = [0, 0], sizes = [1, 8], strides = [1, 1]} : vector<2x8xf32> to vector<1x8xf32>
    %244 = vector.broadcast %243 : vector<1x8xf32> to vector<8x8xf32>
    %245 = arith.addf %242, %244 : vector<8x8xf32>
    %cst_100 = arith.constant dense<0xFF800000> : vector<8xf32>
    %246 = vector.multi_reduction <maximumf>, %245, %cst_100 [1] : vector<8x8xf32> to vector<8xf32>
    %247 = vector.shape_cast %246 : vector<8xf32> to vector<8x1xf32>
    %248 = vector.broadcast %247 : vector<8x1xf32> to vector<8x8xf32>
    %249 = arith.subf %245, %248 : vector<8x8xf32>
    %250 = math.exp %249 : vector<8x8xf32>
    %cst_101 = arith.constant dense<0.000000e+00> : vector<8xf32>
    %251 = vector.multi_reduction <add>, %250, %cst_101 [1] : vector<8x8xf32> to vector<8xf32>
    %252 = vector.shape_cast %251 : vector<8xf32> to vector<8x1xf32>
    %253 = tpu.reciprocal %252 {approx = true} : vector<8x1xf32> -> vector<8x1xf32>
    %254 = vector.broadcast %253 : vector<8x1xf32> to vector<8x8xf32>
    %255 = arith.mulf %250, %254 : vector<8x8xf32>
    %cst_102 = arith.constant dense<0.000000e+00> : vector<8x8xf32>
    %256 = tpu.matmul %255, %241, %cst_102 {dimension_numbers = #tpu.dot_dimension_numbers<[1], [0], [0], [1], [0, 0, 1, 1], [], []>} : vector<8x8xf32>, vector<8x8xf32>, vector<8x8xf32> -> vector<8x8xf32>
    %257 = vector.extract_strided_slice %236 {offsets = [0, 0], sizes = [8, 32], strides = [1, 1]} : vector<32x32xf32> to vector<8x32xf32>
    %cst_103 = arith.constant dense<0.000000e+00> : vector<8x32xf32>
    %258 = tpu.matmul %256, %257, %cst_103 {dimension_numbers = #tpu.dot_dimension_numbers<[1], [0], [0], [1], [0, 0, 1, 1], [], []>} : vector<8x8xf32>, vector<8x32xf32>, vector<8x32xf32> -> vector<8x32xf32>
    %259 = arith.addf %238, %258 : vector<8x32xf32>
    %260 = vector.extract_strided_slice %225 {offsets = [0, 8], sizes = [8, 8], strides = [1, 1]} : vector<16x32xf32> to vector<8x8xf32>
    %261 = vector.extract_strided_slice %233 {offsets = [0, 8], sizes = [8, 8], strides = [1, 1]} : vector<16x32xf32> to vector<8x8xf32>
    %262 = vector.extract_strided_slice %234 {offsets = [0, 8], sizes = [8, 8], strides = [1, 1]} : vector<16x32xf32> to vector<8x8xf32>
    %cst_104 = arith.constant dense<0.000000e+00> : vector<8x8xf32>
    %263 = tpu.matmul %260, %261, %cst_104 {dimension_numbers = #tpu.dot_dimension_numbers<[1], [1], [0], [0], [0, 0, 1, 0], [], []>} : vector<8x8xf32>, vector<8x8xf32>, vector<8x8xf32> -> vector<8x8xf32>
    %264 = vector.extract_strided_slice %30 {offsets = [0, 0], sizes = [1, 8], strides = [1, 1]} : vector<2x8xf32> to vector<1x8xf32>
    %265 = vector.broadcast %264 : vector<1x8xf32> to vector<8x8xf32>
    %266 = arith.addf %263, %265 : vector<8x8xf32>
    %cst_105 = arith.constant dense<0xFF800000> : vector<8xf32>
    %267 = vector.multi_reduction <maximumf>, %266, %cst_105 [1] : vector<8x8xf32> to vector<8xf32>
    %268 = vector.shape_cast %267 : vector<8xf32> to vector<8x1xf32>
    %269 = vector.broadcast %268 : vector<8x1xf32> to vector<8x8xf32>
    %270 = arith.subf %266, %269 : vector<8x8xf32>
    %271 = math.exp %270 : vector<8x8xf32>
    %cst_106 = arith.constant dense<0.000000e+00> : vector<8xf32>
    %272 = vector.multi_reduction <add>, %271, %cst_106 [1] : vector<8x8xf32> to vector<8xf32>
    %273 = vector.shape_cast %272 : vector<8xf32> to vector<8x1xf32>
    %274 = tpu.reciprocal %273 {approx = true} : vector<8x1xf32> -> vector<8x1xf32>
    %275 = vector.broadcast %274 : vector<8x1xf32> to vector<8x8xf32>
    %276 = arith.mulf %271, %275 : vector<8x8xf32>
    %cst_107 = arith.constant dense<0.000000e+00> : vector<8x8xf32>
    %277 = tpu.matmul %276, %262, %cst_107 {dimension_numbers = #tpu.dot_dimension_numbers<[1], [0], [0], [1], [0, 0, 1, 1], [], []>} : vector<8x8xf32>, vector<8x8xf32>, vector<8x8xf32> -> vector<8x8xf32>
    %278 = vector.extract_strided_slice %236 {offsets = [8, 0], sizes = [8, 32], strides = [1, 1]} : vector<32x32xf32> to vector<8x32xf32>
    %cst_108 = arith.constant dense<0.000000e+00> : vector<8x32xf32>
    %279 = tpu.matmul %277, %278, %cst_108 {dimension_numbers = #tpu.dot_dimension_numbers<[1], [0], [0], [1], [0, 0, 1, 1], [], []>} : vector<8x8xf32>, vector<8x32xf32>, vector<8x32xf32> -> vector<8x32xf32>
    %280 = arith.addf %259, %279 : vector<8x32xf32>
    %281 = vector.extract_strided_slice %225 {offsets = [0, 16], sizes = [8, 8], strides = [1, 1]} : vector<16x32xf32> to vector<8x8xf32>
    %282 = vector.extract_strided_slice %233 {offsets = [0, 16], sizes = [8, 8], strides = [1, 1]} : vector<16x32xf32> to vector<8x8xf32>
    %283 = vector.extract_strided_slice %234 {offsets = [0, 16], sizes = [8, 8], strides = [1, 1]} : vector<16x32xf32> to vector<8x8xf32>
    %cst_109 = arith.constant dense<0.000000e+00> : vector<8x8xf32>
    %284 = tpu.matmul %281, %282, %cst_109 {dimension_numbers = #tpu.dot_dimension_numbers<[1], [1], [0], [0], [0, 0, 1, 0], [], []>} : vector<8x8xf32>, vector<8x8xf32>, vector<8x8xf32> -> vector<8x8xf32>
    %285 = vector.extract_strided_slice %30 {offsets = [0, 0], sizes = [1, 8], strides = [1, 1]} : vector<2x8xf32> to vector<1x8xf32>
    %286 = vector.broadcast %285 : vector<1x8xf32> to vector<8x8xf32>
    %287 = arith.addf %284, %286 : vector<8x8xf32>
    %cst_110 = arith.constant dense<0xFF800000> : vector<8xf32>
    %288 = vector.multi_reduction <maximumf>, %287, %cst_110 [1] : vector<8x8xf32> to vector<8xf32>
    %289 = vector.shape_cast %288 : vector<8xf32> to vector<8x1xf32>
    %290 = vector.broadcast %289 : vector<8x1xf32> to vector<8x8xf32>
    %291 = arith.subf %287, %290 : vector<8x8xf32>
    %292 = math.exp %291 : vector<8x8xf32>
    %cst_111 = arith.constant dense<0.000000e+00> : vector<8xf32>
    %293 = vector.multi_reduction <add>, %292, %cst_111 [1] : vector<8x8xf32> to vector<8xf32>
    %294 = vector.shape_cast %293 : vector<8xf32> to vector<8x1xf32>
    %295 = tpu.reciprocal %294 {approx = true} : vector<8x1xf32> -> vector<8x1xf32>
    %296 = vector.broadcast %295 : vector<8x1xf32> to vector<8x8xf32>
    %297 = arith.mulf %292, %296 : vector<8x8xf32>
    %cst_112 = arith.constant dense<0.000000e+00> : vector<8x8xf32>
    %298 = tpu.matmul %297, %283, %cst_112 {dimension_numbers = #tpu.dot_dimension_numbers<[1], [0], [0], [1], [0, 0, 1, 1], [], []>} : vector<8x8xf32>, vector<8x8xf32>, vector<8x8xf32> -> vector<8x8xf32>
    %299 = vector.extract_strided_slice %236 {offsets = [16, 0], sizes = [8, 32], strides = [1, 1]} : vector<32x32xf32> to vector<8x32xf32>
    %cst_113 = arith.constant dense<0.000000e+00> : vector<8x32xf32>
    %300 = tpu.matmul %298, %299, %cst_113 {dimension_numbers = #tpu.dot_dimension_numbers<[1], [0], [0], [1], [0, 0, 1, 1], [], []>} : vector<8x8xf32>, vector<8x32xf32>, vector<8x32xf32> -> vector<8x32xf32>
    %301 = arith.addf %280, %300 : vector<8x32xf32>
    %302 = vector.extract_strided_slice %225 {offsets = [0, 24], sizes = [8, 8], strides = [1, 1]} : vector<16x32xf32> to vector<8x8xf32>
    %303 = vector.extract_strided_slice %233 {offsets = [0, 24], sizes = [8, 8], strides = [1, 1]} : vector<16x32xf32> to vector<8x8xf32>
    %304 = vector.extract_strided_slice %234 {offsets = [0, 24], sizes = [8, 8], strides = [1, 1]} : vector<16x32xf32> to vector<8x8xf32>
    %cst_114 = arith.constant dense<0.000000e+00> : vector<8x8xf32>
    %305 = tpu.matmul %302, %303, %cst_114 {dimension_numbers = #tpu.dot_dimension_numbers<[1], [1], [0], [0], [0, 0, 1, 0], [], []>} : vector<8x8xf32>, vector<8x8xf32>, vector<8x8xf32> -> vector<8x8xf32>
    %306 = vector.extract_strided_slice %30 {offsets = [0, 0], sizes = [1, 8], strides = [1, 1]} : vector<2x8xf32> to vector<1x8xf32>
    %307 = vector.broadcast %306 : vector<1x8xf32> to vector<8x8xf32>
    %308 = arith.addf %305, %307 : vector<8x8xf32>
    %cst_115 = arith.constant dense<0xFF800000> : vector<8xf32>
    %309 = vector.multi_reduction <maximumf>, %308, %cst_115 [1] : vector<8x8xf32> to vector<8xf32>
    %310 = vector.shape_cast %309 : vector<8xf32> to vector<8x1xf32>
    %311 = vector.broadcast %310 : vector<8x1xf32> to vector<8x8xf32>
    %312 = arith.subf %308, %311 : vector<8x8xf32>
    %313 = math.exp %312 : vector<8x8xf32>
    %cst_116 = arith.constant dense<0.000000e+00> : vector<8xf32>
    %314 = vector.multi_reduction <add>, %313, %cst_116 [1] : vector<8x8xf32> to vector<8xf32>
    %315 = vector.shape_cast %314 : vector<8xf32> to vector<8x1xf32>
    %316 = tpu.reciprocal %315 {approx = true} : vector<8x1xf32> -> vector<8x1xf32>
    %317 = vector.broadcast %316 : vector<8x1xf32> to vector<8x8xf32>
    %318 = arith.mulf %313, %317 : vector<8x8xf32>
    %cst_117 = arith.constant dense<0.000000e+00> : vector<8x8xf32>
    %319 = tpu.matmul %318, %304, %cst_117 {dimension_numbers = #tpu.dot_dimension_numbers<[1], [0], [0], [1], [0, 0, 1, 1], [], []>} : vector<8x8xf32>, vector<8x8xf32>, vector<8x8xf32> -> vector<8x8xf32>
    %320 = vector.extract_strided_slice %236 {offsets = [24, 0], sizes = [8, 32], strides = [1, 1]} : vector<32x32xf32> to vector<8x32xf32>
    %cst_118 = arith.constant dense<0.000000e+00> : vector<8x32xf32>
    %321 = tpu.matmul %319, %320, %cst_118 {dimension_numbers = #tpu.dot_dimension_numbers<[1], [0], [0], [1], [0, 0, 1, 1], [], []>} : vector<8x8xf32>, vector<8x32xf32>, vector<8x32xf32> -> vector<8x32xf32>
    %322 = arith.addf %301, %321 : vector<8x32xf32>
    %c0_119 = arith.constant 0 : index
    %c0_120 = arith.constant 0 : index
    %323 = vector.load %arg30[%c0_119, %c0_120] : memref<16x32xf32, #tpu.memory_space<vmem>>, vector<8x32xf32>
    tpu.vector_store %arg30[%c0_119, %c0_120], %322 {strides = array<i32>} : memref<16x32xf32, #tpu.memory_space<vmem>>, vector<8x32xf32>,
    %cst_121 = arith.constant 0.000000e+00 : f32
    %324 = vector.broadcast %cst_121 : f32 to vector<8x32xf32>
    %325 = vector.extract_strided_slice %225 {offsets = [8, 0], sizes = [8, 8], strides = [1, 1]} : vector<16x32xf32> to vector<8x8xf32>
    %326 = vector.extract_strided_slice %233 {offsets = [8, 0], sizes = [8, 8], strides = [1, 1]} : vector<16x32xf32> to vector<8x8xf32>
    %327 = vector.extract_strided_slice %234 {offsets = [8, 0], sizes = [8, 8], strides = [1, 1]} : vector<16x32xf32> to vector<8x8xf32>
    %cst_122 = arith.constant dense<0.000000e+00> : vector<8x8xf32>
    %328 = tpu.matmul %325, %326, %cst_122 {dimension_numbers = #tpu.dot_dimension_numbers<[1], [1], [0], [0], [0, 0, 1, 0], [], []>} : vector<8x8xf32>, vector<8x8xf32>, vector<8x8xf32> -> vector<8x8xf32>
    %329 = vector.extract_strided_slice %30 {offsets = [1, 0], sizes = [1, 8], strides = [1, 1]} : vector<2x8xf32> to vector<1x8xf32>
    %330 = vector.broadcast %329 : vector<1x8xf32> to vector<8x8xf32>
    %331 = arith.addf %328, %330 : vector<8x8xf32>
    %cst_123 = arith.constant dense<0xFF800000> : vector<8xf32>
    %332 = vector.multi_reduction <maximumf>, %331, %cst_123 [1] : vector<8x8xf32> to vector<8xf32>
    %333 = vector.shape_cast %332 : vector<8xf32> to vector<8x1xf32>
    %334 = vector.broadcast %333 : vector<8x1xf32> to vector<8x8xf32>
    %335 = arith.subf %331, %334 : vector<8x8xf32>
    %336 = math.exp %335 : vector<8x8xf32>
    %cst_124 = arith.constant dense<0.000000e+00> : vector<8xf32>
    %337 = vector.multi_reduction <add>, %336, %cst_124 [1] : vector<8x8xf32> to vector<8xf32>
    %338 = vector.shape_cast %337 : vector<8xf32> to vector<8x1xf32>
    %339 = tpu.reciprocal %338 {approx = true} : vector<8x1xf32> -> vector<8x1xf32>
    %340 = vector.broadcast %339 : vector<8x1xf32> to vector<8x8xf32>
    %341 = arith.mulf %336, %340 : vector<8x8xf32>
    %cst_125 = arith.constant dense<0.000000e+00> : vector<8x8xf32>
    %342 = tpu.matmul %341, %327, %cst_125 {dimension_numbers = #tpu.dot_dimension_numbers<[1], [0], [0], [1], [0, 0, 1, 1], [], []>} : vector<8x8xf32>, vector<8x8xf32>, vector<8x8xf32> -> vector<8x8xf32>
    %343 = vector.extract_strided_slice %236 {offsets = [0, 0], sizes = [8, 32], strides = [1, 1]} : vector<32x32xf32> to vector<8x32xf32>
    %cst_126 = arith.constant dense<0.000000e+00> : vector<8x32xf32>
    %344 = tpu.matmul %342, %343, %cst_126 {dimension_numbers = #tpu.dot_dimension_numbers<[1], [0], [0], [1], [0, 0, 1, 1], [], []>} : vector<8x8xf32>, vector<8x32xf32>, vector<8x32xf32> -> vector<8x32xf32>
    %345 = arith.addf %324, %344 : vector<8x32xf32>
    %346 = vector.extract_strided_slice %225 {offsets = [8, 8], sizes = [8, 8], strides = [1, 1]} : vector<16x32xf32> to vector<8x8xf32>
    %347 = vector.extract_strided_slice %233 {offsets = [8, 8], sizes = [8, 8], strides = [1, 1]} : vector<16x32xf32> to vector<8x8xf32>
    %348 = vector.extract_strided_slice %234 {offsets = [8, 8], sizes = [8, 8], strides = [1, 1]} : vector<16x32xf32> to vector<8x8xf32>
    %cst_127 = arith.constant dense<0.000000e+00> : vector<8x8xf32>
    %349 = tpu.matmul %346, %347, %cst_127 {dimension_numbers = #tpu.dot_dimension_numbers<[1], [1], [0], [0], [0, 0, 1, 0], [], []>} : vector<8x8xf32>, vector<8x8xf32>, vector<8x8xf32> -> vector<8x8xf32>
    %350 = vector.extract_strided_slice %30 {offsets = [1, 0], sizes = [1, 8], strides = [1, 1]} : vector<2x8xf32> to vector<1x8xf32>
    %351 = vector.broadcast %350 : vector<1x8xf32> to vector<8x8xf32>
    %352 = arith.addf %349, %351 : vector<8x8xf32>
    %cst_128 = arith.constant dense<0xFF800000> : vector<8xf32>
    %353 = vector.multi_reduction <maximumf>, %352, %cst_128 [1] : vector<8x8xf32> to vector<8xf32>
    %354 = vector.shape_cast %353 : vector<8xf32> to vector<8x1xf32>
    %355 = vector.broadcast %354 : vector<8x1xf32> to vector<8x8xf32>
    %356 = arith.subf %352, %355 : vector<8x8xf32>
    %357 = math.exp %356 : vector<8x8xf32>
    %cst_129 = arith.constant dense<0.000000e+00> : vector<8xf32>
    %358 = vector.multi_reduction <add>, %357, %cst_129 [1] : vector<8x8xf32> to vector<8xf32>
    %359 = vector.shape_cast %358 : vector<8xf32> to vector<8x1xf32>
    %360 = tpu.reciprocal %359 {approx = true} : vector<8x1xf32> -> vector<8x1xf32>
    %361 = vector.broadcast %360 : vector<8x1xf32> to vector<8x8xf32>
    %362 = arith.mulf %357, %361 : vector<8x8xf32>
    %cst_130 = arith.constant dense<0.000000e+00> : vector<8x8xf32>
    %363 = tpu.matmul %362, %348, %cst_130 {dimension_numbers = #tpu.dot_dimension_numbers<[1], [0], [0], [1], [0, 0, 1, 1], [], []>} : vector<8x8xf32>, vector<8x8xf32>, vector<8x8xf32> -> vector<8x8xf32>
    %364 = vector.extract_strided_slice %236 {offsets = [8, 0], sizes = [8, 32], strides = [1, 1]} : vector<32x32xf32> to vector<8x32xf32>
    %cst_131 = arith.constant dense<0.000000e+00> : vector<8x32xf32>
    %365 = tpu.matmul %363, %364, %cst_131 {dimension_numbers = #tpu.dot_dimension_numbers<[1], [0], [0], [1], [0, 0, 1, 1], [], []>} : vector<8x8xf32>, vector<8x32xf32>, vector<8x32xf32> -> vector<8x32xf32>
    %366 = arith.addf %345, %365 : vector<8x32xf32>
    %367 = vector.extract_strided_slice %225 {offsets = [8, 16], sizes = [8, 8], strides = [1, 1]} : vector<16x32xf32> to vector<8x8xf32>
    %368 = vector.extract_strided_slice %233 {offsets = [8, 16], sizes = [8, 8], strides = [1, 1]} : vector<16x32xf32> to vector<8x8xf32>
    %369 = vector.extract_strided_slice %234 {offsets = [8, 16], sizes = [8, 8], strides = [1, 1]} : vector<16x32xf32> to vector<8x8xf32>
    %cst_132 = arith.constant dense<0.000000e+00> : vector<8x8xf32>
    %370 = tpu.matmul %367, %368, %cst_132 {dimension_numbers = #tpu.dot_dimension_numbers<[1], [1], [0], [0], [0, 0, 1, 0], [], []>} : vector<8x8xf32>, vector<8x8xf32>, vector<8x8xf32> -> vector<8x8xf32>
    %371 = vector.extract_strided_slice %30 {offsets = [1, 0], sizes = [1, 8], strides = [1, 1]} : vector<2x8xf32> to vector<1x8xf32>
    %372 = vector.broadcast %371 : vector<1x8xf32> to vector<8x8xf32>
    %373 = arith.addf %370, %372 : vector<8x8xf32>
    %cst_133 = arith.constant dense<0xFF800000> : vector<8xf32>
    %374 = vector.multi_reduction <maximumf>, %373, %cst_133 [1] : vector<8x8xf32> to vector<8xf32>
    %375 = vector.shape_cast %374 : vector<8xf32> to vector<8x1xf32>
    %376 = vector.broadcast %375 : vector<8x1xf32> to vector<8x8xf32>
    %377 = arith.subf %373, %376 : vector<8x8xf32>
    %378 = math.exp %377 : vector<8x8xf32>
    %cst_134 = arith.constant dense<0.000000e+00> : vector<8xf32>
    %379 = vector.multi_reduction <add>, %378, %cst_134 [1] : vector<8x8xf32> to vector<8xf32>
    %380 = vector.shape_cast %379 : vector<8xf32> to vector<8x1xf32>
    %381 = tpu.reciprocal %380 {approx = true} : vector<8x1xf32> -> vector<8x1xf32>
    %382 = vector.broadcast %381 : vector<8x1xf32> to vector<8x8xf32>
    %383 = arith.mulf %378, %382 : vector<8x8xf32>
    %cst_135 = arith.constant dense<0.000000e+00> : vector<8x8xf32>
    %384 = tpu.matmul %383, %369, %cst_135 {dimension_numbers = #tpu.dot_dimension_numbers<[1], [0], [0], [1], [0, 0, 1, 1], [], []>} : vector<8x8xf32>, vector<8x8xf32>, vector<8x8xf32> -> vector<8x8xf32>
    %385 = vector.extract_strided_slice %236 {offsets = [16, 0], sizes = [8, 32], strides = [1, 1]} : vector<32x32xf32> to vector<8x32xf32>
    %cst_136 = arith.constant dense<0.000000e+00> : vector<8x32xf32>
    %386 = tpu.matmul %384, %385, %cst_136 {dimension_numbers = #tpu.dot_dimension_numbers<[1], [0], [0], [1], [0, 0, 1, 1], [], []>} : vector<8x8xf32>, vector<8x32xf32>, vector<8x32xf32> -> vector<8x32xf32>
    %387 = arith.addf %366, %386 : vector<8x32xf32>
    %388 = vector.extract_strided_slice %225 {offsets = [8, 24], sizes = [8, 8], strides = [1, 1]} : vector<16x32xf32> to vector<8x8xf32>
    %389 = vector.extract_strided_slice %233 {offsets = [8, 24], sizes = [8, 8], strides = [1, 1]} : vector<16x32xf32> to vector<8x8xf32>
    %390 = vector.extract_strided_slice %234 {offsets = [8, 24], sizes = [8, 8], strides = [1, 1]} : vector<16x32xf32> to vector<8x8xf32>
    %cst_137 = arith.constant dense<0.000000e+00> : vector<8x8xf32>
    %391 = tpu.matmul %388, %389, %cst_137 {dimension_numbers = #tpu.dot_dimension_numbers<[1], [1], [0], [0], [0, 0, 1, 0], [], []>} : vector<8x8xf32>, vector<8x8xf32>, vector<8x8xf32> -> vector<8x8xf32>
    %392 = vector.extract_strided_slice %30 {offsets = [1, 0], sizes = [1, 8], strides = [1, 1]} : vector<2x8xf32> to vector<1x8xf32>
    %393 = vector.broadcast %392 : vector<1x8xf32> to vector<8x8xf32>
    %394 = arith.addf %391, %393 : vector<8x8xf32>
    %cst_138 = arith.constant dense<0xFF800000> : vector<8xf32>
    %395 = vector.multi_reduction <maximumf>, %394, %cst_138 [1] : vector<8x8xf32> to vector<8xf32>
    %396 = vector.shape_cast %395 : vector<8xf32> to vector<8x1xf32>
    %397 = vector.broadcast %396 : vector<8x1xf32> to vector<8x8xf32>
    %398 = arith.subf %394, %397 : vector<8x8xf32>
    %399 = math.exp %398 : vector<8x8xf32>
    %cst_139 = arith.constant dense<0.000000e+00> : vector<8xf32>
    %400 = vector.multi_reduction <add>, %399, %cst_139 [1] : vector<8x8xf32> to vector<8xf32>
    %401 = vector.shape_cast %400 : vector<8xf32> to vector<8x1xf32>
    %402 = tpu.reciprocal %401 {approx = true} : vector<8x1xf32> -> vector<8x1xf32>
    %403 = vector.broadcast %402 : vector<8x1xf32> to vector<8x8xf32>
    %404 = arith.mulf %399, %403 : vector<8x8xf32>
    %cst_140 = arith.constant dense<0.000000e+00> : vector<8x8xf32>
    %405 = tpu.matmul %404, %390, %cst_140 {dimension_numbers = #tpu.dot_dimension_numbers<[1], [0], [0], [1], [0, 0, 1, 1], [], []>} : vector<8x8xf32>, vector<8x8xf32>, vector<8x8xf32> -> vector<8x8xf32>
    %406 = vector.extract_strided_slice %236 {offsets = [24, 0], sizes = [8, 32], strides = [1, 1]} : vector<32x32xf32> to vector<8x32xf32>
    %cst_141 = arith.constant dense<0.000000e+00> : vector<8x32xf32>
    %407 = tpu.matmul %405, %406, %cst_141 {dimension_numbers = #tpu.dot_dimension_numbers<[1], [0], [0], [1], [0, 0, 1, 1], [], []>} : vector<8x8xf32>, vector<8x32xf32>, vector<8x32xf32> -> vector<8x32xf32>
    %408 = arith.addf %387, %407 : vector<8x32xf32>
    %c8_142 = arith.constant 8 : index
    %c0_143 = arith.constant 0 : index
    %409 = vector.load %arg30[%c8_142, %c0_143] : memref<16x32xf32, #tpu.memory_space<vmem>>, vector<8x32xf32>
    tpu.vector_store %arg30[%c8_142, %c0_143], %408 {strides = array<i32>} : memref<16x32xf32, #tpu.memory_space<vmem>>, vector<8x32xf32>,
    %c0_144 = arith.constant 0 : index
    %c0_145 = arith.constant 0 : index
    %410 = vector.load %arg30[%c0_144, %c0_145] : memref<16x32xf32, #tpu.memory_space<vmem>>, vector<16x32xf32>
    %411 = vector.broadcast %237 : vector<1x32xf32> to vector<16x32xf32>
    %412 = arith.addf %410, %411 : vector<16x32xf32>
    %413 = arith.addf %218, %412 : vector<16x32xf32>
    %c0_146 = arith.constant 0 : index
    %c0_147 = arith.constant 0 : index
    %414 = vector.load %arg16[%c0_146, %c0_147] : memref<2x32xf32, #tpu.memory_space<vmem>>, vector<1x32xf32>
    %c0_148 = arith.constant 0 : index
    %c0_149 = arith.constant 0 : index
    %415 = vector.load %arg17[%c0_148, %c0_149] : memref<2x32xf32, #tpu.memory_space<vmem>>, vector<1x32xf32>
    %cst_150 = arith.constant dense<0.000000e+00> : vector<16xf32>
    %416 = vector.multi_reduction <add>, %413, %cst_150 [1] : vector<16x32xf32> to vector<16xf32>
    %417 = vector.shape_cast %416 : vector<16xf32> to vector<16x1xf32>
    %cst_151 = arith.constant 3.200000e+01 : f32
    %418 = vector.broadcast %cst_151 : f32 to vector<16x1xf32>
    %419 = arith.divf %417, %418 : vector<16x1xf32>
    %420 = vector.broadcast %419 : vector<16x1xf32> to vector<16x32xf32>
    %421 = arith.subf %413, %420 : vector<16x32xf32>
    %422 = arith.mulf %421, %421 : vector<16x32xf32>
    %cst_152 = arith.constant dense<0.000000e+00> : vector<16xf32>
    %423 = vector.multi_reduction <add>, %422, %cst_152 [1] : vector<16x32xf32> to vector<16xf32>
    %424 = vector.shape_cast %423 : vector<16xf32> to vector<16x1xf32>
    %cst_153 = arith.constant 3.200000e+01 : f32
    %425 = vector.broadcast %cst_153 : f32 to vector<16x1xf32>
    %426 = arith.divf %424, %425 : vector<16x1xf32>
    %427 = vector.broadcast %419 : vector<16x1xf32> to vector<16x32xf32>
    %428 = arith.subf %413, %427 : vector<16x32xf32>
    %cst_154 = arith.constant 9.99999974E-6 : f32
    %429 = vector.broadcast %cst_154 : f32 to vector<16x1xf32>
    %430 = arith.addf %426, %429 : vector<16x1xf32>
    %431 = math.rsqrt %430 : vector<16x1xf32>
    %432 = vector.broadcast %431 : vector<16x1xf32> to vector<16x32xf32>
    %433 = arith.mulf %428, %432 : vector<16x32xf32>
    %434 = vector.broadcast %414 : vector<1x32xf32> to vector<16x32xf32>
    %435 = arith.mulf %433, %434 : vector<16x32xf32>
    %436 = vector.broadcast %415 : vector<1x32xf32> to vector<16x32xf32>
    %437 = arith.addf %435, %436 : vector<16x32xf32>
    %c0_155 = arith.constant 0 : index
    %c0_156 = arith.constant 0 : index
    %c0_157 = arith.constant 0 : index
    %438 = vector.load %arg18[%c0_155, %c0_156, %c0_157] : memref<2x32x64xf32, #tpu.memory_space<vmem>>, vector<1x32x64xf32>
    %439 = vector.shape_cast %438 : vector<1x32x64xf32> to vector<32x64xf32>
    %cst_158 = arith.constant dense<0.000000e+00> : vector<16x64xf32>
    %440 = tpu.matmul %437, %439, %cst_158 {dimension_numbers = #tpu.dot_dimension_numbers<[1], [0], [0], [1], [0, 0, 1, 1], [], []>} : vector<16x32xf32>, vector<32x64xf32>, vector<16x64xf32> -> vector<16x64xf32>
    %c0_159 = arith.constant 0 : index
    %c0_160 = arith.constant 0 : index
    %441 = vector.load %arg19[%c0_159, %c0_160] : memref<2x64xf32, #tpu.memory_space<vmem>>, vector<1x64xf32>
    %442 = vector.broadcast %441 : vector<1x64xf32> to vector<16x64xf32>
    %443 = arith.addf %440, %442 : vector<16x64xf32>
    %444 = arith.mulf %443, %443 : vector<16x64xf32>
    %445 = arith.mulf %443, %444 : vector<16x64xf32>
    %cst_161 = arith.constant 4.471500e-02 : f32
    %446 = vector.broadcast %cst_161 : f32 to vector<16x64xf32>
    %447 = arith.mulf %446, %445 : vector<16x64xf32>
    %448 = arith.addf %443, %447 : vector<16x64xf32>
    %cst_162 = arith.constant 0.797884583 : f32
    %449 = vector.broadcast %cst_162 : f32 to vector<16x64xf32>
    %450 = arith.mulf %449, %448 : vector<16x64xf32>
    %451 = math.tanh %450 : vector<16x64xf32>
    %cst_163 = arith.constant 1.000000e+00 : f32
    %452 = vector.broadcast %cst_163 : f32 to vector<16x64xf32>
    %453 = arith.addf %452, %451 : vector<16x64xf32>
    %cst_164 = arith.constant 5.000000e-01 : f32
    %454 = vector.broadcast %cst_164 : f32 to vector<16x64xf32>
    %455 = arith.mulf %454, %453 : vector<16x64xf32>
    %456 = arith.mulf %443, %455 : vector<16x64xf32>
    %c0_165 = arith.constant 0 : index
    %c0_166 = arith.constant 0 : index
    %c0_167 = arith.constant 0 : index
    %457 = vector.load %arg20[%c0_165, %c0_166, %c0_167] : memref<2x64x32xf32, #tpu.memory_space<vmem>>, vector<1x64x32xf32>
    %458 = vector.shape_cast %457 : vector<1x64x32xf32> to vector<64x32xf32>
    %cst_168 = arith.constant dense<0.000000e+00> : vector<16x32xf32>
    %459 = tpu.matmul %456, %458, %cst_168 {dimension_numbers = #tpu.dot_dimension_numbers<[1], [0], [0], [1], [0, 0, 1, 1], [], []>} : vector<16x64xf32>, vector<64x32xf32>, vector<16x32xf32> -> vector<16x32xf32>
    %c0_169 = arith.constant 0 : index
    %c0_170 = arith.constant 0 : index
    %460 = vector.load %arg21[%c0_169, %c0_170] : memref<2x32xf32, #tpu.memory_space<vmem>>, vector<1x32xf32>
    %461 = vector.broadcast %460 : vector<1x32xf32> to vector<16x32xf32>
    %462 = arith.addf %459, %461 : vector<16x32xf32>
    %463 = arith.addf %437, %462 : vector<16x32xf32>
    %c0_171 = arith.constant 0 : index
    %c0_172 = arith.constant 0 : index
    %464 = vector.load %arg22[%c0_171, %c0_172] : memref<2x32xf32, #tpu.memory_space<vmem>>, vector<1x32xf32>
    %c0_173 = arith.constant 0 : index
    %c0_174 = arith.constant 0 : index
    %465 = vector.load %arg23[%c0_173, %c0_174] : memref<2x32xf32, #tpu.memory_space<vmem>>, vector<1x32xf32>
    %cst_175 = arith.constant dense<0.000000e+00> : vector<16xf32>
    %466 = vector.multi_reduction <add>, %463, %cst_175 [1] : vector<16x32xf32> to vector<16xf32>
    %467 = vector.shape_cast %466 : vector<16xf32> to vector<16x1xf32>
    %cst_176 = arith.constant 3.200000e+01 : f32
    %468 = vector.broadcast %cst_176 : f32 to vector<16x1xf32>
    %469 = arith.divf %467, %468 : vector<16x1xf32>
    %470 = vector.broadcast %469 : vector<16x1xf32> to vector<16x32xf32>
    %471 = arith.subf %463, %470 : vector<16x32xf32>
    %472 = arith.mulf %471, %471 : vector<16x32xf32>
    %cst_177 = arith.constant dense<0.000000e+00> : vector<16xf32>
    %473 = vector.multi_reduction <add>, %472, %cst_177 [1] : vector<16x32xf32> to vector<16xf32>
    %474 = vector.shape_cast %473 : vector<16xf32> to vector<16x1xf32>
    %cst_178 = arith.constant 3.200000e+01 : f32
    %475 = vector.broadcast %cst_178 : f32 to vector<16x1xf32>
    %476 = arith.divf %474, %475 : vector<16x1xf32>
    %477 = vector.broadcast %469 : vector<16x1xf32> to vector<16x32xf32>
    %478 = arith.subf %463, %477 : vector<16x32xf32>
    %cst_179 = arith.constant 9.99999974E-6 : f32
    %479 = vector.broadcast %cst_179 : f32 to vector<16x1xf32>
    %480 = arith.addf %476, %479 : vector<16x1xf32>
    %481 = math.rsqrt %480 : vector<16x1xf32>
    %482 = vector.broadcast %481 : vector<16x1xf32> to vector<16x32xf32>
    %483 = arith.mulf %478, %482 : vector<16x32xf32>
    %484 = vector.broadcast %464 : vector<1x32xf32> to vector<16x32xf32>
    %485 = arith.mulf %483, %484 : vector<16x32xf32>
    %486 = vector.broadcast %465 : vector<1x32xf32> to vector<16x32xf32>
    %487 = arith.addf %485, %486 : vector<16x32xf32>
    %c1 = arith.constant 1 : index
    %c0_180 = arith.constant 0 : index
    %c0_181 = arith.constant 0 : index
    %488 = vector.load %arg6[%c1, %c0_180, %c0_181] : memref<2x32x96xf32, #tpu.memory_space<vmem>>, vector<1x32x96xf32>
    %489 = vector.shape_cast %488 : vector<1x32x96xf32> to vector<32x96xf32>
    %cst_182 = arith.constant dense<0.000000e+00> : vector<16x96xf32>
    %490 = tpu.matmul %487, %489, %cst_182 {dimension_numbers = #tpu.dot_dimension_numbers<[1], [0], [0], [1], [0, 0, 1, 1], [], []>} : vector<16x32xf32>, vector<32x96xf32>, vector<16x96xf32> -> vector<16x96xf32>
    %c1_183 = arith.constant 1 : index
    %c0_184 = arith.constant 0 : index
    %491 = vector.load %arg7[%c1_183, %c0_184] : memref<2x96xf32, #tpu.memory_space<vmem>>, vector<1x96xf32>
    %492 = vector.broadcast %491 : vector<1x96xf32> to vector<16x96xf32>
    %493 = arith.addf %490, %492 : vector<16x96xf32>
    %494 = vector.extract_strided_slice %493 {offsets = [0, 0], sizes = [16, 32], strides = [1, 1]} : vector<16x96xf32> to vector<16x32xf32>
    %495 = vector.extract_strided_slice %493 {offsets = [0, 32], sizes = [16, 32], strides = [1, 1]} : vector<16x96xf32> to vector<16x32xf32>
    %496 = vector.extract_strided_slice %493 {offsets = [0, 64], sizes = [16, 32], strides = [1, 1]} : vector<16x96xf32> to vector<16x32xf32>
    %c1_185 = arith.constant 1 : index
    %c0_186 = arith.constant 0 : index
    %c0_187 = arith.constant 0 : index
    %497 = vector.load %arg8[%c1_185, %c0_186, %c0_187] : memref<2x32x32xf32, #tpu.memory_space<vmem>>, vector<1x32x32xf32>
    %498 = vector.shape_cast %497 : vector<1x32x32xf32> to vector<32x32xf32>
    %c1_188 = arith.constant 1 : index
    %c0_189 = arith.constant 0 : index
    %499 = vector.load %arg9[%c1_188, %c0_189] : memref<2x32xf32, #tpu.memory_space<vmem>>, vector<1x32xf32>
    %cst_190 = arith.constant 0.000000e+00 : f32
    %500 = vector.broadcast %cst_190 : f32 to vector<8x32xf32>
    %501 = vector.extract_strided_slice %494 {offsets = [0, 0], sizes = [8, 8], strides = [1, 1]} : vector<16x32xf32> to vector<8x8xf32>
    %502 = vector.extract_strided_slice %495 {offsets = [0, 0], sizes = [8, 8], strides = [1, 1]} : vector<16x32xf32> to vector<8x8xf32>
    %503 = vector.extract_strided_slice %496 {offsets = [0, 0], sizes = [8, 8], strides = [1, 1]} : vector<16x32xf32> to vector<8x8xf32>
    %cst_191 = arith.constant dense<0.000000e+00> : vector<8x8xf32>
    %504 = tpu.matmul %501, %502, %cst_191 {dimension_numbers = #tpu.dot_dimension_numbers<[1], [1], [0], [0], [0, 0, 1, 0], [], []>} : vector<8x8xf32>, vector<8x8xf32>, vector<8x8xf32> -> vector<8x8xf32>
    %cst_192 = arith.constant dense<0xFF800000> : vector<8xf32>
    %505 = vector.multi_reduction <maximumf>, %504, %cst_192 [1] : vector<8x8xf32> to vector<8xf32>
    %506 = vector.shape_cast %505 : vector<8xf32> to vector<8x1xf32>
    %507 = vector.broadcast %506 : vector<8x1xf32> to vector<8x8xf32>
    %508 = arith.subf %504, %507 : vector<8x8xf32>
    %509 = math.exp %508 : vector<8x8xf32>
    %cst_193 = arith.constant dense<0.000000e+00> : vector<8xf32>
    %510 = vector.multi_reduction <add>, %509, %cst_193 [1] : vector<8x8xf32> to vector<8xf32>
    %511 = vector.shape_cast %510 : vector<8xf32> to vector<8x1xf32>
    %512 = tpu.reciprocal %511 {approx = true} : vector<8x1xf32> -> vector<8x1xf32>
    %513 = vector.broadcast %512 : vector<8x1xf32> to vector<8x8xf32>
    %514 = arith.mulf %509, %513 : vector<8x8xf32>
    %cst_194 = arith.constant dense<0.000000e+00> : vector<8x8xf32>
    %515 = tpu.matmul %514, %503, %cst_194 {dimension_numbers = #tpu.dot_dimension_numbers<[1], [0], [0], [1], [0, 0, 1, 1], [], []>} : vector<8x8xf32>, vector<8x8xf32>, vector<8x8xf32> -> vector<8x8xf32>
    %516 = vector.extract_strided_slice %498 {offsets = [0, 0], sizes = [8, 32], strides = [1, 1]} : vector<32x32xf32> to vector<8x32xf32>
    %cst_195 = arith.constant dense<0.000000e+00> : vector<8x32xf32>
    %517 = tpu.matmul %515, %516, %cst_195 {dimension_numbers = #tpu.dot_dimension_numbers<[1], [0], [0], [1], [0, 0, 1, 1], [], []>} : vector<8x8xf32>, vector<8x32xf32>, vector<8x32xf32> -> vector<8x32xf32>
    %518 = arith.addf %500, %517 : vector<8x32xf32>
    %519 = vector.extract_strided_slice %494 {offsets = [0, 8], sizes = [8, 8], strides = [1, 1]} : vector<16x32xf32> to vector<8x8xf32>
    %520 = vector.extract_strided_slice %495 {offsets = [0, 8], sizes = [8, 8], strides = [1, 1]} : vector<16x32xf32> to vector<8x8xf32>
    %521 = vector.extract_strided_slice %496 {offsets = [0, 8], sizes = [8, 8], strides = [1, 1]} : vector<16x32xf32> to vector<8x8xf32>
    %cst_196 = arith.constant dense<0.000000e+00> : vector<8x8xf32>
    %522 = tpu.matmul %519, %520, %cst_196 {dimension_numbers = #tpu.dot_dimension_numbers<[1], [1], [0], [0], [0, 0, 1, 0], [], []>} : vector<8x8xf32>, vector<8x8xf32>, vector<8x8xf32> -> vector<8x8xf32>
    %cst_197 = arith.constant dense<0xFF800000> : vector<8xf32>
    %523 = vector.multi_reduction <maximumf>, %522, %cst_197 [1] : vector<8x8xf32> to vector<8xf32>
    %524 = vector.shape_cast %523 : vector<8xf32> to vector<8x1xf32>
    %525 = vector.broadcast %524 : vector<8x1xf32> to vector<8x8xf32>
    %526 = arith.subf %522, %525 : vector<8x8xf32>
    %527 = math.exp %526 : vector<8x8xf32>
    %cst_198 = arith.constant dense<0.000000e+00> : vector<8xf32>
    %528 = vector.multi_reduction <add>, %527, %cst_198 [1] : vector<8x8xf32> to vector<8xf32>
    %529 = vector.shape_cast %528 : vector<8xf32> to vector<8x1xf32>
    %530 = tpu.reciprocal %529 {approx = true} : vector<8x1xf32> -> vector<8x1xf32>
    %531 = vector.broadcast %530 : vector<8x1xf32> to vector<8x8xf32>
    %532 = arith.mulf %527, %531 : vector<8x8xf32>
    %cst_199 = arith.constant dense<0.000000e+00> : vector<8x8xf32>
    %533 = tpu.matmul %532, %521, %cst_199 {dimension_numbers = #tpu.dot_dimension_numbers<[1], [0], [0], [1], [0, 0, 1, 1], [], []>} : vector<8x8xf32>, vector<8x8xf32>, vector<8x8xf32> -> vector<8x8xf32>
    %534 = vector.extract_strided_slice %498 {offsets = [8, 0], sizes = [8, 32], strides = [1, 1]} : vector<32x32xf32> to vector<8x32xf32>
    %cst_200 = arith.constant dense<0.000000e+00> : vector<8x32xf32>
    %535 = tpu.matmul %533, %534, %cst_200 {dimension_numbers = #tpu.dot_dimension_numbers<[1], [0], [0], [1], [0, 0, 1, 1], [], []>} : vector<8x8xf32>, vector<8x32xf32>, vector<8x32xf32> -> vector<8x32xf32>
    %536 = arith.addf %518, %535 : vector<8x32xf32>
    %537 = vector.extract_strided_slice %494 {offsets = [0, 16], sizes = [8, 8], strides = [1, 1]} : vector<16x32xf32> to vector<8x8xf32>
    %538 = vector.extract_strided_slice %495 {offsets = [0, 16], sizes = [8, 8], strides = [1, 1]} : vector<16x32xf32> to vector<8x8xf32>
    %539 = vector.extract_strided_slice %496 {offsets = [0, 16], sizes = [8, 8], strides = [1, 1]} : vector<16x32xf32> to vector<8x8xf32>
    %cst_201 = arith.constant dense<0.000000e+00> : vector<8x8xf32>
    %540 = tpu.matmul %537, %538, %cst_201 {dimension_numbers = #tpu.dot_dimension_numbers<[1], [1], [0], [0], [0, 0, 1, 0], [], []>} : vector<8x8xf32>, vector<8x8xf32>, vector<8x8xf32> -> vector<8x8xf32>
    %cst_202 = arith.constant dense<0xFF800000> : vector<8xf32>
    %541 = vector.multi_reduction <maximumf>, %540, %cst_202 [1] : vector<8x8xf32> to vector<8xf32>
    %542 = vector.shape_cast %541 : vector<8xf32> to vector<8x1xf32>
    %543 = vector.broadcast %542 : vector<8x1xf32> to vector<8x8xf32>
    %544 = arith.subf %540, %543 : vector<8x8xf32>
    %545 = math.exp %544 : vector<8x8xf32>
    %cst_203 = arith.constant dense<0.000000e+00> : vector<8xf32>
    %546 = vector.multi_reduction <add>, %545, %cst_203 [1] : vector<8x8xf32> to vector<8xf32>
    %547 = vector.shape_cast %546 : vector<8xf32> to vector<8x1xf32>
    %548 = tpu.reciprocal %547 {approx = true} : vector<8x1xf32> -> vector<8x1xf32>
    %549 = vector.broadcast %548 : vector<8x1xf32> to vector<8x8xf32>
    %550 = arith.mulf %545, %549 : vector<8x8xf32>
    %cst_204 = arith.constant dense<0.000000e+00> : vector<8x8xf32>
    %551 = tpu.matmul %550, %539, %cst_204 {dimension_numbers = #tpu.dot_dimension_numbers<[1], [0], [0], [1], [0, 0, 1, 1], [], []>} : vector<8x8xf32>, vector<8x8xf32>, vector<8x8xf32> -> vector<8x8xf32>
    %552 = vector.extract_strided_slice %498 {offsets = [16, 0], sizes = [8, 32], strides = [1, 1]} : vector<32x32xf32> to vector<8x32xf32>
    %cst_205 = arith.constant dense<0.000000e+00> : vector<8x32xf32>
    %553 = tpu.matmul %551, %552, %cst_205 {dimension_numbers = #tpu.dot_dimension_numbers<[1], [0], [0], [1], [0, 0, 1, 1], [], []>} : vector<8x8xf32>, vector<8x32xf32>, vector<8x32xf32> -> vector<8x32xf32>
    %554 = arith.addf %536, %553 : vector<8x32xf32>
    %555 = vector.extract_strided_slice %494 {offsets = [0, 24], sizes = [8, 8], strides = [1, 1]} : vector<16x32xf32> to vector<8x8xf32>
    %556 = vector.extract_strided_slice %495 {offsets = [0, 24], sizes = [8, 8], strides = [1, 1]} : vector<16x32xf32> to vector<8x8xf32>
    %557 = vector.extract_strided_slice %496 {offsets = [0, 24], sizes = [8, 8], strides = [1, 1]} : vector<16x32xf32> to vector<8x8xf32>
    %cst_206 = arith.constant dense<0.000000e+00> : vector<8x8xf32>
    %558 = tpu.matmul %555, %556, %cst_206 {dimension_numbers = #tpu.dot_dimension_numbers<[1], [1], [0], [0], [0, 0, 1, 0], [], []>} : vector<8x8xf32>, vector<8x8xf32>, vector<8x8xf32> -> vector<8x8xf32>
    %cst_207 = arith.constant dense<0xFF800000> : vector<8xf32>
    %559 = vector.multi_reduction <maximumf>, %558, %cst_207 [1] : vector<8x8xf32> to vector<8xf32>
    %560 = vector.shape_cast %559 : vector<8xf32> to vector<8x1xf32>
    %561 = vector.broadcast %560 : vector<8x1xf32> to vector<8x8xf32>
    %562 = arith.subf %558, %561 : vector<8x8xf32>
    %563 = math.exp %562 : vector<8x8xf32>
    %cst_208 = arith.constant dense<0.000000e+00> : vector<8xf32>
    %564 = vector.multi_reduction <add>, %563, %cst_208 [1] : vector<8x8xf32> to vector<8xf32>
    %565 = vector.shape_cast %564 : vector<8xf32> to vector<8x1xf32>
    %566 = tpu.reciprocal %565 {approx = true} : vector<8x1xf32> -> vector<8x1xf32>
    %567 = vector.broadcast %566 : vector<8x1xf32> to vector<8x8xf32>
    %568 = arith.mulf %563, %567 : vector<8x8xf32>
    %cst_209 = arith.constant dense<0.000000e+00> : vector<8x8xf32>
    %569 = tpu.matmul %568, %557, %cst_209 {dimension_numbers = #tpu.dot_dimension_numbers<[1], [0], [0], [1], [0, 0, 1, 1], [], []>} : vector<8x8xf32>, vector<8x8xf32>, vector<8x8xf32> -> vector<8x8xf32>
    %570 = vector.extract_strided_slice %498 {offsets = [24, 0], sizes = [8, 32], strides = [1, 1]} : vector<32x32xf32> to vector<8x32xf32>
    %cst_210 = arith.constant dense<0.000000e+00> : vector<8x32xf32>
    %571 = tpu.matmul %569, %570, %cst_210 {dimension_numbers = #tpu.dot_dimension_numbers<[1], [0], [0], [1], [0, 0, 1, 1], [], []>} : vector<8x8xf32>, vector<8x32xf32>, vector<8x32xf32> -> vector<8x32xf32>
    %572 = arith.addf %554, %571 : vector<8x32xf32>
    %c0_211 = arith.constant 0 : index
    %c0_212 = arith.constant 0 : index
    %573 = vector.load %arg30[%c0_211, %c0_212] : memref<16x32xf32, #tpu.memory_space<vmem>>, vector<8x32xf32>
    tpu.vector_store %arg30[%c0_211, %c0_212], %572 {strides = array<i32>} : memref<16x32xf32, #tpu.memory_space<vmem>>, vector<8x32xf32>,
    %cst_213 = arith.constant 0.000000e+00 : f32
    %574 = vector.broadcast %cst_213 : f32 to vector<8x32xf32>
    %575 = vector.extract_strided_slice %494 {offsets = [8, 0], sizes = [8, 8], strides = [1, 1]} : vector<16x32xf32> to vector<8x8xf32>
    %576 = vector.extract_strided_slice %495 {offsets = [8, 0], sizes = [8, 8], strides = [1, 1]} : vector<16x32xf32> to vector<8x8xf32>
    %577 = vector.extract_strided_slice %496 {offsets = [8, 0], sizes = [8, 8], strides = [1, 1]} : vector<16x32xf32> to vector<8x8xf32>
    %cst_214 = arith.constant dense<0.000000e+00> : vector<8x8xf32>
    %578 = tpu.matmul %575, %576, %cst_214 {dimension_numbers = #tpu.dot_dimension_numbers<[1], [1], [0], [0], [0, 0, 1, 0], [], []>} : vector<8x8xf32>, vector<8x8xf32>, vector<8x8xf32> -> vector<8x8xf32>
    %cst_215 = arith.constant dense<0xFF800000> : vector<8xf32>
    %579 = vector.multi_reduction <maximumf>, %578, %cst_215 [1] : vector<8x8xf32> to vector<8xf32>
    %580 = vector.shape_cast %579 : vector<8xf32> to vector<8x1xf32>
    %581 = vector.broadcast %580 : vector<8x1xf32> to vector<8x8xf32>
    %582 = arith.subf %578, %581 : vector<8x8xf32>
    %583 = math.exp %582 : vector<8x8xf32>
    %cst_216 = arith.constant dense<0.000000e+00> : vector<8xf32>
    %584 = vector.multi_reduction <add>, %583, %cst_216 [1] : vector<8x8xf32> to vector<8xf32>
    %585 = vector.shape_cast %584 : vector<8xf32> to vector<8x1xf32>
    %586 = tpu.reciprocal %585 {approx = true} : vector<8x1xf32> -> vector<8x1xf32>
    %587 = vector.broadcast %586 : vector<8x1xf32> to vector<8x8xf32>
    %588 = arith.mulf %583, %587 : vector<8x8xf32>
    %cst_217 = arith.constant dense<0.000000e+00> : vector<8x8xf32>
    %589 = tpu.matmul %588, %577, %cst_217 {dimension_numbers = #tpu.dot_dimension_numbers<[1], [0], [0], [1], [0, 0, 1, 1], [], []>} : vector<8x8xf32>, vector<8x8xf32>, vector<8x8xf32> -> vector<8x8xf32>
    %590 = vector.extract_strided_slice %498 {offsets = [0, 0], sizes = [8, 32], strides = [1, 1]} : vector<32x32xf32> to vector<8x32xf32>
    %cst_218 = arith.constant dense<0.000000e+00> : vector<8x32xf32>
    %591 = tpu.matmul %589, %590, %cst_218 {dimension_numbers = #tpu.dot_dimension_numbers<[1], [0], [0], [1], [0, 0, 1, 1], [], []>} : vector<8x8xf32>, vector<8x32xf32>, vector<8x32xf32> -> vector<8x32xf32>
    %592 = arith.addf %574, %591 : vector<8x32xf32>
    %593 = vector.extract_strided_slice %494 {offsets = [8, 8], sizes = [8, 8], strides = [1, 1]} : vector<16x32xf32> to vector<8x8xf32>
    %594 = vector.extract_strided_slice %495 {offsets = [8, 8], sizes = [8, 8], strides = [1, 1]} : vector<16x32xf32> to vector<8x8xf32>
    %595 = vector.extract_strided_slice %496 {offsets = [8, 8], sizes = [8, 8], strides = [1, 1]} : vector<16x32xf32> to vector<8x8xf32>
    %cst_219 = arith.constant dense<0.000000e+00> : vector<8x8xf32>
    %596 = tpu.matmul %593, %594, %cst_219 {dimension_numbers = #tpu.dot_dimension_numbers<[1], [1], [0], [0], [0, 0, 1, 0], [], []>} : vector<8x8xf32>, vector<8x8xf32>, vector<8x8xf32> -> vector<8x8xf32>
    %cst_220 = arith.constant dense<0xFF800000> : vector<8xf32>
    %597 = vector.multi_reduction <maximumf>, %596, %cst_220 [1] : vector<8x8xf32> to vector<8xf32>
    %598 = vector.shape_cast %597 : vector<8xf32> to vector<8x1xf32>
    %599 = vector.broadcast %598 : vector<8x1xf32> to vector<8x8xf32>
    %600 = arith.subf %596, %599 : vector<8x8xf32>
    %601 = math.exp %600 : vector<8x8xf32>
    %cst_221 = arith.constant dense<0.000000e+00> : vector<8xf32>
    %602 = vector.multi_reduction <add>, %601, %cst_221 [1] : vector<8x8xf32> to vector<8xf32>
    %603 = vector.shape_cast %602 : vector<8xf32> to vector<8x1xf32>
    %604 = tpu.reciprocal %603 {approx = true} : vector<8x1xf32> -> vector<8x1xf32>
    %605 = vector.broadcast %604 : vector<8x1xf32> to vector<8x8xf32>
    %606 = arith.mulf %601, %605 : vector<8x8xf32>
    %cst_222 = arith.constant dense<0.000000e+00> : vector<8x8xf32>
    %607 = tpu.matmul %606, %595, %cst_222 {dimension_numbers = #tpu.dot_dimension_numbers<[1], [0], [0], [1], [0, 0, 1, 1], [], []>} : vector<8x8xf32>, vector<8x8xf32>, vector<8x8xf32> -> vector<8x8xf32>
    %608 = vector.extract_strided_slice %498 {offsets = [8, 0], sizes = [8, 32], strides = [1, 1]} : vector<32x32xf32> to vector<8x32xf32>
    %cst_223 = arith.constant dense<0.000000e+00> : vector<8x32xf32>
    %609 = tpu.matmul %607, %608, %cst_223 {dimension_numbers = #tpu.dot_dimension_numbers<[1], [0], [0], [1], [0, 0, 1, 1], [], []>} : vector<8x8xf32>, vector<8x32xf32>, vector<8x32xf32> -> vector<8x32xf32>
    %610 = arith.addf %592, %609 : vector<8x32xf32>
    %611 = vector.extract_strided_slice %494 {offsets = [8, 16], sizes = [8, 8], strides = [1, 1]} : vector<16x32xf32> to vector<8x8xf32>
    %612 = vector.extract_strided_slice %495 {offsets = [8, 16], sizes = [8, 8], strides = [1, 1]} : vector<16x32xf32> to vector<8x8xf32>
    %613 = vector.extract_strided_slice %496 {offsets = [8, 16], sizes = [8, 8], strides = [1, 1]} : vector<16x32xf32> to vector<8x8xf32>
    %cst_224 = arith.constant dense<0.000000e+00> : vector<8x8xf32>
    %614 = tpu.matmul %611, %612, %cst_224 {dimension_numbers = #tpu.dot_dimension_numbers<[1], [1], [0], [0], [0, 0, 1, 0], [], []>} : vector<8x8xf32>, vector<8x8xf32>, vector<8x8xf32> -> vector<8x8xf32>
    %cst_225 = arith.constant dense<0xFF800000> : vector<8xf32>
    %615 = vector.multi_reduction <maximumf>, %614, %cst_225 [1] : vector<8x8xf32> to vector<8xf32>
    %616 = vector.shape_cast %615 : vector<8xf32> to vector<8x1xf32>
    %617 = vector.broadcast %616 : vector<8x1xf32> to vector<8x8xf32>
    %618 = arith.subf %614, %617 : vector<8x8xf32>
    %619 = math.exp %618 : vector<8x8xf32>
    %cst_226 = arith.constant dense<0.000000e+00> : vector<8xf32>
    %620 = vector.multi_reduction <add>, %619, %cst_226 [1] : vector<8x8xf32> to vector<8xf32>
    %621 = vector.shape_cast %620 : vector<8xf32> to vector<8x1xf32>
    %622 = tpu.reciprocal %621 {approx = true} : vector<8x1xf32> -> vector<8x1xf32>
    %623 = vector.broadcast %622 : vector<8x1xf32> to vector<8x8xf32>
    %624 = arith.mulf %619, %623 : vector<8x8xf32>
    %cst_227 = arith.constant dense<0.000000e+00> : vector<8x8xf32>
    %625 = tpu.matmul %624, %613, %cst_227 {dimension_numbers = #tpu.dot_dimension_numbers<[1], [0], [0], [1], [0, 0, 1, 1], [], []>} : vector<8x8xf32>, vector<8x8xf32>, vector<8x8xf32> -> vector<8x8xf32>
    %626 = vector.extract_strided_slice %498 {offsets = [16, 0], sizes = [8, 32], strides = [1, 1]} : vector<32x32xf32> to vector<8x32xf32>
    %cst_228 = arith.constant dense<0.000000e+00> : vector<8x32xf32>
    %627 = tpu.matmul %625, %626, %cst_228 {dimension_numbers = #tpu.dot_dimension_numbers<[1], [0], [0], [1], [0, 0, 1, 1], [], []>} : vector<8x8xf32>, vector<8x32xf32>, vector<8x32xf32> -> vector<8x32xf32>
    %628 = arith.addf %610, %627 : vector<8x32xf32>
    %629 = vector.extract_strided_slice %494 {offsets = [8, 24], sizes = [8, 8], strides = [1, 1]} : vector<16x32xf32> to vector<8x8xf32>
    %630 = vector.extract_strided_slice %495 {offsets = [8, 24], sizes = [8, 8], strides = [1, 1]} : vector<16x32xf32> to vector<8x8xf32>
    %631 = vector.extract_strided_slice %496 {offsets = [8, 24], sizes = [8, 8], strides = [1, 1]} : vector<16x32xf32> to vector<8x8xf32>
    %cst_229 = arith.constant dense<0.000000e+00> : vector<8x8xf32>
    %632 = tpu.matmul %629, %630, %cst_229 {dimension_numbers = #tpu.dot_dimension_numbers<[1], [1], [0], [0], [0, 0, 1, 0], [], []>} : vector<8x8xf32>, vector<8x8xf32>, vector<8x8xf32> -> vector<8x8xf32>
    %cst_230 = arith.constant dense<0xFF800000> : vector<8xf32>
    %633 = vector.multi_reduction <maximumf>, %632, %cst_230 [1] : vector<8x8xf32> to vector<8xf32>
    %634 = vector.shape_cast %633 : vector<8xf32> to vector<8x1xf32>
    %635 = vector.broadcast %634 : vector<8x1xf32> to vector<8x8xf32>
    %636 = arith.subf %632, %635 : vector<8x8xf32>
    %637 = math.exp %636 : vector<8x8xf32>
    %cst_231 = arith.constant dense<0.000000e+00> : vector<8xf32>
    %638 = vector.multi_reduction <add>, %637, %cst_231 [1] : vector<8x8xf32> to vector<8xf32>
    %639 = vector.shape_cast %638 : vector<8xf32> to vector<8x1xf32>
    %640 = tpu.reciprocal %639 {approx = true} : vector<8x1xf32> -> vector<8x1xf32>
    %641 = vector.broadcast %640 : vector<8x1xf32> to vector<8x8xf32>
    %642 = arith.mulf %637, %641 : vector<8x8xf32>
    %cst_232 = arith.constant dense<0.000000e+00> : vector<8x8xf32>
    %643 = tpu.matmul %642, %631, %cst_232 {dimension_numbers = #tpu.dot_dimension_numbers<[1], [0], [0], [1], [0, 0, 1, 1], [], []>} : vector<8x8xf32>, vector<8x8xf32>, vector<8x8xf32> -> vector<8x8xf32>
    %644 = vector.extract_strided_slice %498 {offsets = [24, 0], sizes = [8, 32], strides = [1, 1]} : vector<32x32xf32> to vector<8x32xf32>
    %cst_233 = arith.constant dense<0.000000e+00> : vector<8x32xf32>
    %645 = tpu.matmul %643, %644, %cst_233 {dimension_numbers = #tpu.dot_dimension_numbers<[1], [0], [0], [1], [0, 0, 1, 1], [], []>} : vector<8x8xf32>, vector<8x32xf32>, vector<8x32xf32> -> vector<8x32xf32>
    %646 = arith.addf %628, %645 : vector<8x32xf32>
    %c8_234 = arith.constant 8 : index
    %c0_235 = arith.constant 0 : index
    %647 = vector.load %arg30[%c8_234, %c0_235] : memref<16x32xf32, #tpu.memory_space<vmem>>, vector<8x32xf32>
    tpu.vector_store %arg30[%c8_234, %c0_235], %646 {strides = array<i32>} : memref<16x32xf32, #tpu.memory_space<vmem>>, vector<8x32xf32>,
    %c0_236 = arith.constant 0 : index
    %c0_237 = arith.constant 0 : index
    %648 = vector.load %arg30[%c0_236, %c0_237] : memref<16x32xf32, #tpu.memory_space<vmem>>, vector<16x32xf32>
    %649 = vector.broadcast %499 : vector<1x32xf32> to vector<16x32xf32>
    %650 = arith.addf %648, %649 : vector<16x32xf32>
    %651 = arith.addf %487, %650 : vector<16x32xf32>
    %c1_238 = arith.constant 1 : index
    %c0_239 = arith.constant 0 : index
    %652 = vector.load %arg10[%c1_238, %c0_239] : memref<2x32xf32, #tpu.memory_space<vmem>>, vector<1x32xf32>
    %c1_240 = arith.constant 1 : index
    %c0_241 = arith.constant 0 : index
    %653 = vector.load %arg11[%c1_240, %c0_241] : memref<2x32xf32, #tpu.memory_space<vmem>>, vector<1x32xf32>
    %cst_242 = arith.constant dense<0.000000e+00> : vector<16xf32>
    %654 = vector.multi_reduction <add>, %651, %cst_242 [1] : vector<16x32xf32> to vector<16xf32>
    %655 = vector.shape_cast %654 : vector<16xf32> to vector<16x1xf32>
    %cst_243 = arith.constant 3.200000e+01 : f32
    %656 = vector.broadcast %cst_243 : f32 to vector<16x1xf32>
    %657 = arith.divf %655, %656 : vector<16x1xf32>
    %658 = vector.broadcast %657 : vector<16x1xf32> to vector<16x32xf32>
    %659 = arith.subf %651, %658 : vector<16x32xf32>
    %660 = arith.mulf %659, %659 : vector<16x32xf32>
    %cst_244 = arith.constant dense<0.000000e+00> : vector<16xf32>
    %661 = vector.multi_reduction <add>, %660, %cst_244 [1] : vector<16x32xf32> to vector<16xf32>
    %662 = vector.shape_cast %661 : vector<16xf32> to vector<16x1xf32>
    %cst_245 = arith.constant 3.200000e+01 : f32
    %663 = vector.broadcast %cst_245 : f32 to vector<16x1xf32>
    %664 = arith.divf %662, %663 : vector<16x1xf32>
    %665 = vector.broadcast %657 : vector<16x1xf32> to vector<16x32xf32>
    %666 = arith.subf %651, %665 : vector<16x32xf32>
    %cst_246 = arith.constant 9.99999974E-6 : f32
    %667 = vector.broadcast %cst_246 : f32 to vector<16x1xf32>
    %668 = arith.addf %664, %667 : vector<16x1xf32>
    %669 = math.rsqrt %668 : vector<16x1xf32>
    %670 = vector.broadcast %669 : vector<16x1xf32> to vector<16x32xf32>
    %671 = arith.mulf %666, %670 : vector<16x32xf32>
    %672 = vector.broadcast %652 : vector<1x32xf32> to vector<16x32xf32>
    %673 = arith.mulf %671, %672 : vector<16x32xf32>
    %674 = vector.broadcast %653 : vector<1x32xf32> to vector<16x32xf32>
    %675 = arith.addf %673, %674 : vector<16x32xf32>
    %c1_247 = arith.constant 1 : index
    %c0_248 = arith.constant 0 : index
    %c0_249 = arith.constant 0 : index
    %676 = vector.load %arg12[%c1_247, %c0_248, %c0_249] : memref<2x32x96xf32, #tpu.memory_space<vmem>>, vector<1x32x96xf32>
    %677 = vector.shape_cast %676 : vector<1x32x96xf32> to vector<32x96xf32>
    %678 = vector.extract_strided_slice %677 {offsets = [0, 0], sizes = [32, 32], strides = [1, 1]} : vector<32x96xf32> to vector<32x32xf32>
    %cst_250 = arith.constant dense<0.000000e+00> : vector<16x32xf32>
    %679 = tpu.matmul %675, %678, %cst_250 {dimension_numbers = #tpu.dot_dimension_numbers<[1], [0], [0], [1], [0, 0, 1, 1], [], []>} : vector<16x32xf32>, vector<32x32xf32>, vector<16x32xf32> -> vector<16x32xf32>
    %c1_251 = arith.constant 1 : index
    %c0_252 = arith.constant 0 : index
    %680 = vector.load %arg13[%c1_251, %c0_252] : memref<2x96xf32, #tpu.memory_space<vmem>>, vector<1x32xf32>
    %681 = vector.broadcast %680 : vector<1x32xf32> to vector<16x32xf32>
    %682 = arith.addf %679, %681 : vector<16x32xf32>
    %c1_253 = arith.constant 1 : index
    %c0_254 = arith.constant 0 : index
    %c0_255 = arith.constant 0 : index
    %683 = vector.load %arg12[%c1_253, %c0_254, %c0_255] : memref<2x32x96xf32, #tpu.memory_space<vmem>>, vector<1x32x96xf32>
    %684 = vector.shape_cast %683 : vector<1x32x96xf32> to vector<32x96xf32>
    %685 = vector.extract_strided_slice %684 {offsets = [0, 32], sizes = [32, 64], strides = [1, 1]} : vector<32x96xf32> to vector<32x64xf32>
    %cst_256 = arith.constant dense<0.000000e+00> : vector<16x64xf32>
    %686 = tpu.matmul %25, %685, %cst_256 {dimension_numbers = #tpu.dot_dimension_numbers<[1], [0], [0], [1], [0, 0, 1, 1], [], []>} : vector<16x32xf32>, vector<32x64xf32>, vector<16x64xf32> -> vector<16x64xf32>
    %c1_257 = arith.constant 1 : index
    %c32_258 = arith.constant 32 : index
    %687 = vector.load %arg13[%c1_257, %c32_258] : memref<2x96xf32, #tpu.memory_space<vmem>>, vector<1x64xf32>
    %688 = vector.broadcast %687 : vector<1x64xf32> to vector<16x64xf32>
    %689 = arith.addf %686, %688 : vector<16x64xf32>
    %690 = vector.extract_strided_slice %689 {offsets = [0, 0], sizes = [16, 32], strides = [1, 1]} : vector<16x64xf32> to vector<16x32xf32>
    %691 = vector.extract_strided_slice %689 {offsets = [0, 32], sizes = [16, 32], strides = [1, 1]} : vector<16x64xf32> to vector<16x32xf32>
    %c1_259 = arith.constant 1 : index
    %c0_260 = arith.constant 0 : index
    %c0_261 = arith.constant 0 : index
    %692 = vector.load %arg14[%c1_259, %c0_260, %c0_261] : memref<2x32x32xf32, #tpu.memory_space<vmem>>, vector<1x32x32xf32>
    %693 = vector.shape_cast %692 : vector<1x32x32xf32> to vector<32x32xf32>
    %c1_262 = arith.constant 1 : index
    %c0_263 = arith.constant 0 : index
    %694 = vector.load %arg15[%c1_262, %c0_263] : memref<2x32xf32, #tpu.memory_space<vmem>>, vector<1x32xf32>
    %cst_264 = arith.constant 0.000000e+00 : f32
    %695 = vector.broadcast %cst_264 : f32 to vector<8x32xf32>
    %696 = vector.extract_strided_slice %682 {offsets = [0, 0], sizes = [8, 8], strides = [1, 1]} : vector<16x32xf32> to vector<8x8xf32>
    %697 = vector.extract_strided_slice %690 {offsets = [0, 0], sizes = [8, 8], strides = [1, 1]} : vector<16x32xf32> to vector<8x8xf32>
    %698 = vector.extract_strided_slice %691 {offsets = [0, 0], sizes = [8, 8], strides = [1, 1]} : vector<16x32xf32> to vector<8x8xf32>
    %cst_265 = arith.constant dense<0.000000e+00> : vector<8x8xf32>
    %699 = tpu.matmul %696, %697, %cst_265 {dimension_numbers = #tpu.dot_dimension_numbers<[1], [1], [0], [0], [0, 0, 1, 0], [], []>} : vector<8x8xf32>, vector<8x8xf32>, vector<8x8xf32> -> vector<8x8xf32>
    %700 = vector.extract_strided_slice %30 {offsets = [0, 0], sizes = [1, 8], strides = [1, 1]} : vector<2x8xf32> to vector<1x8xf32>
    %701 = vector.broadcast %700 : vector<1x8xf32> to vector<8x8xf32>
    %702 = arith.addf %699, %701 : vector<8x8xf32>
    %cst_266 = arith.constant dense<0xFF800000> : vector<8xf32>
    %703 = vector.multi_reduction <maximumf>, %702, %cst_266 [1] : vector<8x8xf32> to vector<8xf32>
    %704 = vector.shape_cast %703 : vector<8xf32> to vector<8x1xf32>
    %705 = vector.broadcast %704 : vector<8x1xf32> to vector<8x8xf32>
    %706 = arith.subf %702, %705 : vector<8x8xf32>
    %707 = math.exp %706 : vector<8x8xf32>
    %cst_267 = arith.constant dense<0.000000e+00> : vector<8xf32>
    %708 = vector.multi_reduction <add>, %707, %cst_267 [1] : vector<8x8xf32> to vector<8xf32>
    %709 = vector.shape_cast %708 : vector<8xf32> to vector<8x1xf32>
    %710 = tpu.reciprocal %709 {approx = true} : vector<8x1xf32> -> vector<8x1xf32>
    %711 = vector.broadcast %710 : vector<8x1xf32> to vector<8x8xf32>
    %712 = arith.mulf %707, %711 : vector<8x8xf32>
    %cst_268 = arith.constant dense<0.000000e+00> : vector<8x8xf32>
    %713 = tpu.matmul %712, %698, %cst_268 {dimension_numbers = #tpu.dot_dimension_numbers<[1], [0], [0], [1], [0, 0, 1, 1], [], []>} : vector<8x8xf32>, vector<8x8xf32>, vector<8x8xf32> -> vector<8x8xf32>
    %714 = vector.extract_strided_slice %693 {offsets = [0, 0], sizes = [8, 32], strides = [1, 1]} : vector<32x32xf32> to vector<8x32xf32>
    %cst_269 = arith.constant dense<0.000000e+00> : vector<8x32xf32>
    %715 = tpu.matmul %713, %714, %cst_269 {dimension_numbers = #tpu.dot_dimension_numbers<[1], [0], [0], [1], [0, 0, 1, 1], [], []>} : vector<8x8xf32>, vector<8x32xf32>, vector<8x32xf32> -> vector<8x32xf32>
    %716 = arith.addf %695, %715 : vector<8x32xf32>
    %717 = vector.extract_strided_slice %682 {offsets = [0, 8], sizes = [8, 8], strides = [1, 1]} : vector<16x32xf32> to vector<8x8xf32>
    %718 = vector.extract_strided_slice %690 {offsets = [0, 8], sizes = [8, 8], strides = [1, 1]} : vector<16x32xf32> to vector<8x8xf32>
    %719 = vector.extract_strided_slice %691 {offsets = [0, 8], sizes = [8, 8], strides = [1, 1]} : vector<16x32xf32> to vector<8x8xf32>
    %cst_270 = arith.constant dense<0.000000e+00> : vector<8x8xf32>
    %720 = tpu.matmul %717, %718, %cst_270 {dimension_numbers = #tpu.dot_dimension_numbers<[1], [1], [0], [0], [0, 0, 1, 0], [], []>} : vector<8x8xf32>, vector<8x8xf32>, vector<8x8xf32> -> vector<8x8xf32>
    %721 = vector.extract_strided_slice %30 {offsets = [0, 0], sizes = [1, 8], strides = [1, 1]} : vector<2x8xf32> to vector<1x8xf32>
    %722 = vector.broadcast %721 : vector<1x8xf32> to vector<8x8xf32>
    %723 = arith.addf %720, %722 : vector<8x8xf32>
    %cst_271 = arith.constant dense<0xFF800000> : vector<8xf32>
    %724 = vector.multi_reduction <maximumf>, %723, %cst_271 [1] : vector<8x8xf32> to vector<8xf32>
    %725 = vector.shape_cast %724 : vector<8xf32> to vector<8x1xf32>
    %726 = vector.broadcast %725 : vector<8x1xf32> to vector<8x8xf32>
    %727 = arith.subf %723, %726 : vector<8x8xf32>
    %728 = math.exp %727 : vector<8x8xf32>
    %cst_272 = arith.constant dense<0.000000e+00> : vector<8xf32>
    %729 = vector.multi_reduction <add>, %728, %cst_272 [1] : vector<8x8xf32> to vector<8xf32>
    %730 = vector.shape_cast %729 : vector<8xf32> to vector<8x1xf32>
    %731 = tpu.reciprocal %730 {approx = true} : vector<8x1xf32> -> vector<8x1xf32>
    %732 = vector.broadcast %731 : vector<8x1xf32> to vector<8x8xf32>
    %733 = arith.mulf %728, %732 : vector<8x8xf32>
    %cst_273 = arith.constant dense<0.000000e+00> : vector<8x8xf32>
    %734 = tpu.matmul %733, %719, %cst_273 {dimension_numbers = #tpu.dot_dimension_numbers<[1], [0], [0], [1], [0, 0, 1, 1], [], []>} : vector<8x8xf32>, vector<8x8xf32>, vector<8x8xf32> -> vector<8x8xf32>
    %735 = vector.extract_strided_slice %693 {offsets = [8, 0], sizes = [8, 32], strides = [1, 1]} : vector<32x32xf32> to vector<8x32xf32>
    %cst_274 = arith.constant dense<0.000000e+00> : vector<8x32xf32>
    %736 = tpu.matmul %734, %735, %cst_274 {dimension_numbers = #tpu.dot_dimension_numbers<[1], [0], [0], [1], [0, 0, 1, 1], [], []>} : vector<8x8xf32>, vector<8x32xf32>, vector<8x32xf32> -> vector<8x32xf32>
    %737 = arith.addf %716, %736 : vector<8x32xf32>
    %738 = vector.extract_strided_slice %682 {offsets = [0, 16], sizes = [8, 8], strides = [1, 1]} : vector<16x32xf32> to vector<8x8xf32>
    %739 = vector.extract_strided_slice %690 {offsets = [0, 16], sizes = [8, 8], strides = [1, 1]} : vector<16x32xf32> to vector<8x8xf32>
    %740 = vector.extract_strided_slice %691 {offsets = [0, 16], sizes = [8, 8], strides = [1, 1]} : vector<16x32xf32> to vector<8x8xf32>
    %cst_275 = arith.constant dense<0.000000e+00> : vector<8x8xf32>
    %741 = tpu.matmul %738, %739, %cst_275 {dimension_numbers = #tpu.dot_dimension_numbers<[1], [1], [0], [0], [0, 0, 1, 0], [], []>} : vector<8x8xf32>, vector<8x8xf32>, vector<8x8xf32> -> vector<8x8xf32>
    %742 = vector.extract_strided_slice %30 {offsets = [0, 0], sizes = [1, 8], strides = [1, 1]} : vector<2x8xf32> to vector<1x8xf32>
    %743 = vector.broadcast %742 : vector<1x8xf32> to vector<8x8xf32>
    %744 = arith.addf %741, %743 : vector<8x8xf32>
    %cst_276 = arith.constant dense<0xFF800000> : vector<8xf32>
    %745 = vector.multi_reduction <maximumf>, %744, %cst_276 [1] : vector<8x8xf32> to vector<8xf32>
    %746 = vector.shape_cast %745 : vector<8xf32> to vector<8x1xf32>
    %747 = vector.broadcast %746 : vector<8x1xf32> to vector<8x8xf32>
    %748 = arith.subf %744, %747 : vector<8x8xf32>
    %749 = math.exp %748 : vector<8x8xf32>
    %cst_277 = arith.constant dense<0.000000e+00> : vector<8xf32>
    %750 = vector.multi_reduction <add>, %749, %cst_277 [1] : vector<8x8xf32> to vector<8xf32>
    %751 = vector.shape_cast %750 : vector<8xf32> to vector<8x1xf32>
    %752 = tpu.reciprocal %751 {approx = true} : vector<8x1xf32> -> vector<8x1xf32>
    %753 = vector.broadcast %752 : vector<8x1xf32> to vector<8x8xf32>
    %754 = arith.mulf %749, %753 : vector<8x8xf32>
    %cst_278 = arith.constant dense<0.000000e+00> : vector<8x8xf32>
    %755 = tpu.matmul %754, %740, %cst_278 {dimension_numbers = #tpu.dot_dimension_numbers<[1], [0], [0], [1], [0, 0, 1, 1], [], []>} : vector<8x8xf32>, vector<8x8xf32>, vector<8x8xf32> -> vector<8x8xf32>
    %756 = vector.extract_strided_slice %693 {offsets = [16, 0], sizes = [8, 32], strides = [1, 1]} : vector<32x32xf32> to vector<8x32xf32>
    %cst_279 = arith.constant dense<0.000000e+00> : vector<8x32xf32>
    %757 = tpu.matmul %755, %756, %cst_279 {dimension_numbers = #tpu.dot_dimension_numbers<[1], [0], [0], [1], [0, 0, 1, 1], [], []>} : vector<8x8xf32>, vector<8x32xf32>, vector<8x32xf32> -> vector<8x32xf32>
    %758 = arith.addf %737, %757 : vector<8x32xf32>
    %759 = vector.extract_strided_slice %682 {offsets = [0, 24], sizes = [8, 8], strides = [1, 1]} : vector<16x32xf32> to vector<8x8xf32>
    %760 = vector.extract_strided_slice %690 {offsets = [0, 24], sizes = [8, 8], strides = [1, 1]} : vector<16x32xf32> to vector<8x8xf32>
    %761 = vector.extract_strided_slice %691 {offsets = [0, 24], sizes = [8, 8], strides = [1, 1]} : vector<16x32xf32> to vector<8x8xf32>
    %cst_280 = arith.constant dense<0.000000e+00> : vector<8x8xf32>
    %762 = tpu.matmul %759, %760, %cst_280 {dimension_numbers = #tpu.dot_dimension_numbers<[1], [1], [0], [0], [0, 0, 1, 0], [], []>} : vector<8x8xf32>, vector<8x8xf32>, vector<8x8xf32> -> vector<8x8xf32>
    %763 = vector.extract_strided_slice %30 {offsets = [0, 0], sizes = [1, 8], strides = [1, 1]} : vector<2x8xf32> to vector<1x8xf32>
    %764 = vector.broadcast %763 : vector<1x8xf32> to vector<8x8xf32>
    %765 = arith.addf %762, %764 : vector<8x8xf32>
    %cst_281 = arith.constant dense<0xFF800000> : vector<8xf32>
    %766 = vector.multi_reduction <maximumf>, %765, %cst_281 [1] : vector<8x8xf32> to vector<8xf32>
    %767 = vector.shape_cast %766 : vector<8xf32> to vector<8x1xf32>
    %768 = vector.broadcast %767 : vector<8x1xf32> to vector<8x8xf32>
    %769 = arith.subf %765, %768 : vector<8x8xf32>
    %770 = math.exp %769 : vector<8x8xf32>
    %cst_282 = arith.constant dense<0.000000e+00> : vector<8xf32>
    %771 = vector.multi_reduction <add>, %770, %cst_282 [1] : vector<8x8xf32> to vector<8xf32>
    %772 = vector.shape_cast %771 : vector<8xf32> to vector<8x1xf32>
    %773 = tpu.reciprocal %772 {approx = true} : vector<8x1xf32> -> vector<8x1xf32>
    %774 = vector.broadcast %773 : vector<8x1xf32> to vector<8x8xf32>
    %775 = arith.mulf %770, %774 : vector<8x8xf32>
    %cst_283 = arith.constant dense<0.000000e+00> : vector<8x8xf32>
    %776 = tpu.matmul %775, %761, %cst_283 {dimension_numbers = #tpu.dot_dimension_numbers<[1], [0], [0], [1], [0, 0, 1, 1], [], []>} : vector<8x8xf32>, vector<8x8xf32>, vector<8x8xf32> -> vector<8x8xf32>
    %777 = vector.extract_strided_slice %693 {offsets = [24, 0], sizes = [8, 32], strides = [1, 1]} : vector<32x32xf32> to vector<8x32xf32>
    %cst_284 = arith.constant dense<0.000000e+00> : vector<8x32xf32>
    %778 = tpu.matmul %776, %777, %cst_284 {dimension_numbers = #tpu.dot_dimension_numbers<[1], [0], [0], [1], [0, 0, 1, 1], [], []>} : vector<8x8xf32>, vector<8x32xf32>, vector<8x32xf32> -> vector<8x32xf32>
    %779 = arith.addf %758, %778 : vector<8x32xf32>
    %c0_285 = arith.constant 0 : index
    %c0_286 = arith.constant 0 : index
    %780 = vector.load %arg30[%c0_285, %c0_286] : memref<16x32xf32, #tpu.memory_space<vmem>>, vector<8x32xf32>
    tpu.vector_store %arg30[%c0_285, %c0_286], %779 {strides = array<i32>} : memref<16x32xf32, #tpu.memory_space<vmem>>, vector<8x32xf32>,
    %cst_287 = arith.constant 0.000000e+00 : f32
    %781 = vector.broadcast %cst_287 : f32 to vector<8x32xf32>
    %782 = vector.extract_strided_slice %682 {offsets = [8, 0], sizes = [8, 8], strides = [1, 1]} : vector<16x32xf32> to vector<8x8xf32>
    %783 = vector.extract_strided_slice %690 {offsets = [8, 0], sizes = [8, 8], strides = [1, 1]} : vector<16x32xf32> to vector<8x8xf32>
    %784 = vector.extract_strided_slice %691 {offsets = [8, 0], sizes = [8, 8], strides = [1, 1]} : vector<16x32xf32> to vector<8x8xf32>
    %cst_288 = arith.constant dense<0.000000e+00> : vector<8x8xf32>
    %785 = tpu.matmul %782, %783, %cst_288 {dimension_numbers = #tpu.dot_dimension_numbers<[1], [1], [0], [0], [0, 0, 1, 0], [], []>} : vector<8x8xf32>, vector<8x8xf32>, vector<8x8xf32> -> vector<8x8xf32>
    %786 = vector.extract_strided_slice %30 {offsets = [1, 0], sizes = [1, 8], strides = [1, 1]} : vector<2x8xf32> to vector<1x8xf32>
    %787 = vector.broadcast %786 : vector<1x8xf32> to vector<8x8xf32>
    %788 = arith.addf %785, %787 : vector<8x8xf32>
    %cst_289 = arith.constant dense<0xFF800000> : vector<8xf32>
    %789 = vector.multi_reduction <maximumf>, %788, %cst_289 [1] : vector<8x8xf32> to vector<8xf32>
    %790 = vector.shape_cast %789 : vector<8xf32> to vector<8x1xf32>
    %791 = vector.broadcast %790 : vector<8x1xf32> to vector<8x8xf32>
    %792 = arith.subf %788, %791 : vector<8x8xf32>
    %793 = math.exp %792 : vector<8x8xf32>
    %cst_290 = arith.constant dense<0.000000e+00> : vector<8xf32>
    %794 = vector.multi_reduction <add>, %793, %cst_290 [1] : vector<8x8xf32> to vector<8xf32>
    %795 = vector.shape_cast %794 : vector<8xf32> to vector<8x1xf32>
    %796 = tpu.reciprocal %795 {approx = true} : vector<8x1xf32> -> vector<8x1xf32>
    %797 = vector.broadcast %796 : vector<8x1xf32> to vector<8x8xf32>
    %798 = arith.mulf %793, %797 : vector<8x8xf32>
    %cst_291 = arith.constant dense<0.000000e+00> : vector<8x8xf32>
    %799 = tpu.matmul %798, %784, %cst_291 {dimension_numbers = #tpu.dot_dimension_numbers<[1], [0], [0], [1], [0, 0, 1, 1], [], []>} : vector<8x8xf32>, vector<8x8xf32>, vector<8x8xf32> -> vector<8x8xf32>
    %800 = vector.extract_strided_slice %693 {offsets = [0, 0], sizes = [8, 32], strides = [1, 1]} : vector<32x32xf32> to vector<8x32xf32>
    %cst_292 = arith.constant dense<0.000000e+00> : vector<8x32xf32>
    %801 = tpu.matmul %799, %800, %cst_292 {dimension_numbers = #tpu.dot_dimension_numbers<[1], [0], [0], [1], [0, 0, 1, 1], [], []>} : vector<8x8xf32>, vector<8x32xf32>, vector<8x32xf32> -> vector<8x32xf32>
    %802 = arith.addf %781, %801 : vector<8x32xf32>
    %803 = vector.extract_strided_slice %682 {offsets = [8, 8], sizes = [8, 8], strides = [1, 1]} : vector<16x32xf32> to vector<8x8xf32>
    %804 = vector.extract_strided_slice %690 {offsets = [8, 8], sizes = [8, 8], strides = [1, 1]} : vector<16x32xf32> to vector<8x8xf32>
    %805 = vector.extract_strided_slice %691 {offsets = [8, 8], sizes = [8, 8], strides = [1, 1]} : vector<16x32xf32> to vector<8x8xf32>
    %cst_293 = arith.constant dense<0.000000e+00> : vector<8x8xf32>
    %806 = tpu.matmul %803, %804, %cst_293 {dimension_numbers = #tpu.dot_dimension_numbers<[1], [1], [0], [0], [0, 0, 1, 0], [], []>} : vector<8x8xf32>, vector<8x8xf32>, vector<8x8xf32> -> vector<8x8xf32>
    %807 = vector.extract_strided_slice %30 {offsets = [1, 0], sizes = [1, 8], strides = [1, 1]} : vector<2x8xf32> to vector<1x8xf32>
    %808 = vector.broadcast %807 : vector<1x8xf32> to vector<8x8xf32>
    %809 = arith.addf %806, %808 : vector<8x8xf32>
    %cst_294 = arith.constant dense<0xFF800000> : vector<8xf32>
    %810 = vector.multi_reduction <maximumf>, %809, %cst_294 [1] : vector<8x8xf32> to vector<8xf32>
    %811 = vector.shape_cast %810 : vector<8xf32> to vector<8x1xf32>
    %812 = vector.broadcast %811 : vector<8x1xf32> to vector<8x8xf32>
    %813 = arith.subf %809, %812 : vector<8x8xf32>
    %814 = math.exp %813 : vector<8x8xf32>
    %cst_295 = arith.constant dense<0.000000e+00> : vector<8xf32>
    %815 = vector.multi_reduction <add>, %814, %cst_295 [1] : vector<8x8xf32> to vector<8xf32>
    %816 = vector.shape_cast %815 : vector<8xf32> to vector<8x1xf32>
    %817 = tpu.reciprocal %816 {approx = true} : vector<8x1xf32> -> vector<8x1xf32>
    %818 = vector.broadcast %817 : vector<8x1xf32> to vector<8x8xf32>
    %819 = arith.mulf %814, %818 : vector<8x8xf32>
    %cst_296 = arith.constant dense<0.000000e+00> : vector<8x8xf32>
    %820 = tpu.matmul %819, %805, %cst_296 {dimension_numbers = #tpu.dot_dimension_numbers<[1], [0], [0], [1], [0, 0, 1, 1], [], []>} : vector<8x8xf32>, vector<8x8xf32>, vector<8x8xf32> -> vector<8x8xf32>
    %821 = vector.extract_strided_slice %693 {offsets = [8, 0], sizes = [8, 32], strides = [1, 1]} : vector<32x32xf32> to vector<8x32xf32>
    %cst_297 = arith.constant dense<0.000000e+00> : vector<8x32xf32>
    %822 = tpu.matmul %820, %821, %cst_297 {dimension_numbers = #tpu.dot_dimension_numbers<[1], [0], [0], [1], [0, 0, 1, 1], [], []>} : vector<8x8xf32>, vector<8x32xf32>, vector<8x32xf32> -> vector<8x32xf32>
    %823 = arith.addf %802, %822 : vector<8x32xf32>
    %824 = vector.extract_strided_slice %682 {offsets = [8, 16], sizes = [8, 8], strides = [1, 1]} : vector<16x32xf32> to vector<8x8xf32>
    %825 = vector.extract_strided_slice %690 {offsets = [8, 16], sizes = [8, 8], strides = [1, 1]} : vector<16x32xf32> to vector<8x8xf32>
    %826 = vector.extract_strided_slice %691 {offsets = [8, 16], sizes = [8, 8], strides = [1, 1]} : vector<16x32xf32> to vector<8x8xf32>
    %cst_298 = arith.constant dense<0.000000e+00> : vector<8x8xf32>
    %827 = tpu.matmul %824, %825, %cst_298 {dimension_numbers = #tpu.dot_dimension_numbers<[1], [1], [0], [0], [0, 0, 1, 0], [], []>} : vector<8x8xf32>, vector<8x8xf32>, vector<8x8xf32> -> vector<8x8xf32>
    %828 = vector.extract_strided_slice %30 {offsets = [1, 0], sizes = [1, 8], strides = [1, 1]} : vector<2x8xf32> to vector<1x8xf32>
    %829 = vector.broadcast %828 : vector<1x8xf32> to vector<8x8xf32>
    %830 = arith.addf %827, %829 : vector<8x8xf32>
    %cst_299 = arith.constant dense<0xFF800000> : vector<8xf32>
    %831 = vector.multi_reduction <maximumf>, %830, %cst_299 [1] : vector<8x8xf32> to vector<8xf32>
    %832 = vector.shape_cast %831 : vector<8xf32> to vector<8x1xf32>
    %833 = vector.broadcast %832 : vector<8x1xf32> to vector<8x8xf32>
    %834 = arith.subf %830, %833 : vector<8x8xf32>
    %835 = math.exp %834 : vector<8x8xf32>
    %cst_300 = arith.constant dense<0.000000e+00> : vector<8xf32>
    %836 = vector.multi_reduction <add>, %835, %cst_300 [1] : vector<8x8xf32> to vector<8xf32>
    %837 = vector.shape_cast %836 : vector<8xf32> to vector<8x1xf32>
    %838 = tpu.reciprocal %837 {approx = true} : vector<8x1xf32> -> vector<8x1xf32>
    %839 = vector.broadcast %838 : vector<8x1xf32> to vector<8x8xf32>
    %840 = arith.mulf %835, %839 : vector<8x8xf32>
    %cst_301 = arith.constant dense<0.000000e+00> : vector<8x8xf32>
    %841 = tpu.matmul %840, %826, %cst_301 {dimension_numbers = #tpu.dot_dimension_numbers<[1], [0], [0], [1], [0, 0, 1, 1], [], []>} : vector<8x8xf32>, vector<8x8xf32>, vector<8x8xf32> -> vector<8x8xf32>
    %842 = vector.extract_strided_slice %693 {offsets = [16, 0], sizes = [8, 32], strides = [1, 1]} : vector<32x32xf32> to vector<8x32xf32>
    %cst_302 = arith.constant dense<0.000000e+00> : vector<8x32xf32>
    %843 = tpu.matmul %841, %842, %cst_302 {dimension_numbers = #tpu.dot_dimension_numbers<[1], [0], [0], [1], [0, 0, 1, 1], [], []>} : vector<8x8xf32>, vector<8x32xf32>, vector<8x32xf32> -> vector<8x32xf32>
    %844 = arith.addf %823, %843 : vector<8x32xf32>
    %845 = vector.extract_strided_slice %682 {offsets = [8, 24], sizes = [8, 8], strides = [1, 1]} : vector<16x32xf32> to vector<8x8xf32>
    %846 = vector.extract_strided_slice %690 {offsets = [8, 24], sizes = [8, 8], strides = [1, 1]} : vector<16x32xf32> to vector<8x8xf32>
    %847 = vector.extract_strided_slice %691 {offsets = [8, 24], sizes = [8, 8], strides = [1, 1]} : vector<16x32xf32> to vector<8x8xf32>
    %cst_303 = arith.constant dense<0.000000e+00> : vector<8x8xf32>
    %848 = tpu.matmul %845, %846, %cst_303 {dimension_numbers = #tpu.dot_dimension_numbers<[1], [1], [0], [0], [0, 0, 1, 0], [], []>} : vector<8x8xf32>, vector<8x8xf32>, vector<8x8xf32> -> vector<8x8xf32>
    %849 = vector.extract_strided_slice %30 {offsets = [1, 0], sizes = [1, 8], strides = [1, 1]} : vector<2x8xf32> to vector<1x8xf32>
    %850 = vector.broadcast %849 : vector<1x8xf32> to vector<8x8xf32>
    %851 = arith.addf %848, %850 : vector<8x8xf32>
    %cst_304 = arith.constant dense<0xFF800000> : vector<8xf32>
    %852 = vector.multi_reduction <maximumf>, %851, %cst_304 [1] : vector<8x8xf32> to vector<8xf32>
    %853 = vector.shape_cast %852 : vector<8xf32> to vector<8x1xf32>
    %854 = vector.broadcast %853 : vector<8x1xf32> to vector<8x8xf32>
    %855 = arith.subf %851, %854 : vector<8x8xf32>
    %856 = math.exp %855 : vector<8x8xf32>
    %cst_305 = arith.constant dense<0.000000e+00> : vector<8xf32>
    %857 = vector.multi_reduction <add>, %856, %cst_305 [1] : vector<8x8xf32> to vector<8xf32>
    %858 = vector.shape_cast %857 : vector<8xf32> to vector<8x1xf32>
    %859 = tpu.reciprocal %858 {approx = true} : vector<8x1xf32> -> vector<8x1xf32>
    %860 = vector.broadcast %859 : vector<8x1xf32> to vector<8x8xf32>
    %861 = arith.mulf %856, %860 : vector<8x8xf32>
    %cst_306 = arith.constant dense<0.000000e+00> : vector<8x8xf32>
    %862 = tpu.matmul %861, %847, %cst_306 {dimension_numbers = #tpu.dot_dimension_numbers<[1], [0], [0], [1], [0, 0, 1, 1], [], []>} : vector<8x8xf32>, vector<8x8xf32>, vector<8x8xf32> -> vector<8x8xf32>
    %863 = vector.extract_strided_slice %693 {offsets = [24, 0], sizes = [8, 32], strides = [1, 1]} : vector<32x32xf32> to vector<8x32xf32>
    %cst_307 = arith.constant dense<0.000000e+00> : vector<8x32xf32>
    %864 = tpu.matmul %862, %863, %cst_307 {dimension_numbers = #tpu.dot_dimension_numbers<[1], [0], [0], [1], [0, 0, 1, 1], [], []>} : vector<8x8xf32>, vector<8x32xf32>, vector<8x32xf32> -> vector<8x32xf32>
    %865 = arith.addf %844, %864 : vector<8x32xf32>
    %c8_308 = arith.constant 8 : index
    %c0_309 = arith.constant 0 : index
    %866 = vector.load %arg30[%c8_308, %c0_309] : memref<16x32xf32, #tpu.memory_space<vmem>>, vector<8x32xf32>
    tpu.vector_store %arg30[%c8_308, %c0_309], %865 {strides = array<i32>} : memref<16x32xf32, #tpu.memory_space<vmem>>, vector<8x32xf32>,
    %c0_310 = arith.constant 0 : index
    %c0_311 = arith.constant 0 : index
    %867 = vector.load %arg30[%c0_310, %c0_311] : memref<16x32xf32, #tpu.memory_space<vmem>>, vector<16x32xf32>
    %868 = vector.broadcast %694 : vector<1x32xf32> to vector<16x32xf32>
    %869 = arith.addf %867, %868 : vector<16x32xf32>
    %870 = arith.addf %675, %869 : vector<16x32xf32>
    %c1_312 = arith.constant 1 : index
    %c0_313 = arith.constant 0 : index
    %871 = vector.load %arg16[%c1_312, %c0_313] : memref<2x32xf32, #tpu.memory_space<vmem>>, vector<1x32xf32>
    %c1_314 = arith.constant 1 : index
    %c0_315 = arith.constant 0 : index
    %872 = vector.load %arg17[%c1_314, %c0_315] : memref<2x32xf32, #tpu.memory_space<vmem>>, vector<1x32xf32>
    %cst_316 = arith.constant dense<0.000000e+00> : vector<16xf32>
    %873 = vector.multi_reduction <add>, %870, %cst_316 [1] : vector<16x32xf32> to vector<16xf32>
    %874 = vector.shape_cast %873 : vector<16xf32> to vector<16x1xf32>
    %cst_317 = arith.constant 3.200000e+01 : f32
    %875 = vector.broadcast %cst_317 : f32 to vector<16x1xf32>
    %876 = arith.divf %874, %875 : vector<16x1xf32>
    %877 = vector.broadcast %876 : vector<16x1xf32> to vector<16x32xf32>
    %878 = arith.subf %870, %877 : vector<16x32xf32>
    %879 = arith.mulf %878, %878 : vector<16x32xf32>
    %cst_318 = arith.constant dense<0.000000e+00> : vector<16xf32>
    %880 = vector.multi_reduction <add>, %879, %cst_318 [1] : vector<16x32xf32> to vector<16xf32>
    %881 = vector.shape_cast %880 : vector<16xf32> to vector<16x1xf32>
    %cst_319 = arith.constant 3.200000e+01 : f32
    %882 = vector.broadcast %cst_319 : f32 to vector<16x1xf32>
    %883 = arith.divf %881, %882 : vector<16x1xf32>
    %884 = vector.broadcast %876 : vector<16x1xf32> to vector<16x32xf32>
    %885 = arith.subf %870, %884 : vector<16x32xf32>
    %cst_320 = arith.constant 9.99999974E-6 : f32
    %886 = vector.broadcast %cst_320 : f32 to vector<16x1xf32>
    %887 = arith.addf %883, %886 : vector<16x1xf32>
    %888 = math.rsqrt %887 : vector<16x1xf32>
    %889 = vector.broadcast %888 : vector<16x1xf32> to vector<16x32xf32>
    %890 = arith.mulf %885, %889 : vector<16x32xf32>
    %891 = vector.broadcast %871 : vector<1x32xf32> to vector<16x32xf32>
    %892 = arith.mulf %890, %891 : vector<16x32xf32>
    %893 = vector.broadcast %872 : vector<1x32xf32> to vector<16x32xf32>
    %894 = arith.addf %892, %893 : vector<16x32xf32>
    %c1_321 = arith.constant 1 : index
    %c0_322 = arith.constant 0 : index
    %c0_323 = arith.constant 0 : index
    %895 = vector.load %arg18[%c1_321, %c0_322, %c0_323] : memref<2x32x64xf32, #tpu.memory_space<vmem>>, vector<1x32x64xf32>
    %896 = vector.shape_cast %895 : vector<1x32x64xf32> to vector<32x64xf32>
    %cst_324 = arith.constant dense<0.000000e+00> : vector<16x64xf32>
    %897 = tpu.matmul %894, %896, %cst_324 {dimension_numbers = #tpu.dot_dimension_numbers<[1], [0], [0], [1], [0, 0, 1, 1], [], []>} : vector<16x32xf32>, vector<32x64xf32>, vector<16x64xf32> -> vector<16x64xf32>
    %c1_325 = arith.constant 1 : index
    %c0_326 = arith.constant 0 : index
    %898 = vector.load %arg19[%c1_325, %c0_326] : memref<2x64xf32, #tpu.memory_space<vmem>>, vector<1x64xf32>
    %899 = vector.broadcast %898 : vector<1x64xf32> to vector<16x64xf32>
    %900 = arith.addf %897, %899 : vector<16x64xf32>
    %901 = arith.mulf %900, %900 : vector<16x64xf32>
    %902 = arith.mulf %900, %901 : vector<16x64xf32>
    %cst_327 = arith.constant 4.471500e-02 : f32
    %903 = vector.broadcast %cst_327 : f32 to vector<16x64xf32>
    %904 = arith.mulf %903, %902 : vector<16x64xf32>
    %905 = arith.addf %900, %904 : vector<16x64xf32>
    %cst_328 = arith.constant 0.797884583 : f32
    %906 = vector.broadcast %cst_328 : f32 to vector<16x64xf32>
    %907 = arith.mulf %906, %905 : vector<16x64xf32>
    %908 = math.tanh %907 : vector<16x64xf32>
    %cst_329 = arith.constant 1.000000e+00 : f32
    %909 = vector.broadcast %cst_329 : f32 to vector<16x64xf32>
    %910 = arith.addf %909, %908 : vector<16x64xf32>
    %cst_330 = arith.constant 5.000000e-01 : f32
    %911 = vector.broadcast %cst_330 : f32 to vector<16x64xf32>
    %912 = arith.mulf %911, %910 : vector<16x64xf32>
    %913 = arith.mulf %900, %912 : vector<16x64xf32>
    %c1_331 = arith.constant 1 : index
    %c0_332 = arith.constant 0 : index
    %c0_333 = arith.constant 0 : index
    %914 = vector.load %arg20[%c1_331, %c0_332, %c0_333] : memref<2x64x32xf32, #tpu.memory_space<vmem>>, vector<1x64x32xf32>
    %915 = vector.shape_cast %914 : vector<1x64x32xf32> to vector<64x32xf32>
    %cst_334 = arith.constant dense<0.000000e+00> : vector<16x32xf32>
    %916 = tpu.matmul %913, %915, %cst_334 {dimension_numbers = #tpu.dot_dimension_numbers<[1], [0], [0], [1], [0, 0, 1, 1], [], []>} : vector<16x64xf32>, vector<64x32xf32>, vector<16x32xf32> -> vector<16x32xf32>
    %c1_335 = arith.constant 1 : index
    %c0_336 = arith.constant 0 : index
    %917 = vector.load %arg21[%c1_335, %c0_336] : memref<2x32xf32, #tpu.memory_space<vmem>>, vector<1x32xf32>
    %918 = vector.broadcast %917 : vector<1x32xf32> to vector<16x32xf32>
    %919 = arith.addf %916, %918 : vector<16x32xf32>
    %920 = arith.addf %894, %919 : vector<16x32xf32>
    %c1_337 = arith.constant 1 : index
    %c0_338 = arith.constant 0 : index
    %921 = vector.load %arg22[%c1_337, %c0_338] : memref<2x32xf32, #tpu.memory_space<vmem>>, vector<1x32xf32>
    %c1_339 = arith.constant 1 : index
    %c0_340 = arith.constant 0 : index
    %922 = vector.load %arg23[%c1_339, %c0_340] : memref<2x32xf32, #tpu.memory_space<vmem>>, vector<1x32xf32>
    %cst_341 = arith.constant dense<0.000000e+00> : vector<16xf32>
    %923 = vector.multi_reduction <add>, %920, %cst_341 [1] : vector<16x32xf32> to vector<16xf32>
    %924 = vector.shape_cast %923 : vector<16xf32> to vector<16x1xf32>
    %cst_342 = arith.constant 3.200000e+01 : f32
    %925 = vector.broadcast %cst_342 : f32 to vector<16x1xf32>
    %926 = arith.divf %924, %925 : vector<16x1xf32>
    %927 = vector.broadcast %926 : vector<16x1xf32> to vector<16x32xf32>
    %928 = arith.subf %920, %927 : vector<16x32xf32>
    %929 = arith.mulf %928, %928 : vector<16x32xf32>
    %cst_343 = arith.constant dense<0.000000e+00> : vector<16xf32>
    %930 = vector.multi_reduction <add>, %929, %cst_343 [1] : vector<16x32xf32> to vector<16xf32>
    %931 = vector.shape_cast %930 : vector<16xf32> to vector<16x1xf32>
    %cst_344 = arith.constant 3.200000e+01 : f32
    %932 = vector.broadcast %cst_344 : f32 to vector<16x1xf32>
    %933 = arith.divf %931, %932 : vector<16x1xf32>
    %934 = vector.broadcast %926 : vector<16x1xf32> to vector<16x32xf32>
    %935 = arith.subf %920, %934 : vector<16x32xf32>
    %cst_345 = arith.constant 9.99999974E-6 : f32
    %936 = vector.broadcast %cst_345 : f32 to vector<16x1xf32>
    %937 = arith.addf %933, %936 : vector<16x1xf32>
    %938 = math.rsqrt %937 : vector<16x1xf32>
    %939 = vector.broadcast %938 : vector<16x1xf32> to vector<16x32xf32>
    %940 = arith.mulf %935, %939 : vector<16x32xf32>
    %941 = vector.broadcast %921 : vector<1x32xf32> to vector<16x32xf32>
    %942 = arith.mulf %940, %941 : vector<16x32xf32>
    %943 = vector.broadcast %922 : vector<1x32xf32> to vector<16x32xf32>
    %944 = arith.addf %942, %943 : vector<16x32xf32>
    %cst_346 = arith.constant 0.000000e+00 : f32
    %945 = vector.broadcast %cst_346 : f32 to vector<1x1xf32>
    %946 = vector.extract_strided_slice %944 {offsets = [1, 0], sizes = [1, 32], strides = [1, 1]} : vector<16x32xf32> to vector<1x32xf32>
    %c0_347 = arith.constant 0 : index
    %c0_348 = arith.constant 0 : index
    %947 = vector.load %arg24[%c0_347, %c0_348] : memref<32x32xf32, #tpu.memory_space<vmem>>, vector<32x32xf32>
    %cst_349 = arith.constant dense<0.000000e+00> : vector<1x32xf32>
    %948 = tpu.matmul %946, %947, %cst_349 {dimension_numbers = #tpu.dot_dimension_numbers<[1], [0], [0], [1], [0, 0, 1, 1], [], []>} : vector<1x32xf32>, vector<32x32xf32>, vector<1x32xf32> -> vector<1x32xf32>
    %c0_350 = arith.constant 0 : index
    %c0_351 = arith.constant 0 : index
    %949 = vector.load %arg25[%c0_350, %c0_351] : memref<1x32xf32, #tpu.memory_space<vmem>>, vector<1x32xf32>
    %950 = arith.addf %948, %949 : vector<1x32xf32>
    %951 = math.tanh %950 : vector<1x32xf32>
    %c0_352 = arith.constant 0 : index
    %c0_353 = arith.constant 0 : index
    %952 = vector.load %arg26[%c0_352, %c0_353] : memref<32x3xf32, #tpu.memory_space<vmem>>, vector<32x3xf32>
    %cst_354 = arith.constant dense<0.000000e+00> : vector<1x3xf32>
    %953 = tpu.matmul %951, %952, %cst_354 {dimension_numbers = #tpu.dot_dimension_numbers<[1], [0], [0], [1], [0, 0, 1, 1], [], []>} : vector<1x32xf32>, vector<32x3xf32>, vector<1x3xf32> -> vector<1x3xf32>
    %c0_355 = arith.constant 0 : index
    %c0_356 = arith.constant 0 : index
    %954 = vector.load %arg27[%c0_355, %c0_356] : memref<1x3xf32, #tpu.memory_space<vmem>>, vector<1x3xf32>
    %955 = arith.addf %953, %954 : vector<1x3xf32>
    %c0_357 = arith.constant 0 : index
    %c0_358 = arith.constant 0 : index
    %956 = vector.load %arg29[%c0_357, %c0_358] : memref<2x3xf32, #tpu.memory_space<vmem>>, vector<1x3xf32>
    tpu.vector_store %arg29[%c0_357, %c0_358], %955 {strides = array<i32>} : memref<2x3xf32, #tpu.memory_space<vmem>>, vector<1x3xf32>,
    %cst_359 = arith.constant dense<0xFF800000> : vector<1xf32>
    %957 = vector.multi_reduction <maximumf>, %955, %cst_359 [1] : vector<1x3xf32> to vector<1xf32>
    %958 = vector.shape_cast %957 : vector<1xf32> to vector<1x1xf32>
    %959 = vector.broadcast %958 : vector<1x1xf32> to vector<1x3xf32>
    %960 = arith.subf %955, %959 : vector<1x3xf32>
    %961 = math.exp %960 : vector<1x3xf32>
    %cst_360 = arith.constant dense<0.000000e+00> : vector<1xf32>
    %962 = vector.multi_reduction <add>, %961, %cst_360 [1] : vector<1x3xf32> to vector<1xf32>
    %963 = vector.shape_cast %962 : vector<1xf32> to vector<1x1xf32>
    %964 = math.log %963 : vector<1x1xf32>
    %965 = tpu.iota {dimensions = array<i32: 1>} : vector<1x3xi32>
    %c0_361 = arith.constant 0 : index
    %966 = memref.load %arg0[%c0_361] : memref<2xi32, #tpu.memory_space<smem>>
    %967 = vector.broadcast %966 : i32 to vector<1x3xi32>
    %968 = arith.cmpi eq, %965, %967 : vector<1x3xi32>
    %969 = arith.extui %968 : vector<1x3xi1> to vector<1x3xi32>
    %970 = arith.sitofp %969 : vector<1x3xi32> to vector<1x3xf32>
    %971 = vector.broadcast %964 : vector<1x1xf32> to vector<1x3xf32>
    %972 = arith.subf %960, %971 : vector<1x3xf32>
    %973 = arith.mulf %970, %972 : vector<1x3xf32>
    %cst_362 = arith.constant dense<0.000000e+00> : vector<1xf32>
    %974 = vector.multi_reduction <add>, %973, %cst_362 [1] : vector<1x3xf32> to vector<1xf32>
    %975 = vector.shape_cast %974 : vector<1xf32> to vector<1x1xf32>
    %976 = arith.subf %945, %975 : vector<1x1xf32>
    %977 = vector.extract_strided_slice %944 {offsets = [9, 0], sizes = [1, 32], strides = [1, 1]} : vector<16x32xf32> to vector<1x32xf32>
    %c0_363 = arith.constant 0 : index
    %c0_364 = arith.constant 0 : index
    %978 = vector.load %arg24[%c0_363, %c0_364] : memref<32x32xf32, #tpu.memory_space<vmem>>, vector<32x32xf32>
    %cst_365 = arith.constant dense<0.000000e+00> : vector<1x32xf32>
    %979 = tpu.matmul %977, %978, %cst_365 {dimension_numbers = #tpu.dot_dimension_numbers<[1], [0], [0], [1], [0, 0, 1, 1], [], []>} : vector<1x32xf32>, vector<32x32xf32>, vector<1x32xf32> -> vector<1x32xf32>
    %c0_366 = arith.constant 0 : index
    %c0_367 = arith.constant 0 : index
    %980 = vector.load %arg25[%c0_366, %c0_367] : memref<1x32xf32, #tpu.memory_space<vmem>>, vector<1x32xf32>
    %981 = arith.addf %979, %980 : vector<1x32xf32>
    %982 = math.tanh %981 : vector<1x32xf32>
    %c0_368 = arith.constant 0 : index
    %c0_369 = arith.constant 0 : index
    %983 = vector.load %arg26[%c0_368, %c0_369] : memref<32x3xf32, #tpu.memory_space<vmem>>, vector<32x3xf32>
    %cst_370 = arith.constant dense<0.000000e+00> : vector<1x3xf32>
    %984 = tpu.matmul %982, %983, %cst_370 {dimension_numbers = #tpu.dot_dimension_numbers<[1], [0], [0], [1], [0, 0, 1, 1], [], []>} : vector<1x32xf32>, vector<32x3xf32>, vector<1x3xf32> -> vector<1x3xf32>
    %c0_371 = arith.constant 0 : index
    %c0_372 = arith.constant 0 : index
    %985 = vector.load %arg27[%c0_371, %c0_372] : memref<1x3xf32, #tpu.memory_space<vmem>>, vector<1x3xf32>
    %986 = arith.addf %984, %985 : vector<1x3xf32>
    %c1_373 = arith.constant 1 : index
    %c0_374 = arith.constant 0 : index
    %987 = vector.load %arg29[%c1_373, %c0_374] : memref<2x3xf32, #tpu.memory_space<vmem>>, vector<1x3xf32>
    tpu.vector_store %arg29[%c1_373, %c0_374], %986 {strides = array<i32>} : memref<2x3xf32, #tpu.memory_space<vmem>>, vector<1x3xf32>,
    %cst_375 = arith.constant dense<0xFF800000> : vector<1xf32>
    %988 = vector.multi_reduction <maximumf>, %986, %cst_375 [1] : vector<1x3xf32> to vector<1xf32>
    %989 = vector.shape_cast %988 : vector<1xf32> to vector<1x1xf32>
    %990 = vector.broadcast %989 : vector<1x1xf32> to vector<1x3xf32>
    %991 = arith.subf %986, %990 : vector<1x3xf32>
    %992 = math.exp %991 : vector<1x3xf32>
    %cst_376 = arith.constant dense<0.000000e+00> : vector<1xf32>
    %993 = vector.multi_reduction <add>, %992, %cst_376 [1] : vector<1x3xf32> to vector<1xf32>
    %994 = vector.shape_cast %993 : vector<1xf32> to vector<1x1xf32>
    %995 = math.log %994 : vector<1x1xf32>
    %996 = tpu.iota {dimensions = array<i32: 1>} : vector<1x3xi32>
    %c1_377 = arith.constant 1 : index
    %997 = memref.load %arg0[%c1_377] : memref<2xi32, #tpu.memory_space<smem>>
    %998 = vector.broadcast %997 : i32 to vector<1x3xi32>
    %999 = arith.cmpi eq, %996, %998 : vector<1x3xi32>
    %1000 = arith.extui %999 : vector<1x3xi1> to vector<1x3xi32>
    %1001 = arith.sitofp %1000 : vector<1x3xi32> to vector<1x3xf32>
    %1002 = vector.broadcast %995 : vector<1x1xf32> to vector<1x3xf32>
    %1003 = arith.subf %991, %1002 : vector<1x3xf32>
    %1004 = arith.mulf %1001, %1003 : vector<1x3xf32>
    %cst_378 = arith.constant dense<0.000000e+00> : vector<1xf32>
    %1005 = vector.multi_reduction <add>, %1004, %cst_378 [1] : vector<1x3xf32> to vector<1xf32>
    %1006 = vector.shape_cast %1005 : vector<1xf32> to vector<1x1xf32>
    %1007 = arith.subf %976, %1006 : vector<1x1xf32>
    %cst_379 = arith.constant 5.000000e-01 : f32
    %1008 = vector.broadcast %cst_379 : f32 to vector<1x1xf32>
    %1009 = arith.mulf %1007, %1008 : vector<1x1xf32>
    %c0_380 = arith.constant 0 : index
    %c0_381 = arith.constant 0 : index
    %1010 = vector.load %arg28[%c0_380, %c0_381] : memref<1x1xf32, #tpu.memory_space<vmem>>, vector<1x1xf32>
    tpu.vector_store %arg28[%c0_380, %c0_381], %1009 {strides = array<i32>} : memref<1x1xf32, #tpu.memory_space<vmem>>, vector<1x1xf32>,
    return
  }
}

</mosaic_0001>

<bundles_post_ra>
// kernel: sentiment_forward.1
= control target key start
LH: loop header
LB: loop body
LE: loop exit
PB: predicated region body
PF: predicated region fallthrough
CT: control target
= control target key end

     0   :  { %s11137_s6 = smov 1   ;;  %s11138_s10 = smov 2   ;;  %s12380_s0 = inlined_call_operand.smem [shape: u32[30], index: -1, kind: input, shape index: {}] }
   0x1   :  { %s11191_s5 = sld [smem:[%s12380_s0]]   ;;  %s11139_s14 = smov 3  }
   0x2   :  { %s11196_s9 = sld [smem:[%s12380_s0 + %s11137_s6]]   ;;  %s11140_s18 = smov 4  }
   0x3   :  { %s11201_s13 = sld [smem:[%s12380_s0 + %s11138_s10]]   ;;  %s11141_s22 = smov 5  }
   0x4   :  { %s11206_s17 = sld [smem:[%s12380_s0 + %s11139_s14]]   ;;  %s11142_s26 = smov 6  }
   0x5   :  { %s11211_s21 = sld [smem:[%s12380_s0 + %s11140_s18]]   ;;  %s11143_s30 = smov 7  }
   0x6   :  { %s11216_s25 = sld [smem:[%s12380_s0 + %s11141_s22]]   ;;  %s11144_s4 = smov 8  }
   0x7   :  { %s11221_s29 = sld [smem:[%s12380_s0 + %s11142_s26]]   ;;  %s11145_s10 = smov 9  }
   0x8   :  { %s11226_s3 = sld [smem:[%s12380_s0 + %s11143_s30]]   ;;  %s11146_s15 = smov 10  }
   0x9   :  { %s11231_s8 = sld [smem:[%s12380_s0 + %s11144_s4]]   ;;  %s11147_s20 = smov 11  }
   0xa   :  { %s11236_s14 = sld [smem:[%s12380_s0 + %s11145_s10]]   ;;  %s11148_s26 = smov 12  }
   0xb   :  { %s11241_s19 = sld [smem:[%s12380_s0 + %s11146_s15]]   ;;  %s11149_s1 = smov 13  }
   0xc   :  { %s11246_s24 = sld [smem:[%s12380_s0 + %s11147_s20]]   ;;  %s11150_s7 = smov 14  }
   0xd   :  { %s11251_s30 = sld [smem:[%s12380_s0 + %s11148_s26]]   ;;  %s11151_s15 = smov 15  }
   0xe   :  { %s11256_s6 = sld [smem:[%s12380_s0 + %s11149_s1]]   ;;  %s11152_s22 = smov 16  }
   0xf   :  { %s11261_s12 = sld [smem:[%s12380_s0 + %s11150_s7]]   ;;  %s11153_s28 = smov 17  }
  0x10   :  { %s11266_s20 = sld [smem:[%s12380_s0 + %s11151_s15]]   ;;  %s11154_s7 = smov 18  }
  0x11   :  { %s11271_s27 = sld [smem:[%s12380_s0 + %s11152_s22]]   ;;  %s11155_s15 = smov 19  }
  0x12   :  { %s11276_s4 = sld [smem:[%s12380_s0 + %s11153_s28]]   ;;  %s11156_s22 = smov 20  }
  0x13   :  { %s11157_s28 = smov 21  }
  0x15   :  { %12401 = sst [smem:[#allocation12_spill]] %s11261_s12 }
  0x16   :  { %12402 = sst [smem:[#allocation13_spill]] %s11266_s20 }
  0x17   :  { %12403 = sst [smem:[#allocation14_spill]] %s11271_s27 }
  0x18   :  { %12404 = sst [smem:[#allocation15_spill]] %s11276_s4 }
  0x19   :  { %s11281_s12 = sld [smem:[%s12380_s0 + %s11154_s7]]   ;;  %s11158_s7 = smov 22  }
  0x1a   :  { %s11286_s20 = sld [smem:[%s12380_s0 + %s11155_s15]]   ;;  %s11159_s15 = smov 23  }
  0x1b   :  { %s11291_s27 = sld [smem:[%s12380_s0 + %s11156_s22]]   ;;  %s11160_s22 = smov 24  }
  0x1c   :  { %s11296_s4 = sld [smem:[%s12380_s0 + %s11157_s28]]   ;;  %s11161_s28 = smov 25  }
  0x1f   :  { %12405 = sst [smem:[#allocation16_spill]] %s11281_s12 }
  0x20   :  { %12406 = sst [smem:[#allocation17_spill]] %s11286_s20 }
  0x21   :  { %12407 = sst [smem:[#allocation18_spill]] %s11291_s27 }
  0x22   :  { %12408 = sst [smem:[#allocation19_spill]] %s11296_s4 }
  0x23   :  { %s11301_s12 = sld [smem:[%s12380_s0 + %s11158_s7]]   ;;  %s11162_s7 = smov 26  }
  0x24   :  { %s11306_s20 = sld [smem:[%s12380_s0 + %s11159_s15]]   ;;  %s11163_s15 = smov 27  }
  0x25   :  { %s11311_s27 = sld [smem:[%s12380_s0 + %s11160_s22]]   ;;  %s11164_s22 = smov 28  }
  0x26   :  { %s11316_s4 = sld [smem:[%s12380_s0 + %s11161_s28]]   ;;  %s11165_s28 = smov 29  }
  0x29   :  { %12409 = sst [smem:[#allocation20_spill]] %s11301_s12 }
  0x2a   :  { %12410 = sst [smem:[#allocation21_spill]] %s11306_s20 }
  0x2b   :  { %12411 = sst [smem:[#allocation22_spill]] %s11311_s27 }
  0x2c   :  { %12412 = sst [smem:[#allocation23_spill]] %s11316_s4 }
  0x2d   :  { %s11321_s12 = sld [smem:[%s12380_s0 + %s11162_s7]]  }
  0x2e   :  { %s11326_s20 = sld [smem:[%s12380_s0 + %s11163_s15]]  }
  0x2f   :  { %s11331_s27 = sld [smem:[%s12380_s0 + %s11164_s22]]  }
  0x30   :  { %s11336_s4 = sld [smem:[%s12380_s0 + %s11165_s28]]  }
  0x31   :  { %65 = vsyncpa [#allocation5], 0 }
  0x32   :  { %66 = vsyncpa [#allocation4], 0 }
  0x33   :  { %67 = vsyncpa [#allocation8], 0  ;;  %s74_s7 = sshll.u32 %s11191_s5, 4  ;;  %s75_s7 = int_to_ptr.vmem [resolvable:$true] %s74_s7 }
  0x34   :  { %s11075_s10 = scalar_lea.vmem %s75_s7, 16  ;;  %p11080_p1 = scmp.lt.s32.totalorder %s75_s7, %s75_s7 }
  0x35   :  { %p11076_p0 = scmp.ne.s32.totalorder %s75_s7, %s11075_s10  ;;  %p11081_p2 = scmp.lt.s32.totalorder %s11075_s10, %s11075_s10 }
  0x37   :  { %p11082_p3 = por %p11081_p2, %p11080_p1 }
  0x39   :  { %p11083_p4 = pnand %p11082_p3, %p11076_p0 }
  0x3b   :  { %11086 = shalt.err (!%p11083_p4)
}
  0x3c   :  { %s11166_s11 = smov [#allocation3]  }
  0x3d   :  { %77 = dma.vmem_to_smem %s75_s7, 16, %s11166_s11, [#allocation5]  }
  0x3e   :  { %11131 = dma.done.wait [#allocation5], 16  }
  0x3f   :  { %11132 = vsyncadd [#allocation5], 4294967280 }
  0x40   :  { %135 = sfence }
  0x41   :  { %v136_v0 = vld [vmem:[%s11196_s9] sm:$0xff]  ;;  %vm140_vm0 = vcmask 261120   ;;  %v137_v1 = vld [vmem:[%s11196_s9 + $0x8] sm:$0xff]  ;;  %v191_v16 = vld [vmem:[%s11221_s29 + $0x10] sm:$0xff]  ;;  %v11167_v36 = vmov 0.0   ;;  %vm11168_vm1 = vmmov 0  }
  0x42   :  { %v141_v2 = vsel %vm140_vm0, %v136_v0, 0.0  ;;  %v144_v3 = vsel %vm140_vm0, %v137_v1, 0.0  ;;  %v189_v14 = vld [vmem:[%s11221_s29] sm:$0xff]  ;;  %v190_v15 = vld [vmem:[%s11221_s29 + $0x8] sm:$0xff]  ;;  %v192_v18 = vld [vmem:[%s11221_s29 + $0x18] sm:$0xff]  ;;  %10024 = vmatprep.subr.mxu1 %v11167_v36  ;;  %10026 = vmatprep.mubr.msk.f32.mxu1 %vm11168_vm1, %v11167_v36  ;;  %s11169_s0 = smov 88  }
  0x43   :  { %142 = vadd.xlane.f32.xlu0 %v141_v2  ;;  %v10663_v17 = vpack.c.bf16 %v190_v15, %v189_v14  ;;  %v10667_v19 = vpack.c.bf16 %v192_v18, %v191_v16  ;;  %v9523_v27 = vld [vmem:[%s11211_s21] ss:$0 sm:$0xff]  ;;  %s11170_s5 = smov 96   ;;  %s11171_s9 = smov 120   ;;  %vm287_vm2 = vcmask 64512   ;;  %vm4524_vm3 = vcmask 523264  }
  0x44   :  { %v9524_v29 = vld [vmem:[%s11216_s25] ss:$0 sm:$0xff]  ;;  %s11172_s21 = smov 64   ;;  %s11173_s25 = smov 80   ;;  %vm9255_vm4 = vcmask 16384  }
  0x45   :  { %10664 = vmatprep.subr.bf16.mxu0 %v10663_v17  ;;  %v9526_v37 = vld [vmem:[%s11226_s3] ss:$0 sm:$0xff]  ;;  %s11174_s15 = smov 112   ;;  %s11175_s16 = smov 56  }
  0x46   :  { %10666 = vmatpush3.bf16.msra.mxu0 %v10663_v17  ;;  %s12399_s18 = smov 72   ;;  %s12397_s22 = smov 104  }
  0x47   :  { %145 = vadd.xlane.f32.xlu0 %v144_v3  ;;  %10668 = vmatprep.subr.bf16.mxu0 %v10667_v19  ;;  %s12395_s23 = smov 48   ;;  %s12393_s26 = smov 40  }
  0x48   :  { %s12414_s28 = sld [smem:[#allocation13_spill]]  ;;  %s12415_s1 = sld [smem:[#allocation14_spill]] }
  0x49   :  { %s12416_s2 = sld [smem:[#allocation15_spill]]  ;;  %s12417_s7 = sld [smem:[#allocation16_spill]] }
  0x4a   :  { %10670 = vmatpush3.bf16.msra.mxu0 %v10667_v19  ;;  %s12418_s10 = sld [smem:[#allocation18_spill]]  ;;  %s12419_s11 = sld [smem:[#allocation17_spill]] }
  0x4b   :  { %10034 = vmatprep.subr.mxu0 %v11167_v36 }
  0xd0   :  { %v143_v4 = vpop.xlane.xlu0 %142 }
  0xd1   :  { %v148_v5 = vmul.f32 0.03125, %v143_v4 }
  0xd3   :  { %v150_v6 = vsub.f32 %v136_v0, %v148_v5 }
  0xd4   :  { %v146_v7 = vpop.xlane.xlu0 %145 }
  0xd5   :  { %v149_v8 = vmul.f32 0.03125, %v146_v7  ;;  %v152_v9 = vmul.f32 %v150_v6, %v150_v6  ;;  %v11413_v7 = vld [vmem:[%s11231_s8 + $0x8] sm:$0xff] }
  0xd7   :  { %v151_v10 = vsub.f32 %v137_v1, %v149_v8  ;;  %v154_v11 = vsel %vm140_vm0, %v152_v9, 0.0 }
  0xd8   :  { %155 = vadd.xlane.f32.xlu1 %v154_v11 }
  0xd9   :  { %v153_v12 = vmul.f32 %v151_v10, %v151_v10 }
  0xdb   :  { %v157_v13 = vsel %vm140_vm0, %v153_v12, 0.0 }
  0xdc   :  { %158 = vadd.xlane.f32.xlu1 %v157_v13 }
 0x165   :  { %v156_v20 = vpop.xlane.xlu1 %155 }
 0x166   :  { %v160_v21 = vmul.f32 0.03125, %v156_v20 }
 0x168   :  { %v162_v22 = vadd.f32 1e-05, %v160_v21 }
 0x169   :  { %v159_v23 = vpop.xlane.xlu1 %158 }
 0x16a   :  { %10897 = vrsqrt.f32 %v162_v22  ;;  %v161_v24 = vmul.f32 0.03125, %v159_v23 }
 0x16c   :  { %v163_v25 = vadd.f32 1e-05, %v161_v24 }
 0x16e   :  { %10899 = vrsqrt.f32 %v163_v25 }
 0x174   :  { %v10898_v26 = vpop.eup %10897 }
 0x175   :  { %v166_v28 = vmul.f32 %v10898_v26, %v150_v6 }
 0x177   :  { %v174_v30 = vmul.f32 %v9523_v27, %v166_v28 }
 0x178   :  { %v10900_v31 = vpop.eup %10899 }
 0x179   :  { %v167_v32 = vmul.f32 %v10900_v31, %v151_v10  ;;  %v11351_v33 = vadd.f32 %v9524_v29, %v174_v30  ;;  %v11418_v10 = vld [vmem:[%s11231_s8] sm:$0xff] }
 0x17b   :  { %v175_v34 = vmul.f32 %v9523_v27, %v167_v32  ;;  %10021 = vmatprep.mubr.msk.f32.mxu0 %vm140_vm0, %v11351_v33  ;;  %v11446_v27 = vld [vmem:[%s11231_s8 + $0x10] sm:$0xff] }
 0x17d   :  { %v11355_v35 = vadd.f32 %v9524_v29, %v175_v34 }
 0x17f   :  { %10022 = vmatmul.mubr.msk.f32.vlgmr.msra.gmra.mrb[0].mxu0 %vm140_vm0, %v11355_v35 }
 0x180   :  { %10036 = vmatprep.mubr.msk.f32.mxu0 %vm11168_vm1, %v11167_v36 }
 0x252   :  { %v10023_v38 = vpop.f32.mrb[0].mxu0 }
 0x253   :  { %v11366_v39 = vadd.f32 %v10023_v38, %v9526_v37  ;;  %v270_v40 = vpop.f32.mrb[1].mxu0 }
 0x254   :  { %v11368_v41 = vadd.f32 %v9526_v37, %v270_v40 }
 0x256   :  { %451 = vrot.lane.b32.xlu1 %v11368_v41, %s11169_s0  ;;  %285 = vrot.lane.b32.xlu0 %v11368_v41, %s11170_s5 }
 0x25a   :  { %449 = vrot.lane.b32.xlu1 %v11368_v41, %s11171_s9 }
 0x2c8   :  { %v452_v42 = vpop.permute.xlu1 %451  ;;  %v286_v43 = vpop.permute.xlu0 %285 }
 0x2c9   :  { %10025 = vmatpush3.xpose.msk.msra.mxu1 %vm287_vm2, %v286_v43  ;;  %10035 = vmatpush3.xpose.msk.msra.mxu0 %vm287_vm2, %v452_v42 }
 0x2ca   :  { %10029 = vmatprep.subr.mxu1 %v11167_v36  ;;  %10044 = vmatprep.subr.mxu0 %v11167_v36 }
 0x2cc   :  { %v450_v44 = vpop.permute.xlu1 %449  ;;  %10027 = vmatmul.mubr.msk.f32.vlgmr.msra.gmra.mrb[0].mxu1 %vm287_vm2, %v11368_v41 }
 0x2cd   :  { %10037 = vmatmul.mubr.msk.f32.vlgmr.msra.gmra.mrb[2].mxu0 %vm287_vm2, %v450_v44  ;;  %10031 = vmatprep.mubr.msk.f32.mxu1 %vm11168_vm1, %v11167_v36 }
 0x2ce   :  { %10046 = vmatprep.mubr.msk.f32.mxu0 %vm11168_vm1, %v11167_v36  ;;  %10045 = vmatpush3.msra.mxu0 %v11413_v7 }
 0x2cf   :  { %10049 = vmatprep.subr.mxu0 %v11167_v36 }
 0x39f   :  { %v358_v45 = vpop.f32.mrb[0].mxu1 }
 0x3a0   :  { %v10028_v46 = vpop.f32.mrb[1].mxu1  ;;  %v523_v47 = vpop.f32.mrb[2].mxu0  ;;  %v362_v48 = vsel %vm287_vm2, %v358_v45, -inf }
 0x3a1   :  { %v10038_v49 = vpop.f32.mrb[3].mxu0  ;;  %363 = vmax.xlane.f32.xlu1 %v362_v48  ;;  %v527_v50 = vsel %vm287_vm2, %v523_v47, -inf }
 0x3a2   :  { %528 = vmax.xlane.f32.xlu0 %v527_v50 }
 0x3b2   :  { %373 = vrot.lane.b32.xlu1 %v11368_v41, %s11172_s21 }
 0x3b6   :  { %762 = vrot.lane.b32.xlu1 %v11368_v41, %s11173_s25 }
 0x3ba   :  { %760 = vrot.lane.b32.xlu1 %v11368_v41, %s11174_s15 }
 0x42e   :  { %v364_v51 = vpop.xlane.xlu1 %363 }
 0x42f   :  { %v365_v52 = vsub.f32 %v358_v45, %v364_v51  ;;  %v529_v53 = vpop.xlane.xlu0 %528 }
 0x430   :  { %v530_v54 = vsub.f32 %v523_v47, %v529_v53  ;;  %v11471_v47 = vld [vmem:[%s11231_s8 + $0x18] sm:$0xff] }
 0x431   :  { %v366_v55 = vmul.f32 1.442695, %v365_v52 }
 0x432   :  { %v531_v56 = vmul.f32 1.442695, %v530_v54  ;;  %v374_v57 = vpop.permute.xlu1 %373 }
 0x433   :  { %10901 = vpow2.f32 %v366_v55  ;;  %10030 = vmatpush3.msra.mxu1 %v374_v57 }
 0x434   :  { %10039 = vmatprep.subr.mxu1 %v11167_v36  ;;  %10903 = vpow2.f32 %v531_v56 }
 0x436   :  { %v763_v5 = vpop.permute.xlu1 %762 }
 0x43a   :  { %v761_v6 = vpop.permute.xlu1 %760 }
 0x43d   :  { %v10902_v58 = vpop.eup %10901 }
 0x43e   :  { %v368_v59 = vsel %vm287_vm2, %v10902_v58, 0.0  ;;  %v10904_v60 = vpop.eup %10903 }
 0x43f   :  { %369 = vadd.xlane.f32.xlu0 %v368_v59  ;;  %v533_v61 = vsel %vm287_vm2, %v10904_v60, 0.0 }
 0x443   :  { %534 = vadd.xlane.f32.xlu0 %v533_v61 }
 0x459   :  { %538 = vrot.lane.b32.xlu0 %v11368_v41, %s11175_s16 }
 0x4cc   :  { %v370_v62 = vpop.xlane.xlu0 %369 }
 0x4cd   :  { %10905 = vrcp.f32 %v370_v62 }
 0x4d0   :  { %v535_v63 = vpop.xlane.xlu0 %534 }
 0x4d1   :  { %10907 = vrcp.f32 %v535_v63 }
 0x4d4   :  { %v539_v2 = vpop.permute.xlu0 %538 }
 0x4d7   :  { %v10906_v0 = vpop.eup %10905 }
 0x4d8   :  { %v372_v1 = vmul.f32 %v10906_v0, %v10902_v58 }
 0x4da   :  { %10032 = vmatmul.mubr.msk.f32.vlgmr.msra.gmra.mrb[2].mxu1 %vm287_vm2, %v372_v1 }
 0x4db   :  { %v10908_v3 = vpop.eup %10907  ;;  %10040 = vmatpush3.msra.mxu1 %v539_v2  ;;  %10041 = vmatprep.mubr.msk.f32.mxu1 %vm11168_vm1, %v11167_v36 }
 0x4dc   :  { %v537_v4 = vmul.f32 %v10908_v3, %v10904_v60  ;;  %10054 = vmatprep.subr.mxu1 %v11167_v36 }
 0x4de   :  { %10042 = vmatmul.mubr.msk.f32.vlgmr.msra.gmra.mrb[4].mxu1 %vm287_vm2, %v537_v4 }
 0x4df   :  { %10056 = vmatprep.mubr.msk.f32.mxu1 %vm11168_vm1, %v11167_v36 }
 0x4e2   :  { %10055 = vmatpush3.xpose.msk.msra.mxu1 %vm287_vm2, %v763_v5 }
 0x4e3   :  { %10059 = vmatprep.subr.mxu1 %v11167_v36 }
 0x4e5   :  { %10057 = vmatmul.mubr.msk.f32.vlgmr.msra.gmra.mrb[6].mxu1 %vm287_vm2, %v761_v6 }
 0x4e6   :  { %10061 = vmatprep.mubr.msk.f32.mxu1 %vm11168_vm1, %v11167_v36 }
 0x5ad   :  { %v445_v8 = vpop.f32.mrb[2].mxu1 }
 0x5ae   :  { %v10033_v9 = vpop.f32.mrb[3].mxu1 }
 0x5b1   :  { %v610_v11 = vpop.f32.mrb[4].mxu1 }
 0x5b2   :  { %v10043_v12 = vpop.f32.mrb[5].mxu1  ;;  %10047 = vmatmul.mubr.msk.f32.vlgmr.msra.gmra.mrb[4].mxu0 %vm287_vm2, %v610_v11 }
 0x5b3   :  { %10050 = vmatpush3.msra.mxu0 %v11418_v10  ;;  %10051 = vmatprep.mubr.msk.f32.mxu0 %vm11168_vm1, %v11167_v36 }
 0x5b4   :  { %10064 = vmatprep.subr.mxu0 %v11167_v36 }
 0x5b8   :  { %v834_v13 = vpop.f32.mrb[6].mxu1 }
 0x5b9   :  { %v10058_v14 = vpop.f32.mrb[7].mxu1  ;;  %v838_v15 = vsel %vm287_vm2, %v834_v13, -inf }
 0x5ba   :  { %839 = vmax.xlane.f32.xlu1 %v838_v15  ;;  %10052 = vmatmul.mubr.msk.f32.vlgmr.msra.gmra.mrb[4].mxu0 %vm287_vm2, %v445_v8 }
 0x5bb   :  { %10066 = vmatprep.mubr.msk.f32.mxu0 %vm11168_vm1, %v11167_v36  ;;  %10065 = vmatpush3.msra.mxu0 %v11446_v27 }
 0x5bc   :  { %10074 = vmatprep.subr.mxu0 %v11167_v36 }
 0x5cb   :  { %1001 = vrot.lane.b32.xlu1 %v11368_v41, %s12399_s18 }
 0x5cf   :  { %999 = vrot.lane.b32.xlu1 %v11368_v41, %s12397_s22 }
 0x647   :  { %v840_v16 = vpop.xlane.xlu1 %839 }
 0x648   :  { %v841_v17 = vsub.f32 %v834_v13, %v840_v16 }
 0x64a   :  { %v842_v18 = vmul.f32 1.442695, %v841_v17 }
 0x64b   :  { %v1002_v24 = vpop.permute.xlu1 %1001 }
 0x64c   :  { %10909 = vpow2.f32 %v842_v18 }
 0x64f   :  { %v1000_v26 = vpop.permute.xlu1 %999 }
 0x656   :  { %v10910_v19 = vpop.eup %10909 }
 0x657   :  { %v844_v20 = vsel %vm287_vm2, %v10910_v19, 0.0 }
 0x658   :  { %845 = vadd.xlane.f32.xlu0 %v844_v20 }
 0x66e   :  { %849 = vrot.lane.b32.xlu0 %v11368_v41, %s12395_s23 }
 0x6e5   :  { %v846_v21 = vpop.xlane.xlu0 %845 }
 0x6e6   :  { %10911 = vrcp.f32 %v846_v21 }
 0x6e9   :  { %v850_v22 = vpop.permute.xlu0 %849 }
 0x6ea   :  { %10060 = vmatpush3.msra.mxu1 %v850_v22 }
 0x6eb   :  { %10069 = vmatprep.subr.mxu1 %v11167_v36 }
 0x6f0   :  { %v10912_v23 = vpop.eup %10911 }
 0x6f1   :  { %v848_v25 = vmul.f32 %v10912_v23, %v10910_v19 }
 0x6f3   :  { %10062 = vmatmul.mubr.msk.f32.vlgmr.msra.gmra.mrb[8].mxu1 %vm287_vm2, %v848_v25 }
 0x6f4   :  { %10070 = vmatpush3.xpose.msk.msra.mxu1 %vm287_vm2, %v1002_v24  ;;  %10071 = vmatprep.mubr.msk.f32.mxu1 %vm11168_vm1, %v11167_v36 }
 0x6f5   :  { %10084 = vmatprep.subr.mxu1 %v11167_v36 }
 0x6f7   :  { %10072 = vmatmul.mubr.msk.f32.vlgmr.msra.gmra.mrb[10].mxu1 %vm287_vm2, %v1000_v26 }
 0x6f8   :  { %10086 = vmatprep.mubr.msk.f32.mxu1 %vm11168_vm1, %v11167_v36 }
 0x7c6   :  { %v921_v28 = vpop.f32.mrb[8].mxu1 }
 0x7c7   :  { %v10063_v29 = vpop.f32.mrb[9].mxu1  ;;  %10067 = vmatmul.mubr.msk.f32.vlgmr.msra.gmra.mrb[4].mxu0 %vm287_vm2, %v921_v28 }
 0x7c8   :  { %10076 = vmatprep.mubr.msk.f32.mxu0 %vm11168_vm1, %v11167_v36 }
 0x7ca   :  { %v1073_v30 = vpop.f32.mrb[10].mxu1 }
 0x7cb   :  { %v10073_v31 = vpop.f32.mrb[11].mxu1  ;;  %v1077_v32 = vsel %vm287_vm2, %v1073_v30, -inf }
 0x7cc   :  { %1078 = vmax.xlane.f32.xlu0 %v1077_v32 }
 0x7e2   :  { %1088 = vrot.lane.b32.xlu0 %v11368_v41, %s12393_s26 }
 0x7e6   :  { %1405 = vrot.lane.b32.xlu0 %v11366_v39, %s11169_s0 }
 0x859   :  { %v1079_v34 = vpop.xlane.xlu0 %1078 }
 0x85a   :  { %v1080_v37 = vsub.f32 %v1073_v30, %v1079_v34 }
 0x85c   :  { %v1081_v38 = vmul.f32 1.442695, %v1080_v37  ;;  %v9561_v37 = vld [vmem:[%s11236_s14] ss:$0 sm:$0xff] }
 0x85d   :  { %v1089_v40 = vpop.permute.xlu0 %1088 }
 0x85e   :  { %10913 = vpow2.f32 %v1081_v38  ;;  %10075 = vmatpush3.msra.mxu0 %v1089_v40 }
 0x85f   :  { %10079 = vmatprep.subr.mxu0 %v11167_v36 }
 0x861   :  { %v1406_v52 = vpop.permute.xlu0 %1405 }
 0x868   :  { %v10914_v42 = vpop.eup %10913 }
 0x869   :  { %v1083_v43 = vsel %vm287_vm2, %v10914_v42, 0.0 }
 0x86a   :  { %1084 = vadd.xlane.f32.xlu1 %v1083_v43 }
 0x87b   :  { %1240 = vrot.lane.b32.xlu1 %v11366_v39, %s11170_s5 }
 0x87f   :  { %1403 = vrot.lane.b32.xlu1 %v11366_v39, %s11171_s9 }
 0x8f7   :  { %v1085_v41 = vpop.xlane.xlu1 %1084 }
 0x8f8   :  { %10915 = vrcp.f32 %v1085_v41 }
 0x8fb   :  { %v1241_v44 = vpop.permute.xlu1 %1240 }
 0x8fc   :  { %10085 = vmatpush3.xpose.msk.msra.mxu1 %vm287_vm2, %v1241_v44 }
 0x8fd   :  { %10089 = vmatprep.subr.mxu1 %v11167_v36 }
 0x8ff   :  { %10087 = vmatmul.mubr.msk.f32.vlgmr.msra.gmra.mrb[12].mxu1 %vm287_vm2, %v11366_v39  ;;  %v1404_v54 = vpop.permute.xlu1 %1403 }
 0x900   :  { %10091 = vmatprep.mubr.msk.f32.mxu1 %vm11168_vm1, %v11167_v36 }
 0x902   :  { %v10916_v45 = vpop.eup %10915 }
 0x903   :  { %v1087_v46 = vmul.f32 %v10916_v45, %v10914_v42 }
 0x905   :  { %10077 = vmatmul.mubr.msk.f32.vlgmr.msra.gmra.mrb[6].mxu0 %vm287_vm2, %v1087_v46 }
 0x906   :  { %10080 = vmatpush3.msra.mxu0 %v11471_v47  ;;  %10081 = vmatprep.mubr.msk.f32.mxu0 %vm11168_vm1, %v11167_v36 }
 0x907   :  { %10094 = vmatprep.subr.mxu0 %v11167_v36 }
 0x9d2   :  { %v1312_v48 = vpop.f32.mrb[12].mxu1 }
 0x9d3   :  { %v10088_v49 = vpop.f32.mrb[13].mxu1  ;;  %v1316_v50 = vsel %vm287_vm2, %v1312_v48, -inf }
 0x9d4   :  { %1317 = vmax.xlane.f32.xlu0 %v1316_v50 }
 0x9d8   :  { %v1160_v51 = vpop.f32.mrb[6].mxu0 }
 0x9d9   :  { %v10078_v53 = vpop.f32.mrb[7].mxu0  ;;  %10082 = vmatmul.mubr.msk.f32.vlgmr.msra.gmra.mrb[4].mxu0 %vm287_vm2, %v1160_v51 }
 0x9da   :  { %10095 = vmatpush3.xpose.msk.msra.mxu0 %vm287_vm2, %v1406_v52  ;;  %10096 = vmatprep.mubr.msk.f32.mxu0 %vm11168_vm1, %v11167_v36 }
 0x9db   :  { %10104 = vmatprep.subr.mxu0 %v11167_v36 }
 0x9dd   :  { %10097 = vmatmul.mubr.msk.f32.vlgmr.msra.gmra.mrb[8].mxu0 %vm287_vm2, %v1404_v54 }
 0x9de   :  { %10105 = vmatpush3.msra.mxu0 %v11413_v7  ;;  %10106 = vmatprep.mubr.msk.f32.mxu0 %vm11168_vm1, %v11167_v36 }
 0x9df   :  { %10109 = vmatprep.subr.mxu0 %v11167_v36 }
 0xa61   :  { %v1318_v55 = vpop.xlane.xlu0 %1317 }
 0xa62   :  { %v1319_v56 = vsub.f32 %v1312_v48, %v1318_v55 }
 0xa64   :  { %v1320_v57 = vmul.f32 1.442695, %v1319_v56 }
 0xa66   :  { %10917 = vpow2.f32 %v1320_v57 }
 0xa70   :  { %v10918_v58 = vpop.eup %10917 }
 0xa71   :  { %v1322_v59 = vsel %vm287_vm2, %v10918_v58, 0.0 }
 0xa72   :  { %1323 = vadd.xlane.f32.xlu0 %v1322_v59 }
 0xaac   :  { %v1233_v60 = vpop.f32.mrb[4].mxu0 }
 0xaad   :  { %1238 = vst.msk [vmem:[#allocation2] sm:$0xff] %vm140_vm0, %v1233_v60  ;;  %v10083_v61 = vpop.f32.mrb[5].mxu0 }
 0xab0   :  { %v1477_v62 = vpop.f32.mrb[8].mxu0 }
 0xab1   :  { %v10098_v63 = vpop.f32.mrb[9].mxu0  ;;  %v1481_v0 = vsel %vm287_vm2, %v1477_v62, -inf }
 0xab2   :  { %1482 = vmax.xlane.f32.xlu1 %v1481_v0 }
 0xab4   :  { %v2193_v38 = vld [vmem:[#allocation2] sm:$0xff] }
 0xab5   :  { %v2199_v43 = vadd.f32 %v9561_v37, %v2193_v38 }
 0xab7   :  { %v2201_v46 = vadd.f32 %v2199_v43, %v11351_v33  ;;  %v185_v43 = vld [vmem:[%s11201_s13 + $0x8] sm:$0xff] }
 0xab9   :  { %v2205_v48 = vsel %vm140_vm0, %v2201_v46, 0.0 }
 0xac3   :  { %1492 = vrot.lane.b32.xlu1 %v11366_v39, %s11175_s16 }
 0xac7   :  { %1716 = vrot.lane.b32.xlu1 %v11366_v39, %s11173_s25 }
 0xacb   :  { %1714 = vrot.lane.b32.xlu1 %v11366_v39, %s11174_s15 }
 0xaff   :  { %v1324_v6 = vpop.xlane.xlu0 %1323 }
 0xb3f   :  { %v1483_v1 = vpop.xlane.xlu1 %1482 }
 0xb40   :  { %v1484_v2 = vsub.f32 %v1477_v62, %v1483_v1 }
 0xb42   :  { %v1485_v3 = vmul.f32 1.442695, %v1484_v2 }
 0xb43   :  { %v1493_v12 = vpop.permute.xlu1 %1492 }
 0xb44   :  { %10919 = vpow2.f32 %v1485_v3 }
 0xb45   :  { %10921 = vrcp.f32 %v1324_v6 }
 0xb47   :  { %v1717_v14 = vpop.permute.xlu1 %1716 }
 0xb4b   :  { %v1715_v16 = vpop.permute.xlu1 %1714 }
 0xb4e   :  { %v10920_v4 = vpop.eup %10919 }
 0xb4f   :  { %v1487_v5 = vsel %vm287_vm2, %v10920_v4, 0.0  ;;  %v10922_v8 = vpop.eup %10921 }
 0xb50   :  { %1488 = vadd.xlane.f32.xlu0 %v1487_v5  ;;  %v1326_v11 = vmul.f32 %v10922_v8, %v10918_v58  ;;  %v2246_v5 = vld [vmem:[%s11251_s30 + $0x18] sm:$0xff] }
 0xb66   :  { %1327 = vrot.lane.b32.xlu0 %v11366_v39, %s11172_s21 }
 0xbdd   :  { %v1489_v7 = vpop.xlane.xlu0 %1488 }
 0xbde   :  { %10923 = vrcp.f32 %v1489_v7 }
 0xbe1   :  { %v1328_v9 = vpop.permute.xlu0 %1327 }
 0xbe2   :  { %10090 = vmatpush3.msra.mxu1 %v1328_v9 }
 0xbe3   :  { %10092 = vmatmul.mubr.msk.f32.vlgmr.msra.gmra.mrb[14].mxu1 %vm287_vm2, %v1326_v11  ;;  %10099 = vmatprep.subr.mxu1 %v11167_v36 }
 0xbe4   :  { %10100 = vmatpush3.msra.mxu1 %v1493_v12  ;;  %10101 = vmatprep.mubr.msk.f32.mxu1 %vm11168_vm1, %v11167_v36 }
 0xbe5   :  { %10114 = vmatprep.subr.mxu1 %v11167_v36 }
 0xbe8   :  { %v10924_v13 = vpop.eup %10923 }
 0xbe9   :  { %v1491_v15 = vmul.f32 %v10924_v13, %v10920_v4  ;;  %v2245_v4 = vld [vmem:[%s11251_s30 + $0x10] sm:$0xff] }
 0xbea   :  { %v10882_v6 = vpack.i.bf16 %v2246_v5, %v2245_v4 }
 0xbeb   :  { %10102 = vmatmul.mubr.msk.f32.vlgmr.msra.gmra.mrb[16].mxu1 %vm287_vm2, %v1491_v15  ;;  %v2243_v15 = vld [vmem:[%s11251_s30] sm:$0xff] }
 0xbec   :  { %10115 = vmatpush3.xpose.msk.msra.mxu1 %vm287_vm2, %v1717_v14  ;;  %10116 = vmatprep.mubr.msk.f32.mxu1 %vm11168_vm1, %v11167_v36 }
 0xbed   :  { %10119 = vmatprep.subr.mxu1 %v11167_v36 }
 0xbef   :  { %10117 = vmatmul.mubr.msk.f32.vlgmr.msra.gmra.mrb[18].mxu1 %vm287_vm2, %v1715_v16  ;;  %v2244_v16 = vld [vmem:[%s11251_s30 + $0x8] sm:$0xff] }
 0xbf0   :  { %10121 = vmatprep.mubr.msk.f32.mxu1 %vm11168_vm1, %v11167_v36 }
 0xcb6   :  { %v1399_v17 = vpop.f32.mrb[14].mxu1 }
 0xcb7   :  { %v10093_v18 = vpop.f32.mrb[15].mxu1 }
 0xcb8   :  { %v9562_v18 = vld [vmem:[%s11241_s19] ss:$0 sm:$0xff] }
 0xcbe   :  { %v1564_v19 = vpop.f32.mrb[16].mxu1 }
 0xcbf   :  { %v10103_v20 = vpop.f32.mrb[17].mxu1  ;;  %10107 = vmatmul.mubr.msk.f32.vlgmr.msra.gmra.mrb[10].mxu0 %vm287_vm2, %v1564_v19 }
 0xcc0   :  { %10110 = vmatpush3.msra.mxu0 %v11418_v10  ;;  %10111 = vmatprep.mubr.msk.f32.mxu0 %vm11168_vm1, %v11167_v36  ;;  %v9563_v20 = vld [vmem:[%s11246_s24] ss:$0 sm:$0xff] }
 0xcc1   :  { %10124 = vmatprep.subr.mxu0 %v11167_v36 }
 0xcc2   :  { %v1788_v21 = vpop.f32.mrb[18].mxu1 }
 0xcc3   :  { %v10118_v22 = vpop.f32.mrb[19].mxu1  ;;  %v1792_v23 = vsel %vm287_vm2, %v1788_v21, -inf }
 0xcc4   :  { %1793 = vmax.xlane.f32.xlu0 %v1792_v23 }
 0xcc7   :  { %10112 = vmatmul.mubr.msk.f32.vlgmr.msra.gmra.mrb[10].mxu0 %vm287_vm2, %v1399_v17 }
 0xcc8   :  { %10125 = vmatpush3.msra.mxu0 %v11446_v27  ;;  %10126 = vmatprep.mubr.msk.f32.mxu0 %vm11168_vm1, %v11167_v36 }
 0xcc9   :  { %10134 = vmatprep.subr.mxu0 %v11167_v36 }
 0xcda   :  { %1803 = vrot.lane.b32.xlu0 %v11366_v39, %s12395_s23  ;;  %s12421_s23 = sld [smem:[#allocation20_spill]] }
 0xcde   :  { %1953 = vrot.lane.b32.xlu0 %v11366_v39, %s12397_s22 }
 0xd51   :  { %v1794_v10 = vpop.xlane.xlu0 %1793 }
 0xd52   :  { %v1795_v24 = vsub.f32 %v1788_v21, %v1794_v10  ;;  %v10877_v21 = vpack.i.bf16 %v2244_v16, %v2243_v15  ;;  %v10671_v10 = vpack.c.bf16 %v2244_v16, %v2243_v15 }
 0xd54   :  { %v1796_v25 = vmul.f32 1.442695, %v1795_v24  ;;  %v184_v24 = vld [vmem:[%s11201_s13] sm:$0xff] }
 0xd55   :  { %v1804_v26 = vpop.permute.xlu0 %1803 }
 0xd56   :  { %10925 = vpow2.f32 %v1796_v25  ;;  %10120 = vmatpush3.msra.mxu1 %v1804_v26  ;;  %v10675_v25 = vpack.c.bf16 %v2246_v5, %v2245_v4  ;;  %v11575_v26 = vld [vmem:[%s11256_s6] ss:$0 sm:$0xff] }
 0xd57   :  { %10129 = vmatprep.subr.mxu1 %v11167_v36 }
 0xd59   :  { %v1954_v34 = vpop.permute.xlu0 %1953 }
 0xd60   :  { %v10926_v27 = vpop.eup %10925 }
 0xd61   :  { %v1798_v28 = vsel %vm287_vm2, %v10926_v27, 0.0 }
 0xd62   :  { %1799 = vadd.xlane.f32.xlu1 %v1798_v28 }
 0xd73   :  { %1955 = vrot.lane.b32.xlu1 %v11366_v39, %s12399_s18 }
 0xdef   :  { %v1800_v29 = vpop.xlane.xlu1 %1799 }
 0xdf0   :  { %10927 = vrcp.f32 %v1800_v29 }
 0xdf3   :  { %v1956_v32 = vpop.permute.xlu1 %1955 }
 0xdfa   :  { %v10928_v30 = vpop.eup %10927 }
 0xdfb   :  { %v1802_v31 = vmul.f32 %v10928_v30, %v10926_v27 }
 0xdfd   :  { %10122 = vmatmul.mubr.msk.f32.vlgmr.msra.gmra.mrb[20].mxu1 %vm287_vm2, %v1802_v31 }
 0xdfe   :  { %10130 = vmatpush3.xpose.msk.msra.mxu1 %vm287_vm2, %v1956_v32  ;;  %10131 = vmatprep.mubr.msk.f32.mxu1 %vm11168_vm1, %v11167_v36 }
 0xdff   :  { %10672 = vmatprep.subr.bf16.mxu1 %v10671_v10 }
 0xe01   :  { %10132 = vmatmul.mubr.msk.f32.vlgmr.msra.gmra.mrb[22].mxu1 %vm287_vm2, %v1954_v34 }
 0xe02   :  { %10674 = vmatpush3.bf16.msra.mxu1 %v10671_v10 }
 0xe03   :  { %10676 = vmatprep.subr.bf16.mxu1 %v10675_v25 }
 0xe06   :  { %10678 = vmatpush3.bf16.msra.mxu1 %v10675_v25 }
 0xe07   :  { %10166 = vmatprep.subr.mxu1 %v11167_v36 }
 0xed0   :  { %v1875_v40 = vpop.f32.mrb[20].mxu1 }
 0xed1   :  { %v10123_v42 = vpop.f32.mrb[21].mxu1  ;;  %10127 = vmatmul.mubr.msk.f32.vlgmr.msra.gmra.mrb[10].mxu0 %vm287_vm2, %v1875_v40 }
 0xed2   :  { %10136 = vmatprep.mubr.msk.f32.mxu0 %vm11168_vm1, %v11167_v36 }
 0xed4   :  { %v2027_v41 = vpop.f32.mrb[22].mxu1 }
 0xed5   :  { %v10133_v44 = vpop.f32.mrb[23].mxu1  ;;  %v2031_v45 = vsel %vm287_vm2, %v2027_v41, -inf }
 0xed6   :  { %2032 = vmax.xlane.f32.xlu1 %v2031_v45 }
 0xeda   :  { %2206 = vadd.xlane.f32.xlu1 %v2205_v48 }
 0xf63   :  { %v2033_v49 = vpop.xlane.xlu1 %2032 }
 0xf64   :  { %v2034_v50 = vsub.f32 %v2027_v41, %v2033_v49 }
 0xf66   :  { %v2035_v51 = vmul.f32 1.442695, %v2034_v50 }
 0xf67   :  { %v2207_v60 = vpop.xlane.xlu1 %2206 }
 0xf68   :  { %10929 = vpow2.f32 %v2035_v51  ;;  %v2211_v61 = vmul.f32 0.03125, %v2207_v60 }
 0xf6a   :  { %v2213_v63 = vsub.f32 %v2201_v46, %v2211_v61 }
 0xf6c   :  { %v2215_v2 = vmul.f32 %v2213_v63, %v2213_v63 }
 0xf6e   :  { %v2217_v3 = vsel %vm140_vm0, %v2215_v2, 0.0 }
 0xf72   :  { %v10930_v52 = vpop.eup %10929 }
 0xf73   :  { %v2037_v53 = vsel %vm287_vm2, %v10930_v52, 0.0 }
 0xf74   :  { %2038 = vadd.xlane.f32.xlu0 %v2037_v53 }
 0xf8a   :  { %2042 = vrot.lane.b32.xlu0 %v11366_v39, %s12393_s26  ;;  %s12420_s26 = sld [smem:[#allocation19_spill]] }
 0xf8e   :  { %10883 = vrot.lane.b32.xlu0 %v10882_v6, %s11170_s5 }
 0xf92   :  { %2350 = vrot.lane.b32.xlu0 %v11575_v26, %s11170_s5 }
0x1001   :  { %v2039_v54 = vpop.xlane.xlu0 %2038 }
0x1002   :  { %10931 = vrcp.f32 %v2039_v54 }
0x1005   :  { %v2043_v55 = vpop.permute.xlu0 %2042 }
0x1006   :  { %10135 = vmatpush3.msra.mxu0 %v2043_v55 }
0x1007   :  { %10139 = vmatprep.subr.mxu0 %v11167_v36 }
0x1009   :  { %v10884_v28 = vpop.permute.xlu0 %10883 }
0x100a   :  { %v10886_v31 = vunpack.i.h.bf16 %v10884_v28  ;;  %v10885_v32 = vunpack.i.l.bf16 %v10884_v28 }
0x100c   :  { %v10932_v33 = vpop.eup %10931  ;;  %v10683_v42 = vpack.c.bf16 %v10886_v31, %v10885_v32 }
0x100d   :  { %v2041_v56 = vmul.f32 %v10932_v33, %v10930_v52  ;;  %v11590_v48 = vpop.permute.xlu0 %2350 }
0x100f   :  { %10137 = vmatmul.mubr.msk.f32.vlgmr.msra.gmra.mrb[12].mxu0 %vm287_vm2, %v2041_v56  ;;  %v2439_v56 = vlaneseq }
0x1010   :  { %10140 = vmatpush3.msra.mxu0 %v11471_v47  ;;  %10141 = vmatprep.mubr.msk.f32.mxu0 %vm11168_vm1, %v11167_v36 }
0x10e2   :  { %v2114_v57 = vpop.f32.mrb[12].mxu0 }
0x10e3   :  { %v10138_v58 = vpop.f32.mrb[13].mxu0  ;;  %10142 = vmatmul.mubr.msk.f32.vlgmr.msra.gmra.mrb[10].mxu0 %vm287_vm2, %v2114_v57  ;;  %v186_v57 = vld [vmem:[%s11206_s17] sm:$0x3]  ;;  %s12413_s17 = sld [smem:[#allocation12_spill]] }
0x10e4   :  { %10163 = vmatprep.mubr.msk.f32.mxu0 %vm140_vm0, %v184_v24  ;;  %v9525_v58 = vadd.f32 -1.0, %v186_v57 }
0x10e9   :  { %v11656_v25 = vld [vmem:[%s12413_s17 + $0x8] sm:$0xff] }
0x11b6   :  { %v2187_v39 = vpop.f32.mrb[10].mxu0 }
0x11b7   :  { %2192 = vst.msk [vmem:[#allocation2 + $0x8] sm:$0xff] %vm140_vm0, %v2187_v39  ;;  %v10143_v59 = vpop.f32.mrb[11].mxu0  ;;  %v11620_v39 = vshrl.u32 %v2439_v56, 7 }
0x11b8   :  { %v11622_v59 = vmul.f32 1e+09, %v9525_v58 }
0x11b9   :  { %v2441_v60 = vsub.s32 0, %v11620_v39 }
0x11bb   :  { %v11626_v61 = vrot.slane %v11622_v59, %v2441_v60 }
0x11be   :  { %v2194_v62 = vld [vmem:[#allocation2 + $0x8] sm:$0xff] }
0x11bf   :  { %v2200_v0 = vadd.f32 %v9561_v37, %v2194_v62 }
0x11c1   :  { %v2202_v47 = vadd.f32 %v2200_v0, %v11355_v35 }
0x11c3   :  { %v2208_v1 = vsel %vm140_vm0, %v2202_v47, 0.0 }
0x11c4   :  { %2209 = vadd.xlane.f32.xlu1 %v2208_v1 }
0x11c8   :  { %2218 = vadd.xlane.f32.xlu1 %v2217_v3 }
0x1251   :  { %v2210_v7 = vpop.xlane.xlu1 %2209 }
0x1252   :  { %v2212_v8 = vmul.f32 0.03125, %v2210_v7 }
0x1254   :  { %v2214_v9 = vsub.f32 %v2202_v47, %v2212_v8 }
0x1255   :  { %v2219_v35 = vpop.xlane.xlu1 %2218 }
0x1256   :  { %v2223_v11 = vmul.f32 0.03125, %v2219_v35  ;;  %v2216_v12 = vmul.f32 %v2214_v9, %v2214_v9 }
0x1258   :  { %v2225_v13 = vadd.f32 1e-05, %v2223_v11  ;;  %v2220_v14 = vsel %vm140_vm0, %v2216_v12, 0.0 }
0x1259   :  { %2221 = vadd.xlane.f32.xlu1 %v2220_v14 }
0x125a   :  { %10933 = vrsqrt.f32 %v2225_v13 }
0x1264   :  { %v10934_v17 = vpop.eup %10933 }
0x1265   :  { %v2229_v19 = vmul.f32 %v10934_v17, %v2213_v63 }
0x1267   :  { %v2235_v22 = vmul.f32 %v9562_v18, %v2229_v19 }
0x1269   :  { %v11566_v23 = vadd.f32 %v9563_v20, %v2235_v22 }
0x126a   :  { %10878 = vrot.lane.b32.xlu1 %v10877_v21, %s11170_s5 }
0x126b   :  { %10152 = vmatprep.mubr.msk.f32.mxu1 %vm140_vm0, %v11566_v23 }
0x12e6   :  { %v2222_v27 = vpop.xlane.xlu1 %2221 }
0x12e7   :  { %v2224_v29 = vmul.f32 0.03125, %v2222_v27 }
0x12e9   :  { %v2226_v30 = vadd.f32 1e-05, %v2224_v29  ;;  %v11661_v29 = vld [vmem:[%s12413_s17] sm:$0xff] }
0x12ea   :  { %v10879_v34 = vpop.permute.xlu1 %10878 }
0x12eb   :  { %10935 = vrsqrt.f32 %v2226_v30  ;;  %v10881_v37 = vunpack.i.h.bf16 %v10879_v34  ;;  %v10880_v38 = vunpack.i.l.bf16 %v10879_v34 }
0x12ed   :  { %v10679_v40 = vpack.c.bf16 %v10881_v37, %v10880_v38 }
0x12ef   :  { %10680 = vmatprep.subr.bf16.mxu0 %v10679_v40 }
0x12f0   :  { %10682 = vmatpush3.bf16.msra.mxu0 %v10679_v40 }
0x12f1   :  { %10684 = vmatprep.subr.bf16.mxu0 %v10683_v42 }
0x12f4   :  { %10686 = vmatpush3.bf16.msra.mxu0 %v10683_v42 }
0x12f5   :  { %v10936_v41 = vpop.eup %10935  ;;  %10176 = vmatprep.subr.mxu0 %v11167_v36 }
0x12f6   :  { %v2230_v44 = vmul.f32 %v10936_v41, %v2214_v9 }
0x12f7   :  { %10164 = vmatmul.mubr.msk.f32.vlgmr.msra.gmra.mrb[14].mxu0 %vm140_vm0, %v185_v43 }
0x12f8   :  { %v2236_v45 = vmul.f32 %v9562_v18, %v2230_v44  ;;  %10178 = vmatprep.mubr.msk.f32.mxu0 %vm11168_vm1, %v11167_v36 }
0x12fa   :  { %v11584_v46 = vadd.f32 %v9563_v20, %v2236_v45 }
0x12fc   :  { %10153 = vmatmul.mubr.msk.f32.vlgmr.msra.gmra.mrb[24].mxu1 %vm140_vm0, %v11584_v46 }
0x12fd   :  { %10168 = vmatprep.mubr.msk.f32.mxu1 %vm11168_vm1, %v11167_v36 }
0x13ca   :  { %v11592_v49 = vpop.f32.mrb[14].mxu0 }
0x13cb   :  { %v2425_v50 = vpop.f32.mrb[15].mxu0 }
0x13cc   :  { %v11595_v51 = vadd.f32 %v2425_v50, %v11590_v48 }
0x13ce   :  { %2608 = vrot.lane.b32.xlu0 %v11595_v51, %s11171_s9  ;;  %10167 = vmatpush3.xpose.msk.msra.mxu1 %vm287_vm2, %v11595_v51 }
0x13cf   :  { %v11601_v52 = vpop.f32.mrb[24].mxu1  ;;  %10171 = vmatprep.subr.mxu1 %v11167_v36 }
0x13d0   :  { %v2324_v53 = vpop.f32.mrb[25].mxu1  ;;  %v11697_v58 = vadd.f32 %v11601_v52, %v11575_v26 }
0x13d1   :  { %v11605_v54 = vadd.f32 %v11575_v26, %v2324_v53 }
0x13d3   :  { %2606 = vrot.lane.b32.xlu0 %v11605_v54, %s11171_s9  ;;  %10169 = vmatmul.mubr.msk.f32.vlgmr.msra.gmra.mrb[26].mxu1 %vm287_vm2, %v11605_v54 }
0x13d4   :  { %10173 = vmatprep.mubr.msk.f32.mxu1 %vm11168_vm1, %v11167_v36 }
0x1440   :  { %v2609_v55 = vpop.permute.xlu0 %2608 }
0x1441   :  { %10177 = vmatpush3.xpose.msk.msra.mxu0 %vm287_vm2, %v2609_v55 }
0x1442   :  { %10186 = vmatprep.subr.mxu0 %v11167_v36 }
0x1445   :  { %v2607_v33 = vpop.permute.xlu0 %2606 }
0x1446   :  { %10179 = vmatmul.mubr.msk.f32.vlgmr.msra.gmra.mrb[16].mxu0 %vm287_vm2, %v2607_v33  ;;  %v11688_v33 = vadd.f32 %v11592_v49, %v11590_v48  ;;  %v11705_v48 = vld [vmem:[%s12413_s17 + $0x10] sm:$0xff] }
0x1447   :  { %10188 = vmatprep.mubr.msk.f32.mxu0 %vm11168_vm1, %v11167_v36  ;;  %10187 = vmatpush3.msra.mxu0 %v11656_v25 }
0x1448   :  { %10191 = vmatprep.subr.mxu0 %v11167_v36 }
0x14a6   :  { %v2515_v62 = vpop.f32.mrb[26].mxu1 }
0x14a7   :  { %v2516_v63 = vadd.f32 %v2515_v62, %v11626_v61  ;;  %v10170_v0 = vpop.f32.mrb[27].mxu1 }
0x14a9   :  { %v2519_v47 = vsel %vm287_vm2, %v2516_v63, -inf }
0x14aa   :  { %2520 = vmax.xlane.f32.xlu1 %v2519_v47 }
0x14bb   :  { %2530 = vrot.lane.b32.xlu1 %v11595_v51, %s11170_s5 }
0x14bf   :  { %2919 = vrot.lane.b32.xlu1 %v11595_v51, %s11174_s15 }
0x14c3   :  { %2917 = vrot.lane.b32.xlu1 %v11605_v54, %s11174_s15 }
0x1519   :  { %v2680_v1 = vpop.f32.mrb[16].mxu0 }
0x151a   :  { %v2681_v2 = vadd.f32 %v2680_v1, %v11626_v61  ;;  %v10180_v3 = vpop.f32.mrb[17].mxu0 }
0x151c   :  { %v2684_v4 = vsel %vm287_vm2, %v2681_v2, -inf }
0x151d   :  { %2685 = vmax.xlane.f32.xlu0 %v2684_v4 }
0x1537   :  { %v2521_v5 = vpop.xlane.xlu1 %2520 }
0x1538   :  { %v2522_v6 = vsub.f32 %v2516_v63, %v2521_v5 }
0x153a   :  { %v2523_v7 = vmul.f32 1.442695, %v2522_v6 }
0x153b   :  { %v2531_v8 = vpop.permute.xlu1 %2530 }
0x153c   :  { %10937 = vpow2.f32 %v2523_v7  ;;  %10172 = vmatpush3.msra.mxu1 %v2531_v8 }
0x153d   :  { %10181 = vmatprep.subr.mxu1 %v11167_v36 }
0x153f   :  { %v2920_v22 = vpop.permute.xlu1 %2919 }
0x1543   :  { %v2918_v24 = vpop.permute.xlu1 %2917 }
0x1546   :  { %v10938_v9 = vpop.eup %10937 }
0x1547   :  { %v2525_v35 = vsel %vm287_vm2, %v10938_v9, 0.0 }
0x1548   :  { %2526 = vadd.xlane.f32.xlu0 %v2525_v35 }
0x15aa   :  { %v2686_v11 = vpop.xlane.xlu0 %2685 }
0x15ab   :  { %v2687_v12 = vsub.f32 %v2681_v2, %v2686_v11 }
0x15ad   :  { %v2688_v13 = vmul.f32 1.442695, %v2687_v12 }
0x15af   :  { %10939 = vpow2.f32 %v2688_v13 }
0x15b9   :  { %v10940_v14 = vpop.eup %10939 }
0x15ba   :  { %v2690_v15 = vsel %vm287_vm2, %v10940_v14, 0.0 }
0x15bb   :  { %2691 = vadd.xlane.f32.xlu0 %v2690_v15 }
0x15d1   :  { %2695 = vrot.lane.b32.xlu0 %v11595_v51, %s11169_s0 }
0x15d5   :  { %v2527_v16 = vpop.xlane.xlu0 %2526 }
0x15d6   :  { %10941 = vrcp.f32 %v2527_v16 }
0x15e0   :  { %v10942_v17 = vpop.eup %10941 }
0x15e1   :  { %v2529_v18 = vmul.f32 %v10942_v17, %v10938_v9 }
0x15e3   :  { %10174 = vmatmul.mubr.msk.f32.vlgmr.msra.gmra.mrb[28].mxu1 %vm287_vm2, %v2529_v18 }
0x15e4   :  { %10183 = vmatprep.mubr.msk.f32.mxu1 %vm11168_vm1, %v11167_v36 }
0x1648   :  { %v2692_v19 = vpop.xlane.xlu0 %2691 }
0x1649   :  { %10943 = vrcp.f32 %v2692_v19 }
0x164c   :  { %v2696_v20 = vpop.permute.xlu0 %2695 }
0x164d   :  { %10182 = vmatpush3.msra.mxu1 %v2696_v20 }
0x164e   :  { %10196 = vmatprep.subr.mxu1 %v11167_v36 }
0x1653   :  { %v10944_v21 = vpop.eup %10943 }
0x1654   :  { %v2694_v10 = vmul.f32 %v10944_v21, %v10940_v14 }
0x1656   :  { %10184 = vmatmul.mubr.msk.f32.vlgmr.msra.gmra.mrb[30].mxu1 %vm287_vm2, %v2694_v10 }
0x1657   :  { %10197 = vmatpush3.xpose.msk.msra.mxu1 %vm287_vm2, %v2920_v22  ;;  %10198 = vmatprep.mubr.msk.f32.mxu1 %vm11168_vm1, %v11167_v36 }
0x1658   :  { %10201 = vmatprep.subr.mxu1 %v11167_v36 }
0x165a   :  { %10199 = vmatmul.mubr.msk.f32.vlgmr.msra.gmra.mrb[32].mxu1 %vm287_vm2, %v2918_v24 }
0x165b   :  { %10203 = vmatprep.mubr.msk.f32.mxu1 %vm11168_vm1, %v11167_v36 }
0x16b6   :  { %v2602_v27 = vpop.f32.mrb[28].mxu1 }
0x16b7   :  { %v10175_v28 = vpop.f32.mrb[29].mxu1 }
0x1729   :  { %v2767_v30 = vpop.f32.mrb[30].mxu1 }
0x172a   :  { %v10185_v31 = vpop.f32.mrb[31].mxu1  ;;  %10189 = vmatmul.mubr.msk.f32.vlgmr.msra.gmra.mrb[18].mxu0 %vm287_vm2, %v2767_v30 }
0x172b   :  { %10192 = vmatpush3.msra.mxu0 %v11661_v29  ;;  %10193 = vmatprep.mubr.msk.f32.mxu0 %vm11168_vm1, %v11167_v36 }
0x172c   :  { %10206 = vmatprep.subr.mxu0 %v11167_v36 }
0x172d   :  { %v2991_v32 = vpop.f32.mrb[32].mxu1 }
0x172e   :  { %v2992_v34 = vadd.f32 %v2991_v32, %v11626_v61  ;;  %v10200_v37 = vpop.f32.mrb[33].mxu1 }
0x1730   :  { %v2995_v38 = vsel %vm287_vm2, %v2992_v34, -inf }
0x1731   :  { %2996 = vmax.xlane.f32.xlu1 %v2995_v38 }
0x1732   :  { %10194 = vmatmul.mubr.msk.f32.vlgmr.msra.gmra.mrb[18].mxu0 %vm287_vm2, %v2602_v27 }
0x1733   :  { %10208 = vmatprep.mubr.msk.f32.mxu0 %vm11168_vm1, %v11167_v36  ;;  %10207 = vmatpush3.msra.mxu0 %v11705_v48 }
0x1734   :  { %10216 = vmatprep.subr.mxu0 %v11167_v36 }
0x1742   :  { %3158 = vrot.lane.b32.xlu1 %v11595_v51, %s12397_s22 }
0x1746   :  { %3156 = vrot.lane.b32.xlu1 %v11605_v54, %s12397_s22 }
0x17be   :  { %v2997_v40 = vpop.xlane.xlu1 %2996 }
0x17bf   :  { %v2998_v42 = vsub.f32 %v2992_v34, %v2997_v40 }
0x17c1   :  { %v2999_v43 = vmul.f32 1.442695, %v2998_v42 }
0x17c2   :  { %v3159_v54 = vpop.permute.xlu1 %3158 }
0x17c3   :  { %10945 = vpow2.f32 %v2999_v43 }
0x17c6   :  { %v3157_v57 = vpop.permute.xlu1 %3156 }
0x17cd   :  { %v10946_v41 = vpop.eup %10945 }
0x17ce   :  { %v3001_v44 = vsel %vm287_vm2, %v10946_v41, 0.0 }
0x17cf   :  { %3002 = vadd.xlane.f32.xlu0 %v3001_v44 }
0x17e5   :  { %3006 = vrot.lane.b32.xlu0 %v11595_v51, %s11173_s25 }
0x185c   :  { %v3003_v45 = vpop.xlane.xlu0 %3002 }
0x185d   :  { %10947 = vrcp.f32 %v3003_v45 }
0x1860   :  { %v3007_v50 = vpop.permute.xlu0 %3006 }
0x1861   :  { %10202 = vmatpush3.msra.mxu1 %v3007_v50 }
0x1862   :  { %10211 = vmatprep.subr.mxu1 %v11167_v36 }
0x1867   :  { %v10948_v53 = vpop.eup %10947 }
0x1868   :  { %v3005_v55 = vmul.f32 %v10948_v53, %v10946_v41 }
0x186a   :  { %10204 = vmatmul.mubr.msk.f32.vlgmr.msra.gmra.mrb[34].mxu1 %vm287_vm2, %v3005_v55 }
0x186b   :  { %10212 = vmatpush3.xpose.msk.msra.mxu1 %vm287_vm2, %v3159_v54  ;;  %10213 = vmatprep.mubr.msk.f32.mxu1 %vm11168_vm1, %v11167_v36 }
0x186c   :  { %10226 = vmatprep.subr.mxu1 %v11167_v36 }
0x186e   :  { %10214 = vmatmul.mubr.msk.f32.vlgmr.msra.gmra.mrb[36].mxu1 %vm287_vm2, %v3157_v57 }
0x186f   :  { %10227 = vmatpush3.xpose.msk.msra.mxu1 %vm287_vm2, %v11688_v33  ;;  %10228 = vmatprep.mubr.msk.f32.mxu1 %vm11168_vm1, %v11167_v36 }
0x1870   :  { %10231 = vmatprep.subr.mxu1 %v11167_v36 }
0x1872   :  { %10229 = vmatmul.mubr.msk.f32.vlgmr.msra.gmra.mrb[38].mxu1 %vm287_vm2, %v11697_v58 }
0x1873   :  { %10233 = vmatprep.mubr.msk.f32.mxu1 %vm11168_vm1, %v11167_v36 }
0x193d   :  { %v3078_v49 = vpop.f32.mrb[34].mxu1 }
0x193e   :  { %v10205_v60 = vpop.f32.mrb[35].mxu1  ;;  %10209 = vmatmul.mubr.msk.f32.vlgmr.msra.gmra.mrb[18].mxu0 %vm287_vm2, %v3078_v49 }
0x193f   :  { %10218 = vmatprep.mubr.msk.f32.mxu0 %vm11168_vm1, %v11167_v36 }
0x1941   :  { %v3230_v26 = vpop.f32.mrb[36].mxu1 }
0x1942   :  { %v3231_v52 = vadd.f32 %v3230_v26, %v11626_v61  ;;  %v10215_v62 = vpop.f32.mrb[37].mxu1 }
0x1944   :  { %v3234_v63 = vsel %vm287_vm2, %v3231_v52, -inf }
0x1945   :  { %3235 = vmax.xlane.f32.xlu0 %v3234_v63  ;;  %v3472_v0 = vpop.f32.mrb[38].mxu1 }
0x1946   :  { %v10230_v47 = vpop.f32.mrb[39].mxu1 }
0x195b   :  { %3245 = vrot.lane.b32.xlu0 %v11595_v51, %s12399_s18  ;;  %v3398_v51 = vsub.s32 1, %v11620_v39 }
0x195d   :  { %v11724_v7 = vrot.slane %v11622_v59, %v3398_v51  ;;  %v11735_v59 = vld [vmem:[%s12413_s17 + $0x18] sm:$0xff] }
0x195f   :  { %3563 = vrot.lane.b32.xlu0 %v11697_v58, %s11171_s9  ;;  %v3473_v8 = vadd.f32 %v3472_v0, %v11724_v7 }
0x1961   :  { %v3476_v9 = vsel %vm287_vm2, %v3473_v8, -inf }
0x19d2   :  { %v3236_v1 = vpop.xlane.xlu0 %3235 }
0x19d3   :  { %v3237_v2 = vsub.f32 %v3231_v52, %v3236_v1 }
0x19d5   :  { %v3238_v3 = vmul.f32 1.442695, %v3237_v2 }
0x19d6   :  { %v3246_v4 = vpop.permute.xlu0 %3245 }
0x19d7   :  { %10949 = vpow2.f32 %v3238_v3  ;;  %10217 = vmatpush3.msra.mxu0 %v3246_v4 }
0x19d8   :  { %10221 = vmatprep.subr.mxu0 %v11167_v36 }
0x19da   :  { %v3564_v17 = vpop.permute.xlu0 %3563 }
0x19e1   :  { %v10950_v5 = vpop.eup %10949 }
0x19e2   :  { %v3240_v6 = vsel %vm287_vm2, %v10950_v5, 0.0 }
0x19e3   :  { %3241 = vadd.xlane.f32.xlu1 %v3240_v6 }
0x19f4   :  { %3565 = vrot.lane.b32.xlu1 %v11688_v33, %s11171_s9 }
0x1a18   :  { %3477 = vmax.xlane.f32.xlu1 %v3476_v9 }
0x1a29   :  { %3487 = vrot.lane.b32.xlu1 %v11688_v33, %s11170_s5 }
0x1a2d   :  { %3876 = vrot.lane.b32.xlu1 %v11688_v33, %s11174_s15 }
0x1a31   :  { %3874 = vrot.lane.b32.xlu1 %v11697_v58, %s11174_s15 }
0x1a70   :  { %v3242_v35 = vpop.xlane.xlu1 %3241 }
0x1a71   :  { %10951 = vrcp.f32 %v3242_v35 }
0x1a74   :  { %v3566_v12 = vpop.permute.xlu1 %3565 }
0x1a7b   :  { %v10952_v39 = vpop.eup %10951 }
0x1a7c   :  { %v3244_v11 = vmul.f32 %v10952_v39, %v10950_v5 }
0x1a7e   :  { %10219 = vmatmul.mubr.msk.f32.vlgmr.msra.gmra.mrb[20].mxu0 %vm287_vm2, %v3244_v11 }
0x1a7f   :  { %10222 = vmatpush3.msra.mxu0 %v11735_v59  ;;  %10223 = vmatprep.mubr.msk.f32.mxu0 %vm11168_vm1, %v11167_v36 }
0x1a80   :  { %10236 = vmatprep.subr.mxu0 %v11167_v36 }
0x1aa5   :  { %v3478_v13 = vpop.xlane.xlu1 %3477 }
0x1aa6   :  { %v3479_v18 = vsub.f32 %v3473_v8, %v3478_v13 }
0x1aa8   :  { %v3480_v19 = vmul.f32 1.442695, %v3479_v18 }
0x1aa9   :  { %v3488_v14 = vpop.permute.xlu1 %3487 }
0x1aaa   :  { %10232 = vmatpush3.msra.mxu1 %v3488_v14  ;;  %10953 = vpow2.f32 %v3480_v19 }
0x1aab   :  { %10241 = vmatprep.subr.mxu1 %v11167_v36 }
0x1aad   :  { %v3877_v45 = vpop.permute.xlu1 %3876 }
0x1ab1   :  { %v3875_v53 = vpop.permute.xlu1 %3874 }
0x1ab4   :  { %v10954_v28 = vpop.eup %10953 }
0x1b51   :  { %v3317_v15 = vpop.f32.mrb[20].mxu0 }
0x1b52   :  { %v10220_v16 = vpop.f32.mrb[21].mxu0  ;;  %10224 = vmatmul.mubr.msk.f32.vlgmr.msra.gmra.mrb[18].mxu0 %vm287_vm2, %v3317_v15  ;;  %v9601_v15 = vld [vmem:[%s12414_s28] ss:$0 sm:$0xff] }
0x1b53   :  { %10237 = vmatpush3.xpose.msk.msra.mxu0 %vm287_vm2, %v3566_v12  ;;  %10238 = vmatprep.mubr.msk.f32.mxu0 %vm11168_vm1, %v11167_v36 }
0x1b54   :  { %10246 = vmatprep.subr.mxu0 %v11167_v36 }
0x1b56   :  { %10239 = vmatmul.mubr.msk.f32.vlgmr.msra.gmra.mrb[22].mxu0 %vm287_vm2, %v3564_v17 }
0x1b57   :  { %10247 = vmatpush3.msra.mxu0 %v11656_v25  ;;  %10248 = vmatprep.mubr.msk.f32.mxu0 %vm11168_vm1, %v11167_v36  ;;  %v3482_v25 = vsel %vm287_vm2, %v10954_v28, 0.0 }
0x1b58   :  { %10251 = vmatprep.subr.mxu0 %v11167_v36 }
0x1c25   :  { %v3390_v20 = vpop.f32.mrb[18].mxu0 }
0x1c26   :  { %3395 = vst.msk [vmem:[#allocation2] sm:$0xff] %vm140_vm0, %v3390_v20  ;;  %v10225_v21 = vpop.f32.mrb[19].mxu0 }
0x1c29   :  { %v3637_v22 = vpop.f32.mrb[22].mxu0 }
0x1c2a   :  { %v3638_v10 = vadd.f32 %v3637_v22, %v11724_v7  ;;  %v10240_v24 = vpop.f32.mrb[23].mxu0 }
0x1c2c   :  { %v3641_v27 = vsel %vm287_vm2, %v3638_v10, -inf }
0x1c2d   :  { %3642 = vmax.xlane.f32.xlu0 %v3641_v27  ;;  %v4353_v16 = vld [vmem:[#allocation2] sm:$0xff] }
0x1c2e   :  { %v4359_v17 = vadd.f32 %v9601_v15, %v4353_v16 }
0x1c30   :  { %v4361_v20 = vadd.f32 %v4359_v17, %v11566_v23  ;;  %v9604_v17 = vld [vmem:[%s12419_s11] ss:$0 sm:$0xff] }
0x1c31   :  { %3483 = vadd.xlane.f32.xlu0 %v3482_v25 }
0x1c32   :  { %v4365_v21 = vsel %vm140_vm0, %v4361_v20, 0.0 }
0x1cba   :  { %v3643_v30 = vpop.xlane.xlu0 %3642 }
0x1cbb   :  { %v3644_v31 = vsub.f32 %v3638_v10, %v3643_v30 }
0x1cbd   :  { %v3645_v32 = vmul.f32 1.442695, %v3644_v31 }
0x1cbe   :  { %v3484_v34 = vpop.xlane.xlu0 %3483 }
0x1cbf   :  { %10955 = vpow2.f32 %v3645_v32 }
0x1cc0   :  { %10957 = vrcp.f32 %v3484_v34 }
0x1cc9   :  { %v10956_v37 = vpop.eup %10955 }
0x1cca   :  { %v10958_v38 = vpop.eup %10957  ;;  %v3647_v40 = vsel %vm287_vm2, %v10956_v37, 0.0 }
0x1ccb   :  { %v3486_v42 = vmul.f32 %v10958_v38, %v10954_v28  ;;  %3648 = vadd.xlane.f32.xlu0 %v3647_v40 }
0x1ccd   :  { %10234 = vmatmul.mubr.msk.f32.vlgmr.msra.gmra.mrb[40].mxu1 %vm287_vm2, %v3486_v42 }
0x1cce   :  { %10243 = vmatprep.mubr.msk.f32.mxu1 %vm11168_vm1, %v11167_v36 }
0x1ce1   :  { %3652 = vrot.lane.b32.xlu0 %v11688_v33, %s11169_s0 }
0x1d58   :  { %v3649_v43 = vpop.xlane.xlu0 %3648 }
0x1d59   :  { %10959 = vrcp.f32 %v3649_v43 }
0x1d5c   :  { %v3653_v41 = vpop.permute.xlu0 %3652 }
0x1d5d   :  { %10242 = vmatpush3.msra.mxu1 %v3653_v41 }
0x1d5e   :  { %10256 = vmatprep.subr.mxu1 %v11167_v36 }
0x1d63   :  { %v10960_v44 = vpop.eup %10959 }
0x1d64   :  { %v3651_v50 = vmul.f32 %v10960_v44, %v10956_v37 }
0x1d66   :  { %10244 = vmatmul.mubr.msk.f32.vlgmr.msra.gmra.mrb[42].mxu1 %vm287_vm2, %v3651_v50 }
0x1d67   :  { %10257 = vmatpush3.xpose.msk.msra.mxu1 %vm287_vm2, %v3877_v45  ;;  %10258 = vmatprep.mubr.msk.f32.mxu1 %vm11168_vm1, %v11167_v36 }
0x1d68   :  { %10261 = vmatprep.subr.mxu1 %v11167_v36 }
0x1d6a   :  { %10259 = vmatmul.mubr.msk.f32.vlgmr.msra.gmra.mrb[44].mxu1 %vm287_vm2, %v3875_v53 }
0x1d6b   :  { %10263 = vmatprep.mubr.msk.f32.mxu1 %vm11168_vm1, %v11167_v36 }
0x1da0   :  { %v3559_v54 = vpop.f32.mrb[40].mxu1 }
0x1da1   :  { %v10235_v55 = vpop.f32.mrb[41].mxu1 }
0x1da2   :  { %v9602_v55 = vld [vmem:[%s12415_s1] ss:$0 sm:$0xff] }
0x1e39   :  { %v3724_v57 = vpop.f32.mrb[42].mxu1 }
0x1e3a   :  { %v10245_v49 = vpop.f32.mrb[43].mxu1  ;;  %10249 = vmatmul.mubr.msk.f32.vlgmr.msra.gmra.mrb[24].mxu0 %vm287_vm2, %v3724_v57 }
0x1e3b   :  { %10252 = vmatpush3.msra.mxu0 %v11661_v29  ;;  %10253 = vmatprep.mubr.msk.f32.mxu0 %vm11168_vm1, %v11167_v36  ;;  %v9603_v49 = vld [vmem:[%s12416_s2] ss:$0 sm:$0xff] }
0x1e3c   :  { %10266 = vmatprep.subr.mxu0 %v11167_v36 }
0x1e3d   :  { %v3948_v60 = vpop.f32.mrb[44].mxu1 }
0x1e3e   :  { %v3949_v26 = vadd.f32 %v3948_v60, %v11724_v7  ;;  %v10260_v52 = vpop.f32.mrb[45].mxu1 }
0x1e3f   :  { %v4403_v52 = vld [vmem:[%s12417_s7] sm:$0xff] }
0x1e40   :  { %v3952_v62 = vsel %vm287_vm2, %v3949_v26, -inf }
0x1e41   :  { %3953 = vmax.xlane.f32.xlu1 %v3952_v62  ;;  %v4404_v62 = vld [vmem:[%s12417_s7 + $0x8] sm:$0xff] }
0x1e42   :  { %10254 = vmatmul.mubr.msk.f32.vlgmr.msra.gmra.mrb[24].mxu0 %vm287_vm2, %v3559_v54 }
0x1e43   :  { %10267 = vmatpush3.msra.mxu0 %v11705_v48  ;;  %10268 = vmatprep.mubr.msk.f32.mxu0 %vm11168_vm1, %v11167_v36 }
0x1e44   :  { %10276 = vmatprep.subr.mxu0 %v11167_v36 }
0x1e52   :  { %4115 = vrot.lane.b32.xlu1 %v11688_v33, %s12397_s22 }
0x1e56   :  { %4113 = vrot.lane.b32.xlu1 %v11697_v58, %s12397_s22  ;;  %s12422_s22 = sld [smem:[#allocation21_spill]] }
0x1ece   :  { %v3954_v29 = vpop.xlane.xlu1 %3953 }
0x1ecf   :  { %v3955_v63 = vsub.f32 %v3949_v26, %v3954_v29  ;;  %v10687_v29 = vpack.c.bf16 %v4404_v62, %v4403_v52 }
0x1ed1   :  { %v3956_v0 = vmul.f32 1.442695, %v3955_v63  ;;  %v4405_v63 = vld [vmem:[%s12417_s7 + $0x10] sm:$0xff] }
0x1ed2   :  { %v4116_v4 = vpop.permute.xlu1 %4115 }
0x1ed3   :  { %10961 = vpow2.f32 %v3956_v0  ;;  %v4406_v0 = vld [vmem:[%s12417_s7 + $0x18] sm:$0xff] }
0x1ed6   :  { %v4114_v5 = vpop.permute.xlu1 %4113 }
0x1edd   :  { %v10962_v47 = vpop.eup %10961 }
0x1ede   :  { %v3958_v1 = vsel %vm287_vm2, %v10962_v47, 0.0 }
0x1edf   :  { %3959 = vadd.xlane.f32.xlu0 %v3958_v1 }
0x1ef5   :  { %3963 = vrot.lane.b32.xlu0 %v11688_v33, %s11173_s25 }
0x1f6c   :  { %v3960_v48 = vpop.xlane.xlu0 %3959 }
0x1f6d   :  { %10963 = vrcp.f32 %v3960_v48 }
0x1f70   :  { %v3964_v2 = vpop.permute.xlu0 %3963 }
0x1f71   :  { %10262 = vmatpush3.msra.mxu1 %v3964_v2 }
0x1f72   :  { %10271 = vmatprep.subr.mxu1 %v11167_v36 }
0x1f77   :  { %v10964_v3 = vpop.eup %10963 }
0x1f78   :  { %v3962_v58 = vmul.f32 %v10964_v3, %v10962_v47  ;;  %v10691_v47 = vpack.c.bf16 %v4406_v0, %v4405_v63 }
0x1f7a   :  { %10264 = vmatmul.mubr.msk.f32.vlgmr.msra.gmra.mrb[46].mxu1 %vm287_vm2, %v3962_v58 }
0x1f7b   :  { %10272 = vmatpush3.xpose.msk.msra.mxu1 %vm287_vm2, %v4116_v4  ;;  %10273 = vmatprep.mubr.msk.f32.mxu1 %vm11168_vm1, %v11167_v36 }
0x1f7c   :  { %10688 = vmatprep.subr.bf16.mxu1 %v10687_v29 }
0x1f7e   :  { %10274 = vmatmul.mubr.msk.f32.vlgmr.msra.gmra.mrb[48].mxu1 %vm287_vm2, %v4114_v5 }
0x1f7f   :  { %10690 = vmatpush3.bf16.msra.mxu1 %v10687_v29 }
0x1f80   :  { %10692 = vmatprep.subr.bf16.mxu1 %v10691_v47 }
0x1f83   :  { %10694 = vmatpush3.bf16.msra.mxu1 %v10691_v47 }
0x204d   :  { %v4035_v6 = vpop.f32.mrb[46].mxu1 }
0x204e   :  { %v10265_v51 = vpop.f32.mrb[47].mxu1  ;;  %10269 = vmatmul.mubr.msk.f32.vlgmr.msra.gmra.mrb[24].mxu0 %vm287_vm2, %v4035_v6  ;;  %v4511_v6 = vld [vmem:[%s12418_s10] sm:$0xff] }
0x204f   :  { %10278 = vmatprep.mubr.msk.f32.mxu0 %vm11168_vm1, %v11167_v36  ;;  %v4512_v51 = vld [vmem:[%s12418_s10 + $0x8] sm:$0xff] }
0x2051   :  { %v4187_v8 = vpop.f32.mrb[48].mxu1 }
0x2052   :  { %v4188_v9 = vadd.f32 %v4187_v8, %v11724_v7  ;;  %v10275_v35 = vpop.f32.mrb[49].mxu1  ;;  %v10695_v8 = vpack.c.bf16 %v4512_v51, %v4511_v6 }
0x2053   :  { %v4514_v35 = vld [vmem:[%s12418_s10 + $0x18] sm:$0xff] }
0x2054   :  { %v4191_v39 = vsel %vm287_vm2, %v4188_v9, -inf }
0x2055   :  { %4192 = vmax.xlane.f32.xlu0 %v4191_v39 }
0x206b   :  { %4202 = vrot.lane.b32.xlu0 %v11688_v33, %s12399_s18 }
0x20e2   :  { %v4193_v11 = vpop.xlane.xlu0 %4192 }
0x20e3   :  { %v4194_v12 = vsub.f32 %v4188_v9, %v4193_v11  ;;  %v4513_v9 = vld [vmem:[%s12418_s10 + $0x10] sm:$0xff]  ;;  %v4515_v11 = vld [vmem:[%s12418_s10 + $0x20] sm:$0xff] }
0x20e4   :  { %v10699_v39 = vpack.c.bf16 %v4514_v35, %v4513_v9 }
0x20e5   :  { %v4195_v13 = vmul.f32 1.442695, %v4194_v12  ;;  %v4516_v12 = vld [vmem:[%s12418_s10 + $0x28] sm:$0xff] }
0x20e6   :  { %v4203_v14 = vpop.permute.xlu0 %4202 }
0x20e7   :  { %10965 = vpow2.f32 %v4195_v13  ;;  %10277 = vmatpush3.msra.mxu0 %v4203_v14  ;;  %v10703_v13 = vpack.c.bf16 %v4516_v12, %v4515_v11  ;;  %v4517_v14 = vld [vmem:[%s12418_s10 + $0x30] sm:$0xff]  ;;  %v9610_v12 = vld [vmem:[%s12421_s23] ss:$0 sm:$0xff] }
0x20e8   :  { %10281 = vmatprep.subr.mxu0 %v11167_v36 }
0x20f1   :  { %v10966_v18 = vpop.eup %10965 }
0x20f2   :  { %v4197_v19 = vsel %vm287_vm2, %v10966_v18, 0.0 }
0x20f3   :  { %4198 = vadd.xlane.f32.xlu1 %v4197_v19 }
0x20f7   :  { %4366 = vadd.xlane.f32.xlu1 %v4365_v21 }
0x2180   :  { %v4199_v33 = vpop.xlane.xlu1 %4198 }
0x2181   :  { %10967 = vrcp.f32 %v4199_v33 }
0x2184   :  { %v4367_v25 = vpop.xlane.xlu1 %4366 }
0x2185   :  { %v4371_v30 = vmul.f32 0.03125, %v4367_v25 }
0x2187   :  { %v4373_v32 = vsub.f32 %v4361_v20, %v4371_v30 }
0x2189   :  { %v4375_v38 = vmul.f32 %v4373_v32, %v4373_v32 }
0x218b   :  { %v10968_v22 = vpop.eup %10967  ;;  %v4377_v40 = vsel %vm140_vm0, %v4375_v38, 0.0 }
0x218c   :  { %v4201_v10 = vmul.f32 %v10968_v22, %v10966_v18 }
0x218e   :  { %10279 = vmatmul.mubr.msk.f32.vlgmr.msra.gmra.mrb[26].mxu0 %vm287_vm2, %v4201_v10 }
0x218f   :  { %10282 = vmatpush3.msra.mxu0 %v11735_v59  ;;  %10283 = vmatprep.mubr.msk.f32.mxu0 %vm11168_vm1, %v11167_v36 }
0x2190   :  { %10696 = vmatprep.subr.bf16.mxu0 %v10695_v8 }
0x2261   :  { %v4274_v24 = vpop.f32.mrb[26].mxu0 }
0x2262   :  { %v10280_v27 = vpop.f32.mrb[27].mxu0  ;;  %10284 = vmatmul.mubr.msk.f32.vlgmr.msra.gmra.mrb[24].mxu0 %vm287_vm2, %v4274_v24 }
0x2263   :  { %10698 = vmatpush3.bf16.msra.mxu0 %v10695_v8 }
0x2264   :  { %10700 = vmatprep.subr.bf16.mxu0 %v10699_v39 }
0x2267   :  { %10702 = vmatpush3.bf16.msra.mxu0 %v10699_v39 }
0x2268   :  { %10704 = vmatprep.subr.bf16.mxu0 %v10703_v13 }
0x226b   :  { %10706 = vmatpush3.bf16.msra.mxu0 %v10703_v13 }
0x2335   :  { %v4347_v23 = vpop.f32.mrb[24].mxu0 }
0x2336   :  { %4352 = vst.msk [vmem:[#allocation2 + $0x8] sm:$0xff] %vm140_vm0, %v4347_v23  ;;  %v10285_v28 = vpop.f32.mrb[25].mxu0 }
0x233d   :  { %v4354_v31 = vld [vmem:[#allocation2 + $0x8] sm:$0xff] }
0x233e   :  { %v4360_v34 = vadd.f32 %v9601_v15, %v4354_v31  ;;  %v4518_v15 = vld [vmem:[%s12418_s10 + $0x38] sm:$0xff] }
0x233f   :  { %v10707_v16 = vpack.c.bf16 %v4518_v15, %v4517_v14  ;;  %v9611_v14 = vld [vmem:[%s12422_s22] ss:$0 sm:$0xff] }
0x2340   :  { %v4362_v37 = vadd.f32 %v4360_v34, %v11584_v46 }
0x2341   :  { %10708 = vmatprep.subr.bf16.mxu0 %v10707_v16 }
0x2342   :  { %v4368_v59 = vsel %vm140_vm0, %v4362_v37, 0.0  ;;  %10710 = vmatpush3.bf16.msra.mxu0 %v10707_v16 }
0x2343   :  { %4369 = vadd.xlane.f32.xlu1 %v4368_v59  ;;  %10337 = vmatprep.subr.mxu0 %v11167_v36 }
0x2347   :  { %4378 = vadd.xlane.f32.xlu1 %v4377_v40 }
0x23d0   :  { %v4370_v42 = vpop.xlane.xlu1 %4369 }
0x23d1   :  { %v4372_v43 = vmul.f32 0.03125, %v4370_v42 }
0x23d3   :  { %v4374_v41 = vsub.f32 %v4362_v37, %v4372_v43 }
0x23d4   :  { %v4379_v44 = vpop.xlane.xlu1 %4378 }
0x23d5   :  { %v4383_v45 = vmul.f32 0.03125, %v4379_v44  ;;  %v4376_v50 = vmul.f32 %v4374_v41, %v4374_v41 }
0x23d7   :  { %v4385_v53 = vadd.f32 1e-05, %v4383_v45  ;;  %v4380_v46 = vsel %vm140_vm0, %v4376_v50, 0.0 }
0x23d8   :  { %4381 = vadd.xlane.f32.xlu1 %v4380_v46 }
0x23d9   :  { %10969 = vrsqrt.f32 %v4385_v53 }
0x23e3   :  { %v10970_v54 = vpop.eup %10969 }
0x23e4   :  { %v4389_v57 = vmul.f32 %v10970_v54, %v4373_v32 }
0x23e6   :  { %v4395_v60 = vmul.f32 %v9602_v55, %v4389_v57 }
0x23e8   :  { %v11821_v26 = vadd.f32 %v9603_v49, %v4395_v60 }
0x23ea   :  { %10294 = vmatprep.mubr.msk.f32.mxu1 %vm140_vm0, %v11821_v26 }
0x2465   :  { %v4382_v1 = vpop.xlane.xlu1 %4381 }
0x2466   :  { %v4384_v48 = vmul.f32 0.03125, %v4382_v1 }
0x2468   :  { %v4386_v2 = vadd.f32 1e-05, %v4384_v48  ;;  %v9612_v48 = vld [vmem:[%s11221_s29 + $0x20] sm:$0xff] }
0x246a   :  { %10971 = vrsqrt.f32 %v4386_v2  ;;  %v9613_v2 = vld [vmem:[%s11221_s29 + $0x28] sm:$0xff] }
0x2474   :  { %v10972_v3 = vpop.eup %10971 }
0x2475   :  { %v4390_v4 = vmul.f32 %v10972_v3, %v4374_v41  ;;  %v9607_v41 = vld [vmem:[%s12420_s26] ss:$0 sm:$0xff]  ;;  %v9614_v3 = vld [vmem:[%s11221_s29 + $0x30] sm:$0xff] }
0x2477   :  { %v4396_v58 = vmul.f32 %v9602_v55, %v4390_v4  ;;  %v10711_v4 = vpack.c.bf16 %v9613_v2, %v9612_v48 }
0x2479   :  { %v4402_v5 = vadd.f32 %v9603_v49, %v4396_v58  ;;  %v9615_v58 = vld [vmem:[%s11221_s29 + $0x38] sm:$0xff]  ;;  %10712 = vmatprep.subr.bf16.mxu1 %v10711_v4  ;;  %s12423_s29 = smov 104  }
0x247b   :  { %10295 = vmatmul.mubr.msk.f32.vlgmr.msra.gmra.mrb[50].mxu1 %vm140_vm0, %v4402_v5 }
0x247c   :  { %10714 = vmatpush3.bf16.msra.mxu1 %v10711_v4 }
0x254e   :  { %v10296_v18 = vpop.f32.mrb[50].mxu1 }
0x254f   :  { %v4490_v19 = vadd.f32 %v10296_v18, %v9604_v17  ;;  %v4484_v20 = vpop.f32.mrb[51].mxu1 }
0x2550   :  { %v4485_v21 = vadd.f32 %v9604_v17, %v4484_v20 }
0x2551   :  { %v4494_v33 = vmul.f32 %v4490_v19, %v4490_v19 }
0x2552   :  { %v4493_v22 = vmul.f32 %v4485_v21, %v4485_v21 }
0x2553   :  { %v4496_v10 = vmul.f32 %v4494_v33, %v4490_v19 }
0x2554   :  { %v4495_v24 = vmul.f32 %v4493_v22, %v4485_v21 }
0x2555   :  { %v4498_v27 = vmul.f32 0.044715, %v4496_v10 }
0x2556   :  { %v4497_v23 = vmul.f32 0.044715, %v4495_v24 }
0x2557   :  { %v4500_v28 = vadd.f32 %v4498_v27, %v4490_v19 }
0x2558   :  { %v4499_v25 = vadd.f32 %v4497_v23, %v4485_v21 }
0x2559   :  { %v4502_v30 = vmul.f32 0.7978846, %v4500_v28 }
0x255a   :  { %v4501_v31 = vmul.f32 0.7978846, %v4499_v25 }
0x255b   :  { %10973 = vtanh.f32 %v4502_v30 }
0x255c   :  { %10975 = vtanh.f32 %v4501_v31 }
0x2565   :  { %v10974_v32 = vpop.eup %10973 }
0x2566   :  { %v10976_v34 = vpop.eup %10975  ;;  %v4506_v37 = vadd.f32 1.0, %v10974_v32 }
0x2567   :  { %v4505_v59 = vadd.f32 1.0, %v10976_v34 }
0x2568   :  { %v4508_v38 = vmul.f32 0.5, %v4506_v37 }
0x2569   :  { %v4507_v40 = vmul.f32 0.5, %v4505_v59 }
0x256a   :  { %v4510_v43 = vmul.f32 %v4508_v38, %v4490_v19 }
0x256b   :  { %v4509_v42 = vmul.f32 %v4507_v40, %v4485_v21  ;;  %v9616_v21 = vld [vmem:[%s11226_s3 + $0x1] ss:$0 sm:$0xff]  ;;  %s12424_s3 = smov 48  }
0x256d   :  { %10313 = vmatprep.mubr.msk.f32.mxu0 %vm4524_vm3, %v4509_v42 }
0x256e   :  { %10314 = vmatmul.mubr.msk.f32.vlgmr.msra.gmra.mrb[28].mxu0 %vm4524_vm3, %v4510_v43 }
0x256f   :  { %10339 = vmatprep.mubr.msk.f32.mxu0 %vm11168_vm1, %v11167_v36 }
0x2641   :  { %v10315_v44 = vpop.f32.mrb[28].mxu0 }
0x2642   :  { %v4603_v45 = vadd.f32 %v10315_v44, %v9607_v41  ;;  %v4597_v50 = vpop.f32.mrb[29].mxu0 }
0x2643   :  { %v4598_v53 = vadd.f32 %v9607_v41, %v4597_v50 }
0x2644   :  { %v4607_v46 = vadd.f32 %v4603_v45, %v4402_v5  ;;  %v10715_v5 = vpack.c.bf16 %v9615_v58, %v9614_v3 }
0x2645   :  { %v4606_v54 = vadd.f32 %v4598_v53, %v11821_v26 }
0x2646   :  { %v4613_v55 = vsel %vm140_vm0, %v4607_v46, 0.0  ;;  %10716 = vmatprep.subr.bf16.mxu1 %v10715_v5 }
0x2647   :  { %4614 = vadd.xlane.f32.xlu1 %v4613_v55  ;;  %v4610_v57 = vsel %vm140_vm0, %v4606_v54, 0.0  ;;  %10718 = vmatpush3.bf16.msra.mxu1 %v10715_v5 }
0x2648   :  { %4611 = vadd.xlane.f32.xlu0 %v4610_v57  ;;  %10327 = vmatprep.subr.mxu1 %v11167_v36 }
0x26d4   :  { %v4615_v49 = vpop.xlane.xlu1 %4614 }
0x26d5   :  { %v4617_v60 = vmul.f32 0.03125, %v4615_v49  ;;  %v4612_v52 = vpop.xlane.xlu0 %4611 }
0x26d6   :  { %v4616_v62 = vmul.f32 0.03125, %v4612_v52 }
0x26d7   :  { %v4619_v29 = vsub.f32 %v4607_v46, %v4617_v60 }
0x26d8   :  { %v4618_v63 = vsub.f32 %v4606_v54, %v4616_v62 }
0x26d9   :  { %v4621_v26 = vmul.f32 %v4619_v29, %v4619_v29 }
0x26da   :  { %v4620_v0 = vmul.f32 %v4618_v63, %v4618_v63 }
0x26db   :  { %v4625_v1 = vsel %vm140_vm0, %v4621_v26, 0.0 }
0x26dc   :  { %v4622_v47 = vsel %vm140_vm0, %v4620_v0, 0.0  ;;  %v11915_v0 = vld [vmem:[%s11231_s8 + $0x28] sm:$0xff] }
0x26dd   :  { %4623 = vadd.xlane.f32.xlu1 %v4622_v47 }
0x26e1   :  { %4626 = vadd.xlane.f32.xlu1 %v4625_v1  ;;  %v11920_v1 = vld [vmem:[%s11231_s8 + $0x20] sm:$0xff] }
0x276a   :  { %v4624_v6 = vpop.xlane.xlu1 %4623 }
0x276b   :  { %v4628_v51 = vmul.f32 0.03125, %v4624_v6 }
0x276d   :  { %v4630_v8 = vadd.f32 1e-05, %v4628_v51 }
0x276e   :  { %v4627_v9 = vpop.xlane.xlu1 %4626 }
0x276f   :  { %10977 = vrsqrt.f32 %v4630_v8  ;;  %v4629_v35 = vmul.f32 0.03125, %v4627_v9 }
0x2771   :  { %v4631_v39 = vadd.f32 1e-05, %v4629_v35 }
0x2773   :  { %10979 = vrsqrt.f32 %v4631_v39 }
0x2779   :  { %v10978_v11 = vpop.eup %10977 }
0x277a   :  { %v4634_v13 = vmul.f32 %v10978_v11, %v4618_v63 }
0x277c   :  { %v4640_v15 = vmul.f32 %v9610_v12, %v4634_v13 }
0x277d   :  { %v10980_v16 = vpop.eup %10979 }
0x277e   :  { %v4635_v17 = vmul.f32 %v10980_v16, %v4619_v29  ;;  %v11857_v18 = vadd.f32 %v9611_v14, %v4640_v15  ;;  %v11948_v15 = vld [vmem:[%s11231_s8 + $0x30] sm:$0xff] }
0x2780   :  { %v4641_v19 = vmul.f32 %v9610_v12, %v4635_v17  ;;  %10324 = vmatprep.mubr.msk.f32.mxu1 %vm140_vm0, %v11857_v18 }
0x2782   :  { %v11861_v20 = vadd.f32 %v9611_v14, %v4641_v19 }
0x2784   :  { %10325 = vmatmul.mubr.msk.f32.vlgmr.msra.gmra.mrb[52].mxu1 %vm140_vm0, %v11861_v20 }
0x2785   :  { %10329 = vmatprep.mubr.msk.f32.mxu1 %vm11168_vm1, %v11167_v36 }
0x2857   :  { %v10326_v33 = vpop.f32.mrb[52].mxu1 }
0x2858   :  { %v11868_v22 = vadd.f32 %v10326_v33, %v9616_v21  ;;  %v4730_v10 = vpop.f32.mrb[53].mxu1 }
0x2859   :  { %v11870_v24 = vadd.f32 %v9616_v21, %v4730_v10 }
0x285b   :  { %4911 = vrot.lane.b32.xlu0 %v11870_v24, %s11169_s0  ;;  %4746 = vrot.lane.b32.xlu1 %v11870_v24, %s11170_s5 }
0x285f   :  { %4909 = vrot.lane.b32.xlu1 %v11870_v24, %s11171_s9 }
0x28cd   :  { %v4912_v27 = vpop.permute.xlu0 %4911  ;;  %v4747_v23 = vpop.permute.xlu1 %4746 }
0x28ce   :  { %10328 = vmatpush3.xpose.msk.msra.mxu1 %vm287_vm2, %v4747_v23  ;;  %10338 = vmatpush3.xpose.msk.msra.mxu0 %vm287_vm2, %v4912_v27 }
0x28cf   :  { %10332 = vmatprep.subr.mxu1 %v11167_v36  ;;  %10347 = vmatprep.subr.mxu0 %v11167_v36 }
0x28d1   :  { %10330 = vmatmul.mubr.msk.f32.vlgmr.msra.gmra.mrb[54].mxu1 %vm287_vm2, %v11870_v24  ;;  %v4910_v28 = vpop.permute.xlu1 %4909 }
0x28d2   :  { %10340 = vmatmul.mubr.msk.f32.vlgmr.msra.gmra.mrb[30].mxu0 %vm287_vm2, %v4910_v28  ;;  %10334 = vmatprep.mubr.msk.f32.mxu1 %vm11168_vm1, %v11167_v36 }
0x28d3   :  { %10349 = vmatprep.mubr.msk.f32.mxu0 %vm11168_vm1, %v11167_v36  ;;  %10348 = vmatpush3.msra.mxu0 %v11915_v0 }
0x28d4   :  { %10352 = vmatprep.subr.mxu0 %v11167_v36 }
0x29a4   :  { %v4818_v25 = vpop.f32.mrb[54].mxu1 }
0x29a5   :  { %v10331_v30 = vpop.f32.mrb[55].mxu1  ;;  %v4983_v31 = vpop.f32.mrb[30].mxu0  ;;  %v4822_v32 = vsel %vm287_vm2, %v4818_v25, -inf }
0x29a6   :  { %4823 = vmax.xlane.f32.xlu1 %v4822_v32  ;;  %v10341_v34 = vpop.f32.mrb[31].mxu0  ;;  %v4987_v37 = vsel %vm287_vm2, %v4983_v31, -inf }
0x29a7   :  { %4988 = vmax.xlane.f32.xlu0 %v4987_v37  ;;  %v11973_v37 = vld [vmem:[%s11231_s8 + $0x38] sm:$0xff]  ;;  %s12426_s8 = smov 72  }
0x29b7   :  { %4833 = vrot.lane.b32.xlu1 %v11870_v24, %s11172_s21 }
0x29bb   :  { %5222 = vrot.lane.b32.xlu1 %v11870_v24, %s11173_s25 }
0x29bd   :  { %4998 = vrot.lane.b32.xlu0 %v11870_v24, %s11175_s16 }
0x2a33   :  { %v4824_v59 = vpop.xlane.xlu1 %4823 }
0x2a34   :  { %v4825_v38 = vsub.f32 %v4818_v25, %v4824_v59  ;;  %v4989_v40 = vpop.xlane.xlu0 %4988 }
0x2a35   :  { %v4990_v42 = vsub.f32 %v4983_v31, %v4989_v40 }
0x2a36   :  { %v4826_v43 = vmul.f32 1.442695, %v4825_v38 }
0x2a37   :  { %v4991_v41 = vmul.f32 1.442695, %v4990_v42  ;;  %v4834_v44 = vpop.permute.xlu1 %4833 }
0x2a38   :  { %10981 = vpow2.f32 %v4826_v43  ;;  %10333 = vmatpush3.msra.mxu1 %v4834_v44  ;;  %v4999_v52 = vpop.permute.xlu0 %4998 }
0x2a39   :  { %10342 = vmatprep.subr.mxu1 %v11167_v36  ;;  %10983 = vpow2.f32 %v4991_v41 }
0x2a3b   :  { %v5223_v54 = vpop.permute.xlu1 %5222 }
0x2a42   :  { %v10982_v45 = vpop.eup %10981 }
0x2a43   :  { %v4828_v50 = vsel %vm287_vm2, %v10982_v45, 0.0  ;;  %v10984_v53 = vpop.eup %10983 }
0x2a44   :  { %4829 = vadd.xlane.f32.xlu1 %v4828_v50  ;;  %v4993_v46 = vsel %vm287_vm2, %v10984_v53, 0.0 }
0x2a48   :  { %4994 = vadd.xlane.f32.xlu1 %v4993_v46 }
0x2a59   :  { %5220 = vrot.lane.b32.xlu1 %v11870_v24, %s11174_s15 }
0x2ad1   :  { %v4830_v55 = vpop.xlane.xlu1 %4829 }
0x2ad2   :  { %10985 = vrcp.f32 %v4830_v55 }
0x2ad5   :  { %v4995_v57 = vpop.xlane.xlu1 %4994 }
0x2ad6   :  { %10987 = vrcp.f32 %v4995_v57 }
0x2ad9   :  { %v5221_v63 = vpop.permute.xlu1 %5220 }
0x2adc   :  { %v10986_v49 = vpop.eup %10985 }
0x2add   :  { %v4832_v60 = vmul.f32 %v10986_v49, %v10982_v45 }
0x2adf   :  { %10335 = vmatmul.mubr.msk.f32.vlgmr.msra.gmra.mrb[56].mxu1 %vm287_vm2, %v4832_v60 }
0x2ae0   :  { %v10988_v62 = vpop.eup %10987  ;;  %10343 = vmatpush3.msra.mxu1 %v4999_v52  ;;  %10344 = vmatprep.mubr.msk.f32.mxu1 %vm11168_vm1, %v11167_v36 }
0x2ae1   :  { %v4997_v29 = vmul.f32 %v10988_v62, %v10984_v53  ;;  %10357 = vmatprep.subr.mxu1 %v11167_v36 }
0x2ae3   :  { %10345 = vmatmul.mubr.msk.f32.vlgmr.msra.gmra.mrb[58].mxu1 %vm287_vm2, %v4997_v29 }
0x2ae4   :  { %10359 = vmatprep.mubr.msk.f32.mxu1 %vm11168_vm1, %v11167_v36 }
0x2ae7   :  { %10358 = vmatpush3.xpose.msk.msra.mxu1 %vm287_vm2, %v5223_v54 }
0x2ae8   :  { %10362 = vmatprep.subr.mxu1 %v11167_v36 }
0x2aea   :  { %10360 = vmatmul.mubr.msk.f32.vlgmr.msra.gmra.mrb[60].mxu1 %vm287_vm2, %v5221_v63 }
0x2aeb   :  { %10364 = vmatprep.mubr.msk.f32.mxu1 %vm11168_vm1, %v11167_v36 }
0x2bb2   :  { %v4905_v47 = vpop.f32.mrb[56].mxu1 }
0x2bb3   :  { %v10336_v26 = vpop.f32.mrb[57].mxu1 }
0x2bb6   :  { %v5070_v48 = vpop.f32.mrb[58].mxu1 }
0x2bb7   :  { %v10346_v2 = vpop.f32.mrb[59].mxu1  ;;  %10350 = vmatmul.mubr.msk.f32.vlgmr.msra.gmra.mrb[32].mxu0 %vm287_vm2, %v5070_v48 }
0x2bb8   :  { %10353 = vmatpush3.msra.mxu0 %v11920_v1  ;;  %10354 = vmatprep.mubr.msk.f32.mxu0 %vm11168_vm1, %v11167_v36 }
0x2bb9   :  { %10367 = vmatprep.subr.mxu0 %v11167_v36 }
0x2bbd   :  { %v5294_v3 = vpop.f32.mrb[60].mxu1 }
0x2bbe   :  { %v10361_v4 = vpop.f32.mrb[61].mxu1  ;;  %v5298_v58 = vsel %vm287_vm2, %v5294_v3, -inf }
0x2bbf   :  { %5299 = vmax.xlane.f32.xlu1 %v5298_v58  ;;  %10355 = vmatmul.mubr.msk.f32.vlgmr.msra.gmra.mrb[32].mxu0 %vm287_vm2, %v4905_v47 }
0x2bc0   :  { %10369 = vmatprep.mubr.msk.f32.mxu0 %vm11168_vm1, %v11167_v36  ;;  %10368 = vmatpush3.msra.mxu0 %v11948_v15 }
0x2bc1   :  { %10377 = vmatprep.subr.mxu0 %v11167_v36 }
0x2bd0   :  { %5461 = vrot.lane.b32.xlu1 %v11870_v24, %s12399_s18  ;;  %s12425_s18 = smov 40  }
0x2bd4   :  { %5459 = vrot.lane.b32.xlu1 %v11870_v24, %s12423_s29 }
0x2c4c   :  { %v5300_v5 = vpop.xlane.xlu1 %5299 }
0x2c4d   :  { %v5301_v6 = vsub.f32 %v5294_v3, %v5300_v5 }
0x2c4f   :  { %v5302_v51 = vmul.f32 1.442695, %v5301_v6 }
0x2c50   :  { %v5462_v12 = vpop.permute.xlu1 %5461 }
0x2c51   :  { %10989 = vpow2.f32 %v5302_v51 }
0x2c54   :  { %v5460_v14 = vpop.permute.xlu1 %5459 }
0x2c5b   :  { %v10990_v8 = vpop.eup %10989 }
0x2c5c   :  { %v5304_v9 = vsel %vm287_vm2, %v10990_v8, 0.0 }
0x2c5d   :  { %5305 = vadd.xlane.f32.xlu0 %v5304_v9 }
0x2c73   :  { %5309 = vrot.lane.b32.xlu0 %v11870_v24, %s12424_s3 }
0x2cea   :  { %v5306_v35 = vpop.xlane.xlu0 %5305 }
0x2ceb   :  { %10991 = vrcp.f32 %v5306_v35 }
0x2cee   :  { %v5310_v39 = vpop.permute.xlu0 %5309 }
0x2cef   :  { %10363 = vmatpush3.msra.mxu1 %v5310_v39 }
0x2cf0   :  { %10372 = vmatprep.subr.mxu1 %v11167_v36 }
0x2cf5   :  { %v10992_v11 = vpop.eup %10991 }
0x2cf6   :  { %v5308_v13 = vmul.f32 %v10992_v11, %v10990_v8 }
0x2cf8   :  { %10365 = vmatmul.mubr.msk.f32.vlgmr.msra.gmra.mrb[62].mxu1 %vm287_vm2, %v5308_v13 }
0x2cf9   :  { %10373 = vmatpush3.xpose.msk.msra.mxu1 %vm287_vm2, %v5462_v12  ;;  %10374 = vmatprep.mubr.msk.f32.mxu1 %vm11168_vm1, %v11167_v36 }
0x2cfa   :  { %10387 = vmatprep.subr.mxu1 %v11167_v36 }
0x2cfc   :  { %10375 = vmatmul.mubr.msk.f32.vlgmr.msra.gmra.mrb[64].mxu1 %vm287_vm2, %v5460_v14 }
0x2cfd   :  { %10389 = vmatprep.mubr.msk.f32.mxu1 %vm11168_vm1, %v11167_v36 }
0x2dcb   :  { %v5381_v16 = vpop.f32.mrb[62].mxu1 }
0x2dcc   :  { %v10366_v17 = vpop.f32.mrb[63].mxu1  ;;  %10370 = vmatmul.mubr.msk.f32.vlgmr.msra.gmra.mrb[32].mxu0 %vm287_vm2, %v5381_v16 }
0x2dcd   :  { %10379 = vmatprep.mubr.msk.f32.mxu0 %vm11168_vm1, %v11167_v36 }
0x2dcf   :  { %v5533_v19 = vpop.f32.mrb[64].mxu1 }
0x2dd0   :  { %v10376_v21 = vpop.f32.mrb[65].mxu1  ;;  %v5537_v33 = vsel %vm287_vm2, %v5533_v19, -inf }
0x2dd1   :  { %5538 = vmax.xlane.f32.xlu0 %v5537_v33 }
0x2de7   :  { %5548 = vrot.lane.b32.xlu0 %v11870_v24, %s12425_s18 }
0x2deb   :  { %5865 = vrot.lane.b32.xlu0 %v11868_v22, %s11169_s0 }
0x2e5e   :  { %v5539_v10 = vpop.xlane.xlu0 %5538 }
0x2e5f   :  { %v5540_v27 = vsub.f32 %v5533_v19, %v5539_v10 }
0x2e61   :  { %v5541_v23 = vmul.f32 1.442695, %v5540_v27 }
0x2e62   :  { %v5549_v28 = vpop.permute.xlu0 %5548 }
0x2e63   :  { %10993 = vpow2.f32 %v5541_v23  ;;  %10378 = vmatpush3.msra.mxu0 %v5549_v28 }
0x2e64   :  { %10382 = vmatprep.subr.mxu0 %v11167_v36 }
0x2e66   :  { %v5866_v43 = vpop.permute.xlu0 %5865 }
0x2e6d   :  { %v10994_v25 = vpop.eup %10993 }
0x2e6e   :  { %v5543_v30 = vsel %vm287_vm2, %v10994_v25, 0.0 }
0x2e6f   :  { %5544 = vadd.xlane.f32.xlu1 %v5543_v30 }
0x2e80   :  { %5700 = vrot.lane.b32.xlu1 %v11868_v22, %s11170_s5 }
0x2e84   :  { %5863 = vrot.lane.b32.xlu1 %v11868_v22, %s11171_s9 }
0x2efc   :  { %v5545_v24 = vpop.xlane.xlu1 %5544 }
0x2efd   :  { %10995 = vrcp.f32 %v5545_v24 }
0x2f00   :  { %v5701_v31 = vpop.permute.xlu1 %5700 }
0x2f01   :  { %10388 = vmatpush3.xpose.msk.msra.mxu1 %vm287_vm2, %v5701_v31 }
0x2f02   :  { %10392 = vmatprep.subr.mxu1 %v11167_v36 }
0x2f04   :  { %10390 = vmatmul.mubr.msk.f32.vlgmr.msra.gmra.mrb[66].mxu1 %vm287_vm2, %v11868_v22  ;;  %v5864_v44 = vpop.permute.xlu1 %5863 }
0x2f05   :  { %10394 = vmatprep.mubr.msk.f32.mxu1 %vm11168_vm1, %v11167_v36 }
0x2f07   :  { %v10996_v32 = vpop.eup %10995 }
0x2f08   :  { %v5547_v34 = vmul.f32 %v10996_v32, %v10994_v25  ;;  %v9655_v25 = vld [vmem:[%s11236_s14 + $0x1] ss:$0 sm:$0xff]  ;;  %s12428_s14 = sld [smem:[#allocation23_spill]] }
0x2f0a   :  { %10380 = vmatmul.mubr.msk.f32.vlgmr.msra.gmra.mrb[34].mxu0 %vm287_vm2, %v5547_v34 }
0x2f0b   :  { %10383 = vmatpush3.msra.mxu0 %v11973_v37  ;;  %10384 = vmatprep.mubr.msk.f32.mxu0 %vm11168_vm1, %v11167_v36 }
0x2f0c   :  { %10397 = vmatprep.subr.mxu0 %v11167_v36 }
0x2fd7   :  { %v5772_v59 = vpop.f32.mrb[66].mxu1 }
0x2fd8   :  { %v10391_v38 = vpop.f32.mrb[67].mxu1  ;;  %v5776_v40 = vsel %vm287_vm2, %v5772_v59, -inf }
0x2fd9   :  { %5777 = vmax.xlane.f32.xlu0 %v5776_v40 }
0x2fdd   :  { %v5620_v42 = vpop.f32.mrb[34].mxu0 }
0x2fde   :  { %v10381_v41 = vpop.f32.mrb[35].mxu0  ;;  %10385 = vmatmul.mubr.msk.f32.vlgmr.msra.gmra.mrb[32].mxu0 %vm287_vm2, %v5620_v42 }
0x2fdf   :  { %10398 = vmatpush3.xpose.msk.msra.mxu0 %vm287_vm2, %v5866_v43  ;;  %10399 = vmatprep.mubr.msk.f32.mxu0 %vm11168_vm1, %v11167_v36 }
0x2fe0   :  { %10407 = vmatprep.subr.mxu0 %v11167_v36 }
0x2fe2   :  { %10400 = vmatmul.mubr.msk.f32.vlgmr.msra.gmra.mrb[36].mxu0 %vm287_vm2, %v5864_v44 }
0x2fe3   :  { %10408 = vmatpush3.msra.mxu0 %v11915_v0  ;;  %10409 = vmatprep.mubr.msk.f32.mxu0 %vm11168_vm1, %v11167_v36 }
0x2fe4   :  { %10412 = vmatprep.subr.mxu0 %v11167_v36 }
0x3066   :  { %v5778_v45 = vpop.xlane.xlu0 %5777 }
0x3067   :  { %v5779_v50 = vsub.f32 %v5772_v59, %v5778_v45 }
0x3069   :  { %v5780_v53 = vmul.f32 1.442695, %v5779_v50 }
0x306b   :  { %10997 = vpow2.f32 %v5780_v53 }
0x3075   :  { %v10998_v46 = vpop.eup %10997 }
0x3076   :  { %v5782_v54 = vsel %vm287_vm2, %v10998_v46, 0.0 }
0x3077   :  { %5783 = vadd.xlane.f32.xlu0 %v5782_v54 }
0x30b1   :  { %v5693_v55 = vpop.f32.mrb[32].mxu0 }
0x30b2   :  { %5698 = vst.msk [vmem:[#allocation2] sm:$0xff] %vm140_vm0, %v5693_v55  ;;  %v10386_v57 = vpop.f32.mrb[33].mxu0 }
0x30b5   :  { %v5937_v49 = vpop.f32.mrb[36].mxu0 }
0x30b6   :  { %v10401_v60 = vpop.f32.mrb[37].mxu0  ;;  %v5941_v52 = vsel %vm287_vm2, %v5937_v49, -inf }
0x30b7   :  { %5942 = vmax.xlane.f32.xlu1 %v5941_v52 }
0x30b9   :  { %v6653_v30 = vld [vmem:[#allocation2] sm:$0xff] }
0x30ba   :  { %v6659_v32 = vadd.f32 %v9655_v25, %v6653_v30 }
0x30bc   :  { %v6661_v40 = vadd.f32 %v6659_v32, %v11857_v18 }
0x30be   :  { %v6665_v42 = vsel %vm140_vm0, %v6661_v40, 0.0 }
0x30c8   :  { %5787 = vrot.lane.b32.xlu1 %v11868_v22, %s11172_s21 }
0x30cc   :  { %6176 = vrot.lane.b32.xlu1 %v11868_v22, %s11173_s25 }
0x30d0   :  { %6174 = vrot.lane.b32.xlu1 %v11868_v22, %s11174_s15 }
0x3104   :  { %v5784_v62 = vpop.xlane.xlu0 %5783 }
0x3105   :  { %10999 = vrcp.f32 %v5784_v62 }
0x310f   :  { %v11000_v63 = vpop.eup %10999 }
0x3110   :  { %v5786_v26 = vmul.f32 %v11000_v63, %v10998_v46 }
0x3144   :  { %v5943_v29 = vpop.xlane.xlu1 %5942 }
0x3145   :  { %v5944_v0 = vsub.f32 %v5937_v49, %v5943_v29 }
0x3147   :  { %v5945_v47 = vmul.f32 1.442695, %v5944_v0 }
0x3148   :  { %v5788_v48 = vpop.permute.xlu1 %5787 }
0x3149   :  { %11001 = vpow2.f32 %v5945_v47  ;;  %10393 = vmatpush3.msra.mxu1 %v5788_v48 }
0x314a   :  { %10395 = vmatmul.mubr.msk.f32.vlgmr.msra.gmra.mrb[68].mxu1 %vm287_vm2, %v5786_v26  ;;  %10402 = vmatprep.subr.mxu1 %v11167_v36 }
0x314b   :  { %10404 = vmatprep.mubr.msk.f32.mxu1 %vm11168_vm1, %v11167_v36 }
0x314c   :  { %v6177_v6 = vpop.permute.xlu1 %6176 }
0x3150   :  { %v6175_v8 = vpop.permute.xlu1 %6174 }
0x3153   :  { %v11002_v2 = vpop.eup %11001 }
0x3154   :  { %v5947_v3 = vsel %vm287_vm2, %v11002_v2, 0.0 }
0x3155   :  { %5948 = vadd.xlane.f32.xlu0 %v5947_v3  ;;  %v9661_v3 = vld [vmem:[%s11251_s30 + $0x38] sm:$0xff] }
0x316b   :  { %5952 = vrot.lane.b32.xlu0 %v11868_v22, %s11175_s16 }
0x31e2   :  { %v5949_v4 = vpop.xlane.xlu0 %5948 }
0x31e3   :  { %11003 = vrcp.f32 %v5949_v4 }
0x31e6   :  { %v5953_v58 = vpop.permute.xlu0 %5952 }
0x31e7   :  { %10403 = vmatpush3.msra.mxu1 %v5953_v58 }
0x31e8   :  { %10417 = vmatprep.subr.mxu1 %v11167_v36 }
0x31ed   :  { %v11004_v5 = vpop.eup %11003 }
0x31ee   :  { %v5951_v51 = vmul.f32 %v11004_v5, %v11002_v2  ;;  %v9660_v2 = vld [vmem:[%s11251_s30 + $0x30] sm:$0xff] }
0x31ef   :  { %v10892_v4 = vpack.i.bf16 %v9661_v3, %v9660_v2 }
0x31f0   :  { %10405 = vmatmul.mubr.msk.f32.vlgmr.msra.gmra.mrb[70].mxu1 %vm287_vm2, %v5951_v51 }
0x31f1   :  { %10418 = vmatpush3.xpose.msk.msra.mxu1 %vm287_vm2, %v6177_v6  ;;  %10419 = vmatprep.mubr.msk.f32.mxu1 %vm11168_vm1, %v11167_v36 }
0x31f2   :  { %10422 = vmatprep.subr.mxu1 %v11167_v36 }
0x31f4   :  { %10420 = vmatmul.mubr.msk.f32.vlgmr.msra.gmra.mrb[72].mxu1 %vm287_vm2, %v6175_v8 }
0x31f5   :  { %10424 = vmatprep.mubr.msk.f32.mxu1 %vm11168_vm1, %v11167_v36 }
0x321d   :  { %v5859_v9 = vpop.f32.mrb[68].mxu1 }
0x321e   :  { %v10396_v35 = vpop.f32.mrb[69].mxu1 }
0x32c3   :  { %v6024_v39 = vpop.f32.mrb[70].mxu1 }
0x32c4   :  { %v10406_v11 = vpop.f32.mrb[71].mxu1  ;;  %10410 = vmatmul.mubr.msk.f32.vlgmr.msra.gmra.mrb[38].mxu0 %vm287_vm2, %v6024_v39  ;;  %v9658_v39 = vld [vmem:[%s11251_s30 + $0x20] sm:$0xff] }
0x32c5   :  { %10413 = vmatpush3.msra.mxu0 %v11920_v1  ;;  %10414 = vmatprep.mubr.msk.f32.mxu0 %vm11168_vm1, %v11167_v36  ;;  %v9659_v11 = vld [vmem:[%s11251_s30 + $0x28] sm:$0xff]  ;;  %s11181_s30 = smov [#allocation7]  }
0x32c6   :  { %10427 = vmatprep.subr.mxu0 %v11167_v36 }
0x32c7   :  { %v6248_v12 = vpop.f32.mrb[72].mxu1 }
0x32c8   :  { %v10421_v13 = vpop.f32.mrb[73].mxu1  ;;  %v6252_v14 = vsel %vm287_vm2, %v6248_v12, -inf }
0x32c9   :  { %6253 = vmax.xlane.f32.xlu0 %v6252_v14  ;;  %v9656_v13 = vld [vmem:[%s11241_s19 + $0x1] ss:$0 sm:$0xff]  ;;  %s9270_s19 = sld [smem:[#allocation3]] }
0x32cc   :  { %10415 = vmatmul.mubr.msk.f32.vlgmr.msra.gmra.mrb[38].mxu0 %vm287_vm2, %v5859_v9 }
0x32cd   :  { %10428 = vmatpush3.msra.mxu0 %v11948_v15  ;;  %10429 = vmatprep.mubr.msk.f32.mxu0 %vm11168_vm1, %v11167_v36 }
0x32ce   :  { %10437 = vmatprep.subr.mxu0 %v11167_v36 }
0x32df   :  { %6263 = vrot.lane.b32.xlu0 %v11868_v22, %s12424_s3 }
0x32e3   :  { %6413 = vrot.lane.b32.xlu0 %v11868_v22, %s12423_s29 }
0x3356   :  { %v6254_v1 = vpop.xlane.xlu0 %6253 }
0x3357   :  { %v6255_v16 = vsub.f32 %v6248_v12, %v6254_v1  ;;  %v9657_v1 = vld [vmem:[%s11246_s24 + $0x1] ss:$0 sm:$0xff]  ;;  %s9731_s24 = sld [smem:[#allocation3 + $0x1]] }
0x3359   :  { %v6256_v17 = vmul.f32 1.442695, %v6255_v16  ;;  %v10887_v16 = vpack.i.bf16 %v9659_v11, %v9658_v39 }
0x335a   :  { %v6264_v19 = vpop.permute.xlu0 %6263 }
0x335b   :  { %11005 = vpow2.f32 %v6256_v17  ;;  %10423 = vmatpush3.msra.mxu1 %v6264_v19 }
0x335c   :  { %10432 = vmatprep.subr.mxu1 %v11167_v36 }
0x335e   :  { %v6414_v28 = vpop.permute.xlu0 %6413 }
0x3365   :  { %v11006_v15 = vpop.eup %11005 }
0x3366   :  { %v6258_v21 = vsel %vm287_vm2, %v11006_v15, 0.0 }
0x3367   :  { %6259 = vadd.xlane.f32.xlu1 %v6258_v21  ;;  %v10723_v21 = vpack.c.bf16 %v9661_v3, %v9660_v2 }
0x3378   :  { %6415 = vrot.lane.b32.xlu1 %v11868_v22, %s12426_s8 }
0x33f4   :  { %v6260_v33 = vpop.xlane.xlu1 %6259 }
0x33f5   :  { %11007 = vrcp.f32 %v6260_v33  ;;  %v12077_v33 = vld [vmem:[%s11256_s6 + $0x1] ss:$0 sm:$0xff]  ;;  %s9481_s6 = sshll.u32 %s11181_s30, 4  ;;  %s9482_s6 = int_to_ptr.vmem [resolvable:$true] %s9481_s6 }
0x33f6   :  { %p11092_p6 = scmp.lt.s32.totalorder %s9482_s6, %s9482_s6 }
0x33f8   :  { %v6416_v23 = vpop.permute.xlu1 %6415 }
0x33ff   :  { %v11008_v10 = vpop.eup %11007 }
0x3400   :  { %v6262_v27 = vmul.f32 %v11008_v10, %v11006_v15  ;;  %v10719_v15 = vpack.c.bf16 %v9659_v11, %v9658_v39 }
0x3402   :  { %10425 = vmatmul.mubr.msk.f32.vlgmr.msra.gmra.mrb[74].mxu1 %vm287_vm2, %v6262_v27 }
0x3403   :  { %10433 = vmatpush3.xpose.msk.msra.mxu1 %vm287_vm2, %v6416_v23  ;;  %10434 = vmatprep.mubr.msk.f32.mxu1 %vm11168_vm1, %v11167_v36 }
0x3404   :  { %10720 = vmatprep.subr.bf16.mxu1 %v10719_v15 }
0x3406   :  { %10435 = vmatmul.mubr.msk.f32.vlgmr.msra.gmra.mrb[76].mxu1 %vm287_vm2, %v6414_v28 }
0x3407   :  { %10722 = vmatpush3.bf16.msra.mxu1 %v10719_v15  ;;  %v12153_v15 = vld [vmem:[%s12413_s17 + $0x20] sm:$0xff] }
0x3408   :  { %10724 = vmatprep.subr.bf16.mxu1 %v10723_v21 }
0x340b   :  { %10726 = vmatpush3.bf16.msra.mxu1 %v10723_v21 }
0x340c   :  { %10469 = vmatprep.subr.mxu1 %v11167_v36 }
0x34d5   :  { %v6335_v24 = vpop.f32.mrb[74].mxu1 }
0x34d6   :  { %v10426_v31 = vpop.f32.mrb[75].mxu1  ;;  %10430 = vmatmul.mubr.msk.f32.vlgmr.msra.gmra.mrb[38].mxu0 %vm287_vm2, %v6335_v24 }
0x34d7   :  { %10439 = vmatprep.mubr.msk.f32.mxu0 %vm11168_vm1, %v11167_v36 }
0x34d9   :  { %v6487_v34 = vpop.f32.mrb[76].mxu1 }
0x34da   :  { %v10436_v59 = vpop.f32.mrb[77].mxu1  ;;  %v6491_v38 = vsel %vm287_vm2, %v6487_v34, -inf }
0x34db   :  { %6492 = vmax.xlane.f32.xlu1 %v6491_v38 }
0x34df   :  { %6666 = vadd.xlane.f32.xlu1 %v6665_v42  ;;  %v11074_v42 = vld [vmem:[%s11201_s13 + $0x8] sm:$0xff] }
0x3568   :  { %v6493_v43 = vpop.xlane.xlu1 %6492 }
0x3569   :  { %v6494_v41 = vsub.f32 %v6487_v34, %v6493_v43 }
0x356b   :  { %v6495_v44 = vmul.f32 1.442695, %v6494_v41 }
0x356c   :  { %v6667_v52 = vpop.xlane.xlu1 %6666 }
0x356d   :  { %11009 = vpow2.f32 %v6495_v44  ;;  %v6671_v62 = vmul.f32 0.03125, %v6667_v52 }
0x3577   :  { %v11010_v45 = vpop.eup %11009 }
0x3578   :  { %v6497_v50 = vsel %vm287_vm2, %v11010_v45, 0.0 }
0x3579   :  { %6498 = vadd.xlane.f32.xlu0 %v6497_v50 }
0x358f   :  { %6502 = vrot.lane.b32.xlu0 %v11868_v22, %s12425_s18  ;;  %v11073_v22 = vld [vmem:[%s11201_s13] sm:$0xff]  ;;  %s12427_s13 = sld [smem:[#allocation22_spill]] }
0x3593   :  { %10893 = vrot.lane.b32.xlu0 %v10892_v4, %s11170_s5 }
0x3597   :  { %6811 = vrot.lane.b32.xlu0 %v12077_v33, %s11170_s5 }
0x3606   :  { %v6499_v53 = vpop.xlane.xlu0 %6498 }
0x3607   :  { %11011 = vrcp.f32 %v6499_v53 }
0x360a   :  { %v6503_v46 = vpop.permute.xlu0 %6502 }
0x360b   :  { %10438 = vmatpush3.msra.mxu0 %v6503_v46 }
0x360c   :  { %10442 = vmatprep.subr.mxu0 %v11167_v36 }
0x360e   :  { %v10894_v27 = vpop.permute.xlu0 %10893 }
0x360f   :  { %v10895_v30 = vunpack.i.l.bf16 %v10894_v27 }
0x3611   :  { %v11012_v18 = vpop.eup %11011 }
0x3612   :  { %v6501_v54 = vmul.f32 %v11012_v18, %v11010_v45  ;;  %v12092_v44 = vpop.permute.xlu0 %6811 }
0x3614   :  { %10440 = vmatmul.mubr.msk.f32.vlgmr.msra.gmra.mrb[40].mxu0 %vm287_vm2, %v6501_v54 }
0x3615   :  { %10443 = vmatpush3.msra.mxu0 %v11973_v37  ;;  %10444 = vmatprep.mubr.msk.f32.mxu0 %vm11168_vm1, %v11167_v36  ;;  %v6673_v37 = vsub.f32 %v6661_v40, %v6671_v62 }
0x3617   :  { %v6675_v26 = vmul.f32 %v6673_v37, %v6673_v37 }
0x3619   :  { %v6677_v48 = vsel %vm140_vm0, %v6675_v26, 0.0 }
0x36e7   :  { %v6574_v55 = vpop.f32.mrb[40].mxu0 }
0x36e8   :  { %v10441_v57 = vpop.f32.mrb[41].mxu0  ;;  %10445 = vmatmul.mubr.msk.f32.vlgmr.msra.gmra.mrb[38].mxu0 %vm287_vm2, %v6574_v55 }
0x36e9   :  { %10466 = vmatprep.mubr.msk.f32.mxu0 %vm140_vm0, %v11073_v22 }
0x37bb   :  { %v6647_v49 = vpop.f32.mrb[38].mxu0 }
0x37bc   :  { %6652 = vst.msk [vmem:[#allocation2 + $0x8] sm:$0xff] %vm140_vm0, %v6647_v49  ;;  %v10446_v60 = vpop.f32.mrb[39].mxu0 }
0x37c3   :  { %v6654_v29 = vld [vmem:[#allocation2 + $0x8] sm:$0xff] }
0x37c4   :  { %v6660_v63 = vadd.f32 %v9655_v25, %v6654_v29  ;;  %v10896_v25 = vunpack.i.h.bf16 %v10894_v27 }
0x37c6   :  { %v6662_v0 = vadd.f32 %v6660_v63, %v11861_v20  ;;  %v10731_v59 = vpack.c.bf16 %v10896_v25, %v10895_v30 }
0x37c8   :  { %v6668_v47 = vsel %vm140_vm0, %v6662_v0, 0.0 }
0x37c9   :  { %6669 = vadd.xlane.f32.xlu1 %v6668_v47 }
0x37cd   :  { %6678 = vadd.xlane.f32.xlu1 %v6677_v48 }
0x3856   :  { %v6670_v58 = vpop.xlane.xlu1 %6669 }
0x3857   :  { %v6672_v5 = vmul.f32 0.03125, %v6670_v58 }
0x3859   :  { %v6674_v6 = vsub.f32 %v6662_v0, %v6672_v5 }
0x385a   :  { %v6679_v20 = vpop.xlane.xlu1 %6678 }
0x385b   :  { %v6683_v51 = vmul.f32 0.03125, %v6679_v20  ;;  %v6676_v8 = vmul.f32 %v6674_v6, %v6674_v6 }
0x385d   :  { %v6685_v9 = vadd.f32 1e-05, %v6683_v51  ;;  %v6680_v35 = vsel %vm140_vm0, %v6676_v8, 0.0 }
0x385e   :  { %6681 = vadd.xlane.f32.xlu1 %v6680_v35 }
0x385f   :  { %11013 = vrsqrt.f32 %v6685_v9 }
0x3869   :  { %v11014_v12 = vpop.eup %11013 }
0x386a   :  { %v6689_v14 = vmul.f32 %v11014_v12, %v6673_v37 }
0x386c   :  { %v6695_v17 = vmul.f32 %v9656_v13, %v6689_v14 }
0x386e   :  { %v12070_v19 = vadd.f32 %v9657_v1, %v6695_v17 }
0x386f   :  { %10888 = vrot.lane.b32.xlu1 %v10887_v16, %s11170_s5 }
0x3870   :  { %10455 = vmatprep.mubr.msk.f32.mxu1 %vm140_vm0, %v12070_v19 }
0x38eb   :  { %v6682_v10 = vpop.xlane.xlu1 %6681 }
0x38ec   :  { %v6684_v23 = vmul.f32 0.03125, %v6682_v10 }
0x38ee   :  { %v6686_v28 = vadd.f32 1e-05, %v6684_v23 }
0x38ef   :  { %v10889_v24 = vpop.permute.xlu1 %10888 }
0x38f0   :  { %11015 = vrsqrt.f32 %v6686_v28  ;;  %v10891_v31 = vunpack.i.h.bf16 %v10889_v24  ;;  %v10890_v32 = vunpack.i.l.bf16 %v10889_v24 }
0x38f2   :  { %v10727_v34 = vpack.c.bf16 %v10891_v31, %v10890_v32 }
0x38f4   :  { %10728 = vmatprep.subr.bf16.mxu0 %v10727_v34 }
0x38f5   :  { %10730 = vmatpush3.bf16.msra.mxu0 %v10727_v34 }
0x38f6   :  { %10732 = vmatprep.subr.bf16.mxu0 %v10731_v59 }
0x38f9   :  { %10734 = vmatpush3.bf16.msra.mxu0 %v10731_v59 }
0x38fa   :  { %v11016_v38 = vpop.eup %11015  ;;  %10479 = vmatprep.subr.mxu0 %v11167_v36 }
0x38fb   :  { %v6690_v40 = vmul.f32 %v11016_v38, %v6674_v6 }
0x38fc   :  { %10467 = vmatmul.mubr.msk.f32.vlgmr.msra.gmra.mrb[42].mxu0 %vm140_vm0, %v11074_v42 }
0x38fd   :  { %v6696_v43 = vmul.f32 %v9656_v13, %v6690_v40  ;;  %10481 = vmatprep.mubr.msk.f32.mxu0 %vm11168_vm1, %v11167_v36 }
0x38ff   :  { %v12086_v41 = vadd.f32 %v9657_v1, %v6696_v43  ;;  %v12148_v1 = vld [vmem:[%s12413_s17 + $0x28] sm:$0xff] }
0x3901   :  { %10456 = vmatmul.mubr.msk.f32.vlgmr.msra.gmra.mrb[78].mxu1 %vm140_vm0, %v12086_v41 }
0x3902   :  { %10471 = vmatprep.mubr.msk.f32.mxu1 %vm11168_vm1, %v11167_v36 }
0x39cf   :  { %v12094_v45 = vpop.f32.mrb[42].mxu0 }
0x39d0   :  { %v6880_v50 = vpop.f32.mrb[43].mxu0 }
0x39d1   :  { %v12097_v53 = vadd.f32 %v6880_v50, %v12092_v44  ;;  %v12180_v50 = vadd.f32 %v12094_v45, %v12092_v44  ;;  %v12197_v44 = vld [vmem:[%s12413_s17 + $0x30] sm:$0xff] }
0x39d3   :  { %7060 = vrot.lane.b32.xlu0 %v12097_v53, %s11171_s9  ;;  %10470 = vmatpush3.xpose.msk.msra.mxu1 %vm287_vm2, %v12097_v53 }
0x39d4   :  { %v12103_v46 = vpop.f32.mrb[78].mxu1  ;;  %10474 = vmatprep.subr.mxu1 %v11167_v36 }
0x39d5   :  { %v6785_v18 = vpop.f32.mrb[79].mxu1 }
0x39d6   :  { %v12107_v54 = vadd.f32 %v12077_v33, %v6785_v18 }
0x39d8   :  { %7058 = vrot.lane.b32.xlu0 %v12107_v54, %s11171_s9  ;;  %10472 = vmatmul.mubr.msk.f32.vlgmr.msra.gmra.mrb[80].mxu1 %vm287_vm2, %v12107_v54 }
0x39d9   :  { %10476 = vmatprep.mubr.msk.f32.mxu1 %vm11168_vm1, %v11167_v36 }
0x3a45   :  { %v7061_v55 = vpop.permute.xlu0 %7060 }
0x3a46   :  { %10480 = vmatpush3.xpose.msk.msra.mxu0 %vm287_vm2, %v7061_v55 }
0x3a47   :  { %10489 = vmatprep.subr.mxu0 %v11167_v36 }
0x3a4a   :  { %v7059_v57 = vpop.permute.xlu0 %7058 }
0x3a4b   :  { %10482 = vmatmul.mubr.msk.f32.vlgmr.msra.gmra.mrb[44].mxu0 %vm287_vm2, %v7059_v57 }
0x3a4c   :  { %10491 = vmatprep.mubr.msk.f32.mxu0 %vm11168_vm1, %v11167_v36  ;;  %10490 = vmatpush3.msra.mxu0 %v12148_v1 }
0x3a4d   :  { %10494 = vmatprep.subr.mxu0 %v11167_v36 }
0x3aab   :  { %v6967_v22 = vpop.f32.mrb[80].mxu1 }
0x3aac   :  { %v6968_v49 = vadd.f32 %v6967_v22, %v11626_v61  ;;  %v10473_v60 = vpop.f32.mrb[81].mxu1 }
0x3aae   :  { %v6971_v52 = vsel %vm287_vm2, %v6968_v49, -inf }
0x3aaf   :  { %6972 = vmax.xlane.f32.xlu1 %v6971_v52 }
0x3ac0   :  { %7147 = vrot.lane.b32.xlu1 %v12097_v53, %s11169_s0 }
0x3b1e   :  { %v7132_v62 = vpop.f32.mrb[44].mxu0 }
0x3b1f   :  { %v7133_v29 = vadd.f32 %v7132_v62, %v11626_v61  ;;  %v10483_v37 = vpop.f32.mrb[45].mxu0 }
0x3b21   :  { %v7136_v63 = vsel %vm287_vm2, %v7133_v29, -inf }
0x3b22   :  { %7137 = vmax.xlane.f32.xlu0 %v7136_v63 }
0x3b3c   :  { %v6973_v0 = vpop.xlane.xlu1 %6972 }
0x3b3d   :  { %v6974_v47 = vsub.f32 %v6968_v49, %v6973_v0 }
0x3b3f   :  { %v6975_v26 = vmul.f32 1.442695, %v6974_v47 }
0x3b40   :  { %v7148_v35 = vpop.permute.xlu1 %7147 }
0x3b41   :  { %11017 = vpow2.f32 %v6975_v26 }
0x3b4b   :  { %v11018_v48 = vpop.eup %11017 }
0x3b4c   :  { %v6977_v2 = vsel %vm287_vm2, %v11018_v48, 0.0 }
0x3b4d   :  { %6978 = vadd.xlane.f32.xlu0 %v6977_v2  ;;  %v12219_v2 = vld [vmem:[%s12413_s17 + $0x38] sm:$0xff] }
0x3b63   :  { %6982 = vrot.lane.b32.xlu0 %v12097_v53, %s11170_s5 }
0x3b67   :  { %7369 = vrot.lane.b32.xlu0 %v12107_v54, %s11174_s15 }
0x3baf   :  { %v7138_v3 = vpop.xlane.xlu0 %7137 }
0x3bb0   :  { %v7139_v4 = vsub.f32 %v7133_v29, %v7138_v3 }
0x3bb2   :  { %v7140_v58 = vmul.f32 1.442695, %v7139_v4 }
0x3bb4   :  { %11019 = vpow2.f32 %v7140_v58 }
0x3bbe   :  { %v11020_v5 = vpop.eup %11019 }
0x3bbf   :  { %v7142_v6 = vsel %vm287_vm2, %v11020_v5, 0.0 }
0x3bc0   :  { %7143 = vadd.xlane.f32.xlu1 %v7142_v6 }
0x3bd1   :  { %7371 = vrot.lane.b32.xlu1 %v12097_v53, %s11174_s15 }
0x3bda   :  { %v6979_v20 = vpop.xlane.xlu0 %6978 }
0x3bdb   :  { %11021 = vrcp.f32 %v6979_v20 }
0x3bde   :  { %v6983_v51 = vpop.permute.xlu0 %6982 }
0x3bdf   :  { %10475 = vmatpush3.msra.mxu1 %v6983_v51 }
0x3be0   :  { %10484 = vmatprep.subr.mxu1 %v11167_v36 }
0x3be2   :  { %v7370_v14 = vpop.permute.xlu0 %7369 }
0x3be5   :  { %v11022_v8 = vpop.eup %11021 }
0x3be6   :  { %v6981_v9 = vmul.f32 %v11022_v8, %v11018_v48 }
0x3be8   :  { %10477 = vmatmul.mubr.msk.f32.vlgmr.msra.gmra.mrb[82].mxu1 %vm287_vm2, %v6981_v9 }
0x3be9   :  { %10485 = vmatpush3.msra.mxu1 %v7148_v35  ;;  %10486 = vmatprep.mubr.msk.f32.mxu1 %vm11168_vm1, %v11167_v36 }
0x3bea   :  { %10499 = vmatprep.subr.mxu1 %v11167_v36 }
0x3c4d   :  { %v7144_v39 = vpop.xlane.xlu1 %7143 }
0x3c4e   :  { %11023 = vrcp.f32 %v7144_v39 }
0x3c51   :  { %v7372_v13 = vpop.permute.xlu1 %7371 }
0x3c58   :  { %v11024_v11 = vpop.eup %11023 }
0x3c59   :  { %v7146_v12 = vmul.f32 %v11024_v11, %v11020_v5 }
0x3c5b   :  { %10487 = vmatmul.mubr.msk.f32.vlgmr.msra.gmra.mrb[84].mxu1 %vm287_vm2, %v7146_v12 }
0x3c5c   :  { %10500 = vmatpush3.xpose.msk.msra.mxu1 %vm287_vm2, %v7372_v13  ;;  %10501 = vmatprep.mubr.msk.f32.mxu1 %vm11168_vm1, %v11167_v36 }
0x3c5d   :  { %10504 = vmatprep.subr.mxu1 %v11167_v36 }
0x3c5f   :  { %10502 = vmatmul.mubr.msk.f32.vlgmr.msra.gmra.mrb[86].mxu1 %vm287_vm2, %v7370_v14 }
0x3c60   :  { %10506 = vmatprep.mubr.msk.f32.mxu1 %vm11168_vm1, %v11167_v36 }
0x3cbb   :  { %v7054_v16 = vpop.f32.mrb[82].mxu1 }
0x3cbc   :  { %v10478_v17 = vpop.f32.mrb[83].mxu1 }
0x3d2e   :  { %v7219_v21 = vpop.f32.mrb[84].mxu1 }
0x3d2f   :  { %v10488_v10 = vpop.f32.mrb[85].mxu1  ;;  %10492 = vmatmul.mubr.msk.f32.vlgmr.msra.gmra.mrb[46].mxu0 %vm287_vm2, %v7219_v21 }
0x3d30   :  { %10495 = vmatpush3.msra.mxu0 %v12153_v15  ;;  %10496 = vmatprep.mubr.msk.f32.mxu0 %vm11168_vm1, %v11167_v36 }
0x3d31   :  { %10509 = vmatprep.subr.mxu0 %v11167_v36 }
0x3d32   :  { %v7443_v27 = vpop.f32.mrb[86].mxu1 }
0x3d33   :  { %v7444_v23 = vadd.f32 %v7443_v27, %v11626_v61  ;;  %v10503_v28 = vpop.f32.mrb[87].mxu1 }
0x3d35   :  { %v7447_v25 = vsel %vm287_vm2, %v7444_v23, -inf }
0x3d36   :  { %7448 = vmax.xlane.f32.xlu1 %v7447_v25 }
0x3d37   :  { %10497 = vmatmul.mubr.msk.f32.vlgmr.msra.gmra.mrb[46].mxu0 %vm287_vm2, %v7054_v16 }
0x3d38   :  { %10511 = vmatprep.mubr.msk.f32.mxu0 %vm11168_vm1, %v11167_v36  ;;  %10510 = vmatpush3.msra.mxu0 %v12197_v44 }
0x3d39   :  { %10519 = vmatprep.subr.mxu0 %v11167_v36 }
0x3d47   :  { %7610 = vrot.lane.b32.xlu1 %v12097_v53, %s12423_s29 }
0x3d4b   :  { %7608 = vrot.lane.b32.xlu1 %v12107_v54, %s12423_s29  ;;  %v12189_v54 = vadd.f32 %v12103_v46, %v12077_v33 }
0x3dc3   :  { %v7449_v30 = vpop.xlane.xlu1 %7448 }
0x3dc4   :  { %v7450_v24 = vsub.f32 %v7444_v23, %v7449_v30 }
0x3dc6   :  { %v7451_v31 = vmul.f32 1.442695, %v7450_v24 }
0x3dc7   :  { %v7611_v42 = vpop.permute.xlu1 %7610 }
0x3dc8   :  { %11025 = vpow2.f32 %v7451_v31 }
0x3dcb   :  { %v7609_v18 = vpop.permute.xlu1 %7608 }
0x3dd2   :  { %v11026_v32 = vpop.eup %11025 }
0x3dd3   :  { %v7453_v34 = vsel %vm287_vm2, %v11026_v32, 0.0 }
0x3dd4   :  { %7454 = vadd.xlane.f32.xlu0 %v7453_v34 }
0x3dea   :  { %7458 = vrot.lane.b32.xlu0 %v12097_v53, %s11173_s25 }
0x3e61   :  { %v7455_v59 = vpop.xlane.xlu0 %7454 }
0x3e62   :  { %11027 = vrcp.f32 %v7455_v59 }
0x3e65   :  { %v7459_v38 = vpop.permute.xlu0 %7458 }
0x3e66   :  { %10505 = vmatpush3.msra.mxu1 %v7459_v38 }
0x3e67   :  { %10514 = vmatprep.subr.mxu1 %v11167_v36 }
0x3e6c   :  { %v11028_v40 = vpop.eup %11027 }
0x3e6d   :  { %v7457_v43 = vmul.f32 %v11028_v40, %v11026_v32 }
0x3e6f   :  { %10507 = vmatmul.mubr.msk.f32.vlgmr.msra.gmra.mrb[88].mxu1 %vm287_vm2, %v7457_v43 }
0x3e70   :  { %10515 = vmatpush3.xpose.msk.msra.mxu1 %vm287_vm2, %v7611_v42  ;;  %10516 = vmatprep.mubr.msk.f32.mxu1 %vm11168_vm1, %v11167_v36 }
0x3e71   :  { %10529 = vmatprep.subr.mxu1 %v11167_v36 }
0x3e73   :  { %10517 = vmatmul.mubr.msk.f32.vlgmr.msra.gmra.mrb[90].mxu1 %vm287_vm2, %v7609_v18 }
0x3e74   :  { %10530 = vmatpush3.xpose.msk.msra.mxu1 %vm287_vm2, %v12180_v50  ;;  %10531 = vmatprep.mubr.msk.f32.mxu1 %vm11168_vm1, %v11167_v36 }
0x3e75   :  { %10534 = vmatprep.subr.mxu1 %v11167_v36 }
0x3e77   :  { %10532 = vmatmul.mubr.msk.f32.vlgmr.msra.gmra.mrb[92].mxu1 %vm287_vm2, %v12189_v54 }
0x3e78   :  { %10536 = vmatprep.mubr.msk.f32.mxu1 %vm11168_vm1, %v11167_v36 }
0x3f42   :  { %v7530_v45 = vpop.f32.mrb[88].mxu1 }
0x3f43   :  { %v10508_v55 = vpop.f32.mrb[89].mxu1  ;;  %10512 = vmatmul.mubr.msk.f32.vlgmr.msra.gmra.mrb[46].mxu0 %vm287_vm2, %v7530_v45 }
0x3f44   :  { %10521 = vmatprep.mubr.msk.f32.mxu0 %vm11168_vm1, %v11167_v36 }
0x3f46   :  { %v7682_v33 = vpop.f32.mrb[90].mxu1 }
0x3f47   :  { %v7683_v46 = vadd.f32 %v7682_v33, %v11626_v61  ;;  %v10518_v57 = vpop.f32.mrb[91].mxu1 }
0x3f49   :  { %v7686_v22 = vsel %vm287_vm2, %v7683_v46, -inf }
0x3f4a   :  { %7687 = vmax.xlane.f32.xlu0 %v7686_v22  ;;  %v7920_v49 = vpop.f32.mrb[92].mxu1 }
0x3f4b   :  { %v10533_v60 = vpop.f32.mrb[93].mxu1 }
0x3f60   :  { %7697 = vrot.lane.b32.xlu0 %v12097_v53, %s12426_s8  ;;  %v7921_v53 = vadd.f32 %v7920_v49, %v11724_v7 }
0x3f62   :  { %v7924_v0 = vsel %vm287_vm2, %v7921_v53, -inf }
0x3f64   :  { %8011 = vrot.lane.b32.xlu0 %v12189_v54, %s11171_s9 }
0x3fd7   :  { %v7688_v52 = vpop.xlane.xlu0 %7687 }
0x3fd8   :  { %v7689_v62 = vsub.f32 %v7683_v46, %v7688_v52 }
0x3fda   :  { %v7690_v29 = vmul.f32 1.442695, %v7689_v62 }
0x3fdb   :  { %v7698_v37 = vpop.permute.xlu0 %7697 }
0x3fdc   :  { %11029 = vpow2.f32 %v7690_v29  ;;  %10520 = vmatpush3.msra.mxu0 %v7698_v37 }
0x3fdd   :  { %10524 = vmatprep.subr.mxu0 %v11167_v36 }
0x3fdf   :  { %v8012_v5 = vpop.permute.xlu0 %8011 }
0x3fe6   :  { %v11030_v61 = vpop.eup %11029 }
0x3fe7   :  { %v7692_v63 = vsel %vm287_vm2, %v11030_v61, 0.0 }
0x3fe8   :  { %7693 = vadd.xlane.f32.xlu1 %v7692_v63 }
0x3ff9   :  { %8013 = vrot.lane.b32.xlu1 %v12180_v50, %s11171_s9 }
0x401d   :  { %7925 = vmax.xlane.f32.xlu1 %v7924_v0 }
0x402e   :  { %8100 = vrot.lane.b32.xlu1 %v12180_v50, %s11169_s0 }
0x4075   :  { %v7694_v47 = vpop.xlane.xlu1 %7693 }
0x4076   :  { %11031 = vrcp.f32 %v7694_v47 }
0x4079   :  { %v8014_v4 = vpop.permute.xlu1 %8013 }
0x4080   :  { %v11032_v26 = vpop.eup %11031 }
0x4081   :  { %v7696_v48 = vmul.f32 %v11032_v26, %v11030_v61 }
0x4083   :  { %10522 = vmatmul.mubr.msk.f32.vlgmr.msra.gmra.mrb[48].mxu0 %vm287_vm2, %v7696_v48 }
0x4084   :  { %10525 = vmatpush3.msra.mxu0 %v12219_v2  ;;  %10526 = vmatprep.mubr.msk.f32.mxu0 %vm11168_vm1, %v11167_v36 }
0x4085   :  { %10539 = vmatprep.subr.mxu0 %v11167_v36 }
0x40aa   :  { %v7926_v6 = vpop.xlane.xlu1 %7925 }
0x40ab   :  { %v7927_v20 = vsub.f32 %v7921_v53, %v7926_v6 }
0x40ad   :  { %v7928_v51 = vmul.f32 1.442695, %v7927_v20 }
0x40ae   :  { %v8101_v30 = vpop.permute.xlu1 %8100 }
0x40af   :  { %11033 = vpow2.f32 %v7928_v51 }
0x40b9   :  { %v11034_v13 = vpop.eup %11033 }
0x40ba   :  { %v7930_v14 = vsel %vm287_vm2, %v11034_v13, 0.0 }
0x4156   :  { %v7769_v3 = vpop.f32.mrb[48].mxu0 }
0x4157   :  { %v10523_v58 = vpop.f32.mrb[49].mxu0  ;;  %10527 = vmatmul.mubr.msk.f32.vlgmr.msra.gmra.mrb[46].mxu0 %vm287_vm2, %v7769_v3 }
0x4158   :  { %10540 = vmatpush3.xpose.msk.msra.mxu0 %vm287_vm2, %v8014_v4  ;;  %10541 = vmatprep.mubr.msk.f32.mxu0 %vm11168_vm1, %v11167_v36  ;;  %v9703_v58 = vld [vmem:[%s12414_s28 + $0x1] ss:$0 sm:$0xff] }
0x4159   :  { %10549 = vmatprep.subr.mxu0 %v11167_v36 }
0x415b   :  { %10542 = vmatmul.mubr.msk.f32.vlgmr.msra.gmra.mrb[50].mxu0 %vm287_vm2, %v8012_v5 }
0x415c   :  { %10550 = vmatpush3.msra.mxu0 %v12148_v1  ;;  %10551 = vmatprep.mubr.msk.f32.mxu0 %vm11168_vm1, %v11167_v36 }
0x415d   :  { %10554 = vmatprep.subr.mxu0 %v11167_v36 }
0x422a   :  { %v7842_v8 = vpop.f32.mrb[46].mxu0 }
0x422b   :  { %7847 = vst.msk [vmem:[#allocation2] sm:$0xff] %vm140_vm0, %v7842_v8  ;;  %v10528_v9 = vpop.f32.mrb[47].mxu0 }
0x422e   :  { %v8085_v35 = vpop.f32.mrb[50].mxu0 }
0x422f   :  { %v8086_v39 = vadd.f32 %v8085_v35, %v11724_v7  ;;  %v10543_v11 = vpop.f32.mrb[51].mxu0 }
0x4231   :  { %v8089_v12 = vsel %vm287_vm2, %v8086_v39, -inf }
0x4232   :  { %8090 = vmax.xlane.f32.xlu0 %v8089_v12  ;;  %v8801_v5 = vld [vmem:[#allocation2] sm:$0xff] }
0x4233   :  { %v8807_v6 = vadd.f32 %v9703_v58, %v8801_v5 }
0x4235   :  { %v8809_v51 = vadd.f32 %v8807_v6, %v12070_v19 }
0x4236   :  { %7931 = vadd.xlane.f32.xlu0 %v7930_v14 }
0x4237   :  { %v8813_v8 = vsel %vm140_vm0, %v8809_v51, 0.0 }
0x424c   :  { %7935 = vrot.lane.b32.xlu0 %v12180_v50, %s11170_s5 }
0x4250   :  { %8322 = vrot.lane.b32.xlu0 %v12189_v54, %s11174_s15 }
0x42bf   :  { %v8091_v1 = vpop.xlane.xlu0 %8090 }
0x42c0   :  { %v8092_v16 = vsub.f32 %v8086_v39, %v8091_v1 }
0x42c2   :  { %v8093_v17 = vmul.f32 1.442695, %v8092_v16 }
0x42c3   :  { %v7932_v21 = vpop.xlane.xlu0 %7931 }
0x42c4   :  { %11035 = vpow2.f32 %v8093_v17 }
0x42c5   :  { %11037 = vrcp.f32 %v7932_v21 }
0x42c7   :  { %v7936_v10 = vpop.permute.xlu0 %7935 }
0x42c8   :  { %10535 = vmatpush3.msra.mxu1 %v7936_v10 }
0x42c9   :  { %10544 = vmatprep.subr.mxu1 %v11167_v36 }
0x42cb   :  { %v8323_v59 = vpop.permute.xlu0 %8322 }
0x42ce   :  { %v11036_v27 = vpop.eup %11035 }
0x42cf   :  { %v11038_v23 = vpop.eup %11037  ;;  %v8095_v28 = vsel %vm287_vm2, %v11036_v27, 0.0 }
0x42d0   :  { %v7934_v25 = vmul.f32 %v11038_v23, %v11034_v13  ;;  %8096 = vadd.xlane.f32.xlu1 %v8095_v28 }
0x42d2   :  { %10537 = vmatmul.mubr.msk.f32.vlgmr.msra.gmra.mrb[94].mxu1 %vm287_vm2, %v7934_v25 }
0x42d3   :  { %10545 = vmatpush3.msra.mxu1 %v8101_v30  ;;  %10546 = vmatprep.mubr.msk.f32.mxu1 %vm11168_vm1, %v11167_v36 }
0x42d4   :  { %10559 = vmatprep.subr.mxu1 %v11167_v36 }
0x42e1   :  { %8324 = vrot.lane.b32.xlu1 %v12180_v50, %s11174_s15 }
0x435d   :  { %v8097_v24 = vpop.xlane.xlu1 %8096 }
0x435e   :  { %11039 = vrcp.f32 %v8097_v24 }
0x4361   :  { %v8325_v34 = vpop.permute.xlu1 %8324 }
0x4368   :  { %v11040_v31 = vpop.eup %11039 }
0x4369   :  { %v8099_v32 = vmul.f32 %v11040_v31, %v11036_v27 }
0x436b   :  { %10547 = vmatmul.mubr.msk.f32.vlgmr.msra.gmra.mrb[96].mxu1 %vm287_vm2, %v8099_v32 }
0x436c   :  { %10560 = vmatpush3.xpose.msk.msra.mxu1 %vm287_vm2, %v8325_v34  ;;  %10561 = vmatprep.mubr.msk.f32.mxu1 %vm11168_vm1, %v11167_v36 }
0x436d   :  { %10564 = vmatprep.subr.mxu1 %v11167_v36 }
0x436f   :  { %10562 = vmatmul.mubr.msk.f32.vlgmr.msra.gmra.mrb[98].mxu1 %vm287_vm2, %v8323_v59  ;;  %v9704_v59 = vld [vmem:[%s12415_s1 + $0x1] ss:$0 sm:$0xff] }
0x4370   :  { %10566 = vmatprep.mubr.msk.f32.mxu1 %vm11168_vm1, %v11167_v36 }
0x43a5   :  { %v8007_v38 = vpop.f32.mrb[94].mxu1 }
0x43a6   :  { %v10538_v40 = vpop.f32.mrb[95].mxu1 }
0x43a7   :  { %v9705_v40 = vld [vmem:[%s12416_s2 + $0x1] ss:$0 sm:$0xff] }
0x443e   :  { %v8172_v42 = vpop.f32.mrb[96].mxu1 }
0x443f   :  { %v10548_v43 = vpop.f32.mrb[97].mxu1  ;;  %10552 = vmatmul.mubr.msk.f32.vlgmr.msra.gmra.mrb[52].mxu0 %vm287_vm2, %v8172_v42 }
0x4440   :  { %10555 = vmatpush3.msra.mxu0 %v12153_v15  ;;  %10556 = vmatprep.mubr.msk.f32.mxu0 %vm11168_vm1, %v11167_v36 }
0x4441   :  { %10569 = vmatprep.subr.mxu0 %v11167_v36 }
0x4442   :  { %v8396_v18 = vpop.f32.mrb[98].mxu1 }
0x4443   :  { %v8397_v45 = vadd.f32 %v8396_v18, %v11724_v7  ;;  %v10563_v55 = vpop.f32.mrb[99].mxu1  ;;  %v9706_v18 = vld [vmem:[%s12417_s7 + $0x20] sm:$0xff] }
0x4445   :  { %v8400_v33 = vsel %vm287_vm2, %v8397_v45, -inf }
0x4446   :  { %8401 = vmax.xlane.f32.xlu1 %v8400_v33  ;;  %v9708_v33 = vld [vmem:[%s12417_s7 + $0x30] sm:$0xff] }
0x4447   :  { %10557 = vmatmul.mubr.msk.f32.vlgmr.msra.gmra.mrb[52].mxu0 %vm287_vm2, %v8007_v38 }
0x4448   :  { %10570 = vmatpush3.msra.mxu0 %v12197_v44  ;;  %10571 = vmatprep.mubr.msk.f32.mxu0 %vm11168_vm1, %v11167_v36 }
0x4449   :  { %10579 = vmatprep.subr.mxu0 %v11167_v36 }
0x4457   :  { %8563 = vrot.lane.b32.xlu1 %v12180_v50, %s12423_s29 }
0x445b   :  { %8561 = vrot.lane.b32.xlu1 %v12189_v54, %s12423_s29 }
0x44d3   :  { %v8402_v15 = vpop.xlane.xlu1 %8401 }
0x44d4   :  { %v8403_v46 = vsub.f32 %v8397_v45, %v8402_v15  ;;  %v9707_v45 = vld [vmem:[%s12417_s7 + $0x28] sm:$0xff]  ;;  %v9709_v15 = vld [vmem:[%s12417_s7 + $0x38] sm:$0xff] }
0x44d5   :  { %v10735_v55 = vpack.c.bf16 %v9707_v45, %v9706_v18 }
0x44d6   :  { %v8404_v57 = vmul.f32 1.442695, %v8403_v46  ;;  %v10739_v46 = vpack.c.bf16 %v9709_v15, %v9708_v33 }
0x44d7   :  { %v8564_v62 = vpop.permute.xlu1 %8563 }
0x44d8   :  { %11041 = vpow2.f32 %v8404_v57 }
0x44db   :  { %v8562_v29 = vpop.permute.xlu1 %8561 }
0x44e2   :  { %v11042_v22 = vpop.eup %11041 }
0x44e3   :  { %v8406_v49 = vsel %vm287_vm2, %v11042_v22, 0.0 }
0x44e4   :  { %8407 = vadd.xlane.f32.xlu0 %v8406_v49 }
0x44fa   :  { %8411 = vrot.lane.b32.xlu0 %v12180_v50, %s11173_s25 }
0x4571   :  { %v8408_v44 = vpop.xlane.xlu0 %8407 }
0x4572   :  { %11043 = vrcp.f32 %v8408_v44 }
0x4575   :  { %v8412_v60 = vpop.permute.xlu0 %8411 }
0x4576   :  { %10565 = vmatpush3.msra.mxu1 %v8412_v60 }
0x4577   :  { %10574 = vmatprep.subr.mxu1 %v11167_v36 }
0x457c   :  { %v11044_v52 = vpop.eup %11043 }
0x457d   :  { %v8410_v54 = vmul.f32 %v11044_v52, %v11042_v22 }
0x457f   :  { %10567 = vmatmul.mubr.msk.f32.vlgmr.msra.gmra.mrb[100].mxu1 %vm287_vm2, %v8410_v54  ;;  %v9713_v54 = vld [vmem:[%s12418_s10 + $0x40] sm:$0xff] }
0x4580   :  { %10575 = vmatpush3.xpose.msk.msra.mxu1 %vm287_vm2, %v8564_v62  ;;  %10576 = vmatprep.mubr.msk.f32.mxu1 %vm11168_vm1, %v11167_v36 }
0x4581   :  { %10736 = vmatprep.subr.bf16.mxu1 %v10735_v55 }
0x4583   :  { %10577 = vmatmul.mubr.msk.f32.vlgmr.msra.gmra.mrb[102].mxu1 %vm287_vm2, %v8562_v29  ;;  %v9714_v29 = vld [vmem:[%s12418_s10 + $0x48] sm:$0xff] }
0x4584   :  { %10738 = vmatpush3.bf16.msra.mxu1 %v10735_v55 }
0x4585   :  { %10740 = vmatprep.subr.bf16.mxu1 %v10739_v46 }
0x4588   :  { %10742 = vmatpush3.bf16.msra.mxu1 %v10739_v46  ;;  %v9097_v46 = vld [vmem:[%s12427_s13] sm:$0xff] }
0x4652   :  { %v8483_v37 = vpop.f32.mrb[100].mxu1 }
0x4653   :  { %v10568_v61 = vpop.f32.mrb[101].mxu1  ;;  %10572 = vmatmul.mubr.msk.f32.vlgmr.msra.gmra.mrb[52].mxu0 %vm287_vm2, %v8483_v37  ;;  %v10743_v37 = vpack.c.bf16 %v9714_v29, %v9713_v54 }
0x4654   :  { %10581 = vmatprep.mubr.msk.f32.mxu0 %vm11168_vm1, %v11167_v36  ;;  %v9715_v61 = vld [vmem:[%s12418_s10 + $0x50] sm:$0xff] }
0x4656   :  { %v8635_v63 = vpop.f32.mrb[102].mxu1 }
0x4657   :  { %v8636_v53 = vadd.f32 %v8635_v63, %v11724_v7  ;;  %v10578_v0 = vpop.f32.mrb[103].mxu1  ;;  %v9716_v63 = vld [vmem:[%s12418_s10 + $0x58] sm:$0xff] }
0x4658   :  { %v9717_v0 = vld [vmem:[%s12418_s10 + $0x60] sm:$0xff] }
0x4659   :  { %v8639_v47 = vsel %vm287_vm2, %v8636_v53, -inf }
0x465a   :  { %8640 = vmax.xlane.f32.xlu0 %v8639_v47  ;;  %v9718_v47 = vld [vmem:[%s12418_s10 + $0x68] sm:$0xff] }
0x4670   :  { %8650 = vrot.lane.b32.xlu0 %v12180_v50, %s12426_s8 }
0x46e7   :  { %v8641_v26 = vpop.xlane.xlu0 %8640 }
0x46e8   :  { %v8642_v48 = vsub.f32 %v8636_v53, %v8641_v26  ;;  %v10747_v53 = vpack.c.bf16 %v9716_v63, %v9715_v61  ;;  %v10751_v26 = vpack.c.bf16 %v9718_v47, %v9717_v0  ;;  %v9724_v0 = vld [vmem:[%s12421_s23 + $0x1] ss:$0 sm:$0xff] }
0x46ea   :  { %v8643_v3 = vmul.f32 1.442695, %v8642_v48  ;;  %v9719_v48 = vld [vmem:[%s12418_s10 + $0x70] sm:$0xff] }
0x46eb   :  { %v8651_v4 = vpop.permute.xlu0 %8650 }
0x46ec   :  { %11045 = vpow2.f32 %v8643_v3  ;;  %10580 = vmatpush3.msra.mxu0 %v8651_v4  ;;  %v9720_v3 = vld [vmem:[%s12418_s10 + $0x78] sm:$0xff] }
0x46ed   :  { %10584 = vmatprep.subr.mxu0 %v11167_v36  ;;  %v10755_v4 = vpack.c.bf16 %v9720_v3, %v9719_v48 }
0x46f6   :  { %v11046_v20 = vpop.eup %11045 }
0x46f7   :  { %v8645_v7 = vsel %vm287_vm2, %v11046_v20, 0.0 }
0x46f8   :  { %8646 = vadd.xlane.f32.xlu1 %v8645_v7 }
0x46fc   :  { %8814 = vadd.xlane.f32.xlu1 %v8813_v8 }
0x4785   :  { %v8647_v50 = vpop.xlane.xlu1 %8646 }
0x4786   :  { %11047 = vrcp.f32 %v8647_v50 }
0x4789   :  { %v8815_v13 = vpop.xlane.xlu1 %8814 }
0x478a   :  { %v8819_v14 = vmul.f32 0.03125, %v8815_v13 }
0x478c   :  { %v8821_v16 = vsub.f32 %v8809_v51, %v8819_v14 }
0x478e   :  { %v8823_v10 = vmul.f32 %v8821_v16, %v8821_v16 }
0x4790   :  { %v11048_v9 = vpop.eup %11047  ;;  %v8825_v27 = vsel %vm140_vm0, %v8823_v10, 0.0 }
0x4791   :  { %v8649_v35 = vmul.f32 %v11048_v9, %v11046_v20 }
0x4793   :  { %10582 = vmatmul.mubr.msk.f32.vlgmr.msra.gmra.mrb[54].mxu0 %vm287_vm2, %v8649_v35 }
0x4794   :  { %10585 = vmatpush3.msra.mxu0 %v12219_v2  ;;  %10586 = vmatprep.mubr.msk.f32.mxu0 %vm11168_vm1, %v11167_v36 }
0x4795   :  { %10744 = vmatprep.subr.bf16.mxu0 %v10743_v37 }
0x4866   :  { %v8722_v39 = vpop.f32.mrb[54].mxu0 }
0x4867   :  { %v10583_v11 = vpop.f32.mrb[55].mxu0  ;;  %10587 = vmatmul.mubr.msk.f32.vlgmr.msra.gmra.mrb[52].mxu0 %vm287_vm2, %v8722_v39 }
0x4868   :  { %10746 = vmatpush3.bf16.msra.mxu0 %v10743_v37 }
0x4869   :  { %10748 = vmatprep.subr.bf16.mxu0 %v10747_v53 }
0x486c   :  { %10750 = vmatpush3.bf16.msra.mxu0 %v10747_v53 }
0x486d   :  { %10752 = vmatprep.subr.bf16.mxu0 %v10751_v26 }
0x4870   :  { %10754 = vmatpush3.bf16.msra.mxu0 %v10751_v26  ;;  %v9725_v26 = vld [vmem:[%s12422_s22 + $0x1] ss:$0 sm:$0xff] }
0x4871   :  { %10756 = vmatprep.subr.bf16.mxu0 %v10755_v4 }
0x4874   :  { %10758 = vmatpush3.bf16.msra.mxu0 %v10755_v4 }
0x493a   :  { %v8795_v19 = vpop.f32.mrb[52].mxu0 }
0x493b   :  { %8800 = vst.msk [vmem:[#allocation2 + $0x8] sm:$0xff] %vm140_vm0, %v8795_v19  ;;  %v10588_v12 = vpop.f32.mrb[53].mxu0 }
0x4942   :  { %v8802_v1 = vld [vmem:[#allocation2 + $0x8] sm:$0xff] }
0x4943   :  { %v8808_v17 = vadd.f32 %v9703_v58, %v8802_v1  ;;  %v9710_v58 = vld [vmem:[%s12419_s11 + $0x1] ss:$0 sm:$0xff] }
0x4945   :  { %v8810_v21 = vadd.f32 %v8808_v17, %v12086_v41 }
0x4947   :  { %v8816_v2 = vsel %vm140_vm0, %v8810_v21, 0.0 }
0x4948   :  { %8817 = vadd.xlane.f32.xlu1 %v8816_v2 }
0x494c   :  { %8826 = vadd.xlane.f32.xlu1 %v8825_v27 }
0x49d5   :  { %v8818_v23 = vpop.xlane.xlu1 %8817 }
0x49d6   :  { %v8820_v28 = vmul.f32 0.03125, %v8818_v23  ;;  %v9721_v23 = vld [vmem:[%s12420_s26 + $0x1] ss:$0 sm:$0xff] }
0x49d8   :  { %v8822_v25 = vsub.f32 %v8810_v21, %v8820_v28 }
0x49d9   :  { %v8827_v30 = vpop.xlane.xlu1 %8826 }
0x49da   :  { %v8831_v24 = vmul.f32 0.03125, %v8827_v30  ;;  %v8824_v31 = vmul.f32 %v8822_v25, %v8822_v25 }
0x49dc   :  { %v8833_v32 = vadd.f32 1e-05, %v8831_v24  ;;  %v8828_v41 = vsel %vm140_vm0, %v8824_v31, 0.0 }
0x49dd   :  { %8829 = vadd.xlane.f32.xlu1 %v8828_v41 }
0x49de   :  { %11049 = vrsqrt.f32 %v8833_v32 }
0x49e8   :  { %v11050_v34 = vpop.eup %11049 }
0x49e9   :  { %v8837_v38 = vmul.f32 %v11050_v34, %v8821_v16 }
0x49eb   :  { %v8843_v42 = vmul.f32 %v9704_v59, %v8837_v38 }
0x49ed   :  { %v12309_v43 = vadd.f32 %v9705_v40, %v8843_v42 }
0x49ef   :  { %10597 = vmatprep.mubr.msk.f32.mxu1 %vm140_vm0, %v12309_v43 }
0x4a6a   :  { %v8830_v57 = vpop.xlane.xlu1 %8829 }
0x4a6b   :  { %v8832_v22 = vmul.f32 0.03125, %v8830_v57  ;;  %v9098_v57 = vld [vmem:[%s12427_s13 + $0x8] sm:$0xff] }
0x4a6d   :  { %v8834_v49 = vadd.f32 1e-05, %v8832_v22  ;;  %v10760_v22 = vpack.c.bf16 %v9098_v57, %v9097_v46 }
0x4a6f   :  { %11051 = vrsqrt.f32 %v8834_v49  ;;  %v11180_v49 = vmov 0.0|0.0  }
0x4a70   :  { %10759 = vmatprep.subr.bf16.mxu1 %v11180_v49  ;;  %10771 = vmatprep.subr.bf16.mxu0 %v11180_v49 }
0x4a79   :  { %v11052_v44 = vpop.eup %11051 }
0x4a7a   :  { %v8838_v60 = vmul.f32 %v11052_v44, %v8822_v25  ;;  %v9099_v44 = vld [vmem:[%s12427_s13 + $0x10] sm:$0xff] }
0x4a7c   :  { %v8844_v52 = vmul.f32 %v9704_v59, %v8838_v60  ;;  %v9100_v60 = vld [vmem:[%s12427_s13 + $0x18] sm:$0xff] }
0x4a7e   :  { %v8850_v62 = vadd.f32 %v9705_v40, %v8844_v52  ;;  %v10763_v52 = vpack.c.bf16 %v9100_v60, %v9099_v44 }
0x4a80   :  { %10598 = vmatmul.mubr.msk.f32.vlgmr.msra.gmra.mrb[104].mxu1 %vm140_vm0, %v8850_v62 }
0x4a81   :  { %10627 = vmatprep.mubr.msk.f32.mxu1 %vm11168_vm1, %v11167_v36  ;;  %10761 = vmatpush3.bf16.msra.mxu1 %v10760_v22 }
0x4a82   :  { %10762 = vmatprep.subr.bf16.mxu1 %v11180_v49 }
0x4a85   :  { %10764 = vmatpush3.bf16.msra.mxu1 %v10763_v52 }
0x4a86   :  { %10765 = vmatprep.subr.bf16.mxu1 %v11180_v49 }
0x4b53   :  { %v10599_v5 = vpop.f32.mrb[104].mxu1 }
0x4b54   :  { %v8939_v6 = vadd.f32 %v10599_v5, %v9710_v58  ;;  %v8933_v20 = vpop.f32.mrb[105].mxu1 }
0x4b55   :  { %v8934_v7 = vadd.f32 %v9710_v58, %v8933_v20 }
0x4b56   :  { %v8943_v51 = vmul.f32 %v8939_v6, %v8939_v6 }
0x4b57   :  { %v8942_v8 = vmul.f32 %v8934_v7, %v8934_v7 }
0x4b58   :  { %v8945_v50 = vmul.f32 %v8943_v51, %v8939_v6  ;;  %v9177_v51 = vld [vmem:[%s11321_s12] sm:$0xff] }
0x4b59   :  { %v8944_v9 = vmul.f32 %v8942_v8, %v8934_v7  ;;  %v9178_v8 = vld [vmem:[%s11321_s12 + $0x8] sm:$0xff] }
0x4b5a   :  { %v8947_v35 = vmul.f32 0.044715, %v8945_v50  ;;  %v10766_v50 = vpack.c.bf16 %v9178_v8, %v9177_v51 }
0x4b5b   :  { %v8946_v39 = vmul.f32 0.044715, %v8944_v9  ;;  %v9179_v9 = vld [vmem:[%s11321_s12 + $0x10] sm:$0xff] }
0x4b5c   :  { %v8949_v11 = vadd.f32 %v8947_v35, %v8939_v6  ;;  %v9180_v35 = vld [vmem:[%s11321_s12 + $0x18] sm:$0xff]  ;;  %s11087_s12 = scalar_lea.vmem %s9482_s6, 32 }
0x4b5d   :  { %v8948_v19 = vadd.f32 %v8946_v39, %v8934_v7  ;;  %v10769_v39 = vpack.c.bf16 %v9180_v35, %v9179_v9  ;;  %p11088_p5 = scmp.ne.s32.totalorder %s9482_s6, %s11087_s12  ;;  %p11093_p7 = scmp.lt.s32.totalorder %s11087_s12, %s11087_s12 }
0x4b5e   :  { %v8951_v12 = vmul.f32 0.7978846, %v8949_v11  ;;  %v9101_v11 = vld [vmem:[%s12428_s14] sm:$0x1] }
0x4b5f   :  { %v8950_v13 = vmul.f32 0.7978846, %v8948_v19  ;;  %p11094_p8 = por %p11093_p7, %p11092_p6 }
0x4b60   :  { %11053 = vtanh.f32 %v8951_v12 }
0x4b61   :  { %11055 = vtanh.f32 %v8950_v13  ;;  %p11095_p9 = pnand %p11094_p8, %p11088_p5 }
0x4b6a   :  { %v11054_v14 = vpop.eup %11053 }
0x4b6b   :  { %v11056_v1 = vpop.eup %11055  ;;  %v8955_v16 = vadd.f32 1.0, %v11054_v14  ;;  %v9285_v14 = vld [vmem:[%s12428_s14] sm:$0x1] }
0x4b6c   :  { %v8954_v17 = vadd.f32 1.0, %v11056_v1 }
0x4b6d   :  { %v8957_v21 = vmul.f32 0.5, %v8955_v16 }
0x4b6e   :  { %v8956_v2 = vmul.f32 0.5, %v8954_v17 }
0x4b6f   :  { %v8959_v27 = vmul.f32 %v8957_v21, %v8939_v6 }
0x4b70   :  { %v8958_v10 = vmul.f32 %v8956_v2, %v8934_v7 }
0x4b72   :  { %10616 = vmatprep.mubr.msk.f32.mxu0 %vm4524_vm3, %v8958_v10  ;;  %v9181_v10 = vld [vmem:[%s11326_s20] sm:$0x1] }
0x4b73   :  { %10617 = vmatmul.mubr.msk.f32.vlgmr.msra.gmra.mrb[56].mxu0 %vm4524_vm3, %v8959_v27 }
0x4b74   :  { %10649 = vmatprep.mubr.msk.f32.mxu0 %vm11168_vm1, %v11167_v36  ;;  %10773 = vmatpush3.bf16.msra.mxu0 %v10760_v22 }
0x4b75   :  { %10774 = vmatprep.subr.bf16.mxu0 %v11180_v49 }
0x4b78   :  { %10776 = vmatpush3.bf16.msra.mxu0 %v10763_v52 }
0x4c46   :  { %v10618_v28 = vpop.f32.mrb[56].mxu0 }
0x4c47   :  { %v9052_v25 = vadd.f32 %v10618_v28, %v9721_v23  ;;  %v9046_v30 = vpop.f32.mrb[57].mxu0 }
0x4c48   :  { %v9047_v24 = vadd.f32 %v9721_v23, %v9046_v30  ;;  %v9365_v30 = vld [vmem:[%s11326_s20] sm:$0x1] }
0x4c49   :  { %v9056_v31 = vadd.f32 %v9052_v25, %v8850_v62 }
0x4c4a   :  { %v9055_v32 = vadd.f32 %v9047_v24, %v12309_v43 }
0x4c4b   :  { %v9062_v41 = vsel %vm140_vm0, %v9056_v31, 0.0 }
0x4c4c   :  { %9063 = vadd.xlane.f32.xlu1 %v9062_v41  ;;  %v9059_v34 = vsel %vm140_vm0, %v9055_v32, 0.0 }
0x4c4d   :  { %9060 = vadd.xlane.f32.xlu0 %v9059_v34 }
0x4cd9   :  { %v9064_v59 = vpop.xlane.xlu1 %9063 }
0x4cda   :  { %v9066_v38 = vmul.f32 0.03125, %v9064_v59  ;;  %v9061_v40 = vpop.xlane.xlu0 %9060 }
0x4cdb   :  { %v9065_v42 = vmul.f32 0.03125, %v9061_v40 }
0x4cdc   :  { %v9068_v18 = vsub.f32 %v9056_v31, %v9066_v38 }
0x4cdd   :  { %v9067_v45 = vsub.f32 %v9055_v32, %v9065_v42 }
0x4cde   :  { %v9070_v43 = vmul.f32 %v9068_v18, %v9068_v18 }
0x4cdf   :  { %v9069_v55 = vmul.f32 %v9067_v45, %v9067_v45 }
0x4ce0   :  { %v9074_v15 = vsel %vm140_vm0, %v9070_v43, 0.0  ;;  %v9269_v43 = vand.u32 127, %v2439_v56  ;;  %v9452_v56 = vstv %s9731_s24 }
0x4ce1   :  { %v9071_v33 = vsel %vm140_vm0, %v9069_v55, 0.0 }
0x4ce2   :  { %9072 = vadd.xlane.f32.xlu1 %v9071_v33  ;;  %vm9453_vm6 = vcmp.eq.s32.totalorder %v9269_v43, %v9452_v56 }
0x4ce6   :  { %9075 = vadd.xlane.f32.xlu1 %v9074_v15  ;;  %v9271_v15 = vstv %s9270_s19 }
0x4ce7   :  { %vm9272_vm5 = vcmp.eq.s32.totalorder %v9269_v43, %v9271_v15 }
0x4ce8   :  { %v9728_v22 = vsel %vm9272_vm5, 1.0, %v11167_v36 }
0x4d6f   :  { %v9073_v62 = vpop.xlane.xlu1 %9072 }
0x4d70   :  { %v9077_v54 = vmul.f32 0.03125, %v9073_v62 }
0x4d72   :  { %v9079_v29 = vadd.f32 1e-05, %v9077_v54 }
0x4d73   :  { %v9076_v37 = vpop.xlane.xlu1 %9075 }
0x4d74   :  { %11057 = vrsqrt.f32 %v9079_v29  ;;  %v9078_v61 = vmul.f32 0.03125, %v9076_v37 }
0x4d76   :  { %v9080_v63 = vadd.f32 1e-05, %v9078_v61 }
0x4d78   :  { %11059 = vrsqrt.f32 %v9080_v63  ;;  %v9732_v63 = vsel %vm9453_vm6, 1.0, %v11167_v36 }
0x4d7e   :  { %v11058_v53 = vpop.eup %11057 }
0x4d7f   :  { %v9083_v47 = vmul.f32 %v11058_v53, %v9067_v45 }
0x4d81   :  { %v9089_v48 = vmul.f32 %v9724_v0, %v9083_v47 }
0x4d82   :  { %v11060_v3 = vpop.eup %11059 }
0x4d83   :  { %v9084_v4 = vmul.f32 %v11060_v3, %v9068_v18  ;;  %v9095_v58 = vadd.f32 %v9725_v26, %v9089_v48 }
0x4d85   :  { %v9103_v5 = vrot.slane %v9095_v58, 1  ;;  %v9090_v6 = vmul.f32 %v9724_v0, %v9084_v4 }
0x4d87   :  { %10628 = vmatmul.mubr.msk.f32.vlgmr.msra.gmra.mrb[106].mxu1 %vm140_vm0, %v9103_v5  ;;  %v9096_v20 = vadd.f32 %v9725_v26, %v9090_v6 }
0x4d88   :  { %10638 = vmatprep.mubr.msk.f32.mxu1 %vm11168_vm1, %v11167_v36  ;;  %10767 = vmatpush3.bf16.msra.mxu1 %v10766_v50 }
0x4d89   :  { %v9287_v7 = vrot.slane %v9096_v20, 1  ;;  %10768 = vmatprep.subr.bf16.mxu1 %v11180_v49 }
0x4d8b   :  { %10650 = vmatmul.mubr.msk.f32.vlgmr.msra.gmra.mrb[58].mxu0 %vm140_vm0, %v9287_v7 }
0x4d8c   :  { %10770 = vmatpush3.bf16.msra.mxu1 %v10769_v39 }
0x4d8d   :  { %10777 = vmatprep.subr.bf16.mxu1 %v11180_v49 }
0x4e5a   :  { %v9172_v19 = vpop.f32.mrb[106].mxu1 }
0x4e5b   :  { %v9173_v12 = vadd.f32 %v9172_v19, %v9101_v11  ;;  %v10629_v13 = vpop.f32.mrb[107].mxu1 }
0x4e5d   :  { %11061 = vtanh.f32 %v9173_v12 }
0x4e5e   :  { %v9356_v1 = vpop.f32.mrb[58].mxu0 }
0x4e5f   :  { %v10651_v16 = vpop.f32.mrb[59].mxu0  ;;  %v9357_v17 = vadd.f32 %v9356_v1, %v9285_v14 }
0x4e61   :  { %11063 = vtanh.f32 %v9357_v17 }
0x4e67   :  { %v11062_v21 = vpop.eup %11061 }
0x4e68   :  { %10639 = vmatmul.mubr.msk.f32.vlgmr.msra.gmra.mrb[108].mxu1 %vm140_vm0, %v11062_v21 }
0x4e69   :  { %10779 = vmatpush3.bf16.msra.mxu1 %v10766_v50  ;;  %10660 = vmatprep.mubr.msk.f32.mxu1 %vm11168_vm1, %v11167_v36 }
0x4e6a   :  { %10780 = vmatprep.subr.bf16.mxu1 %v11180_v49 }
0x4e6b   :  { %v11064_v2 = vpop.eup %11063 }
0x4e6d   :  { %10782 = vmatpush3.bf16.msra.mxu1 %v10769_v39 }
0x4e70   :  { %10661 = vmatmul.mubr.msk.f32.vlgmr.msra.gmra.mrb[110].mxu1 %vm140_vm0, %v11064_v2 }
0x4f3b   :  { %v9251_v27 = vpop.f32.mrb[108].mxu1 }
0x4f3c   :  { %v9252_v23 = vadd.f32 %v9251_v27, %v9181_v10  ;;  %v10640_v28 = vpop.f32.mrb[109].mxu1 }
0x4f3e   :  { %v9257_v25 = vsel %vm9255_vm4, %v9252_v23, -inf  ;;  %9256 = vst.msk [vmem:[#allocation7] sm:$0x1] %vm9255_vm4, %v9252_v23 }
0x4f3f   :  { %9258 = vmax.xlane.f32.xlu1 %v9257_v25 }
0x4f43   :  { %v9435_v24 = vpop.f32.mrb[110].mxu1 }
0x4f44   :  { %v9436_v31 = vadd.f32 %v9435_v24, %v9365_v30  ;;  %v10662_v32 = vpop.f32.mrb[111].mxu1 }
0x4f46   :  { %9439 = vst.msk [vmem:[#allocation7 + $0x1] sm:$0x1] %vm9255_vm4, %v9436_v31  ;;  %v9440_v41 = vsel %vm9255_vm4, %v9436_v31, -inf }
0x4f47   :  { %9441 = vmax.xlane.f32.xlu1 %v9440_v41 }
0x4fcc   :  { %v9259_v34 = vpop.xlane.xlu1 %9258 }
0x4fcd   :  { %v9260_v59 = vsub.f32 %v9252_v23, %v9259_v34 }
0x4fcf   :  { %v9261_v38 = vmul.f32 1.442695, %v9260_v59 }
0x4fd1   :  { %11065 = vpow2.f32 %v9261_v38 }
0x4fd4   :  { %v9442_v18 = vpop.xlane.xlu1 %9441 }
0x4fd5   :  { %v9443_v55 = vsub.f32 %v9436_v31, %v9442_v18 }
0x4fd7   :  { %v9444_v33 = vmul.f32 1.442695, %v9443_v55 }
0x4fdb   :  { %v11066_v40 = vpop.eup %11065 }
0x4fdc   :  { %v9263_v42 = vsel %vm9255_vm4, %v11066_v40, 0.0 }
0x4fdd   :  { %9264 = vadd.xlane.f32.xlu1 %v9263_v42 }
0x506a   :  { %v9265_v45 = vpop.xlane.xlu1 %9264 }
0x506b   :  { %11067 = vlog2.f32 %v9265_v45 }
0x506c   :  { %11069 = vpow2.f32 %v9444_v33 }
0x5075   :  { %v11068_v46 = vpop.eup %11067 }
0x5076   :  { %v9267_v57 = vmul.f32 0.6931472, %v11068_v46  ;;  %v11070_v52 = vpop.eup %11069 }
0x5077   :  { %v9446_v62 = vsel %vm9255_vm4, %v11070_v52, 0.0 }
0x5078   :  { %v9275_v49 = vsub.f32 %v9260_v59, %v9267_v57 }
0x507a   :  { %v9276_v44 = vmul.f32 %v9728_v22, %v9275_v49 }
0x507c   :  { %v9277_v60 = vsel %vm9255_vm4, %v9276_v44, 0.0 }
0x507d   :  { %9278 = vadd.xlane.f32.xlu1 %v9277_v60 }
0x5081   :  { %9447 = vadd.xlane.f32.xlu1 %v9446_v62 }
0x510a   :  { %v9279_v54 = vpop.xlane.xlu1 %9278 }
0x510e   :  { %v9448_v29 = vpop.xlane.xlu1 %9447 }
0x510f   :  { %11071 = vlog2.f32 %v9448_v29 }
0x5119   :  { %v11072_v37 = vpop.eup %11071 }
0x511a   :  { %v9450_v61 = vmul.f32 0.6931472, %v11072_v37 }
0x511c   :  { %v9456_v53 = vsub.f32 %v9443_v55, %v9450_v61 }
0x511e   :  { %v9457_v0 = vmul.f32 %v9732_v63, %v9456_v53 }
0x5120   :  { %v9458_v47 = vsel %vm9255_vm4, %v9457_v0, 0.0 }
0x5121   :  { %9459 = vadd.xlane.f32.xlu0 %v9458_v47 }
0x5122   :  { %11098 = shalt.err (!%p11095_p9)
}
0x5123   :  { %s11099_s20 = scalar_lea.hbm %s11336_s4, 32 }
0x5124   :  { %p11100_p10 = scmp.ne.s32.totalorder %s11336_s4, %s11099_s20  ;;  %p11103_p11 = scmp.lt.u32.totalorder %s11099_s20, %s11336_s4 }
0x5126   :  { %p11105_p12 = pnand %p11103_p11, %p11100_p10 }
0x5128   :  { %11108 = shalt.err (!%p11105_p12)
}
0x5129   :  { %9484 = dma.vmem_to_hbm [thread:$0]  %s9482_s6, 32, %s11336_s4, [#allocation8]   ;;  %v9280_v36 = vsub.f32 0.0, %v9279_v54  ;;  %vm9463_vm7 = vcmask 0  }
0x512a   :  { %s11182_s0 = smov [#allocation6]  }
0x512b   :  { %s9471_s5 = sshll.u32 %s11182_s0, 4  ;;  %s9472_s5 = int_to_ptr.vmem [resolvable:$true] %s9471_s5 }
0x512c   :  { %s11109_s9 = scalar_lea.vmem %s9472_s5, 16  ;;  %s11113_s21 = scalar_lea.vmem %s9472_s5, 32 }
0x512d   :  { %p11110_p13 = scmp.ne.s32.totalorder %s9472_s5, %s11109_s9  ;;  %p11114_p0 = scmp.lt.s32.totalorder %s9472_s5, %s9472_s5 }
0x512e   :  { %p11115_p1 = scmp.lt.s32.totalorder %s11113_s21, %s11109_s9 }
0x5130   :  { %p11116_p2 = por %p11115_p1, %p11114_p0 }
0x5132   :  { %p11117_p3 = pnand %p11116_p2, %p11110_p13 }
0x51ae   :  { %v9460_v26 = vpop.xlane.xlu0 %9459 }
0x51af   :  { %v9461_v48 = vsub.f32 %v9280_v36, %v9460_v26 }
0x51b1   :  { %v9462_v3 = vmul.f32 0.5, %v9461_v48 }
0x51b3   :  { %9464 = vst.msk [vmem:[#allocation6] sm:$0x1] %vm9463_vm7, %v9462_v3 }
0x51b4   :  { %11120 = shalt.err (!%p11117_p3)
}
0x51b5   :  { %s11121_s4 = scalar_lea.hbm %s11331_s27, 16 }
0x51b6   :  { %p11122_p4 = scmp.ne.s32.totalorder %s11331_s27, %s11121_s4  ;;  %p11125_p5 = scmp.lt.u32.totalorder %s11121_s4, %s11331_s27 }
0x51b8   :  { %p11127_p6 = pnand %p11125_p5, %p11122_p4 }
0x51ba   :  { %11130 = shalt.err (!%p11127_p6)
}
0x51bb   :  { %9474 = dma.vmem_to_hbm [thread:$0]  %s9472_s5, 16, %s11331_s27, [#allocation4]  }
0x51bc   :  { %11133 = dma.done.wait [#allocation4], 16  }
0x51bd   :  { %11134 = vsyncadd [#allocation4], 4294967280 }
0x51be   :  { %11135 = dma.done.wait [#allocation8], 32  }
0x51bf   :  { %11136 = vsyncadd [#allocation8], 4294967264 }
0x51c0   :  { %9491 = vsyncpa [#allocation4], 1 }
0x51c1   :  { %9492 = vsyncpa [#allocation8], 1 }
0x51c2   :  { %9493 = vsyncpa [#allocation5], 1 }

</bundles_post_ra>
